<compile_context>
chip_gen: v5e
topology: v5e:2x2
jax: 0.10.0
libtpu: 0.0.40
codegen_flags: <defaults>
</compile_context>

<pallas_src>
import jax
import jax.numpy as jnp
from jax.experimental import pallas as pl
from jax.experimental.pallas import tpu as pltpu


def textrnn_kernel(ids_ref, wfused_ref, whh_ref, brnn_ref, h0_ref,
                   wout_ref, bout_ref, out_ref, xwb_ref):
    TB = ids_ref.shape[0]            # T * b_tile (time-major rows)
    b_tile = h0_ref.shape[0]
    T = TB // b_tile
    b_half = b_tile // 2
    V_pad = wfused_ref.shape[0]

    # ---- 1) embedding lookup through the PRE-FUSED (embed @ W_ih) table plus
    # bias, for ALL timesteps in one MXU pass — fully off the serial path.
    vocab_iota = jax.lax.broadcasted_iota(jnp.int32, (TB, V_pad), 1)
    onehot = (ids_ref[...] == vocab_iota).astype(jnp.bfloat16)          # (TB, V)
    xwb_ref[...] = (jnp.dot(onehot, wfused_ref[...],
                            preferred_element_type=jnp.float32)
                    + brnn_ref[...])                                    # (TB, H)

    # ---- 2) serial tanh recurrence over two INDEPENDENT batch half-tiles:
    # the LLO scheduler overlaps half-A's EUP tanh with half-B's MXU matmul.
    w_hh = whh_ref[...]
    h_a0 = h0_ref[0:b_half, :]                                          # f32
    h_b0 = h0_ref[b_half:b_tile, :]

    def step(t, carry):
        h_a, h_b = carry
        off_a = pl.multiple_of(t * b_tile, b_tile)
        off_b = pl.multiple_of(t * b_tile + b_half, b_half)
        xw_a = xwb_ref[pl.ds(off_a, b_half), :]
        xw_b = xwb_ref[pl.ds(off_b, b_half), :]
        h_a = jnp.tanh(xw_a + jnp.dot(h_a.astype(jnp.bfloat16), w_hh,
                                      preferred_element_type=jnp.float32))
        h_b = jnp.tanh(xw_b + jnp.dot(h_b.astype(jnp.bfloat16), w_hh,
                                      preferred_element_type=jnp.float32))
        return h_a, h_b

    h_a, h_b = jax.lax.fori_loop(0, T, step, (h_a0, h_b0),
                                 unroll=min(T, 8))

    # ---- 3) classifier: two lane-dense half-tile stores (full 128-lane rows).
    w_out = wout_ref[...]
    b_out = bout_ref[...]
    out_ref[0:b_half, :] = (jnp.dot(h_a.astype(jnp.bfloat16), w_out,
                                    preferred_element_type=jnp.float32) + b_out)
    out_ref[b_half:b_tile, :] = (jnp.dot(h_b.astype(jnp.bfloat16), w_out,
                                         preferred_element_type=jnp.float32) + b_out)


def textrnn_forward(ids, embed_w, w_ih, w_hh, b_rnn, h0, w_out, b_out,
                    *, b_tile=128):
    """ids: (B,T) int32; weights in 'math' layout (already transposed vs torch).

    b_tile: batch rows per grid step (multiple of 16, >= 32 so the kernel can
    split it into two bf16-friendly half-tiles). 128 saturates the MXU per
    serial step; on v7x pick b_tile so B_pad/b_tile >= 2 to use both TCs.
    """
    B, T = ids.shape
    V, E = embed_w.shape
    H = w_hh.shape[0]
    C = w_out.shape[1]

    def rup(x, m):
        return (x + m - 1) // m * m

    assert b_tile % 16 == 0 and b_tile >= 32, "b_tile must split into 16-row bf16 halves"
    B_pad = rup(B, b_tile)
    V_pad, H_pad, C_pad = rup(V, 128), rup(H, 128), rup(C, 128)
    n_tiles = B_pad // b_tile

    # Pre-fuse embedding + input projection in f32, then cast to bf16.
    # Zero pads keep padded hidden lanes exactly 0 through tanh(0)=0.
    w_fused = (jnp.zeros((V_pad, H_pad), jnp.float32)
               .at[:V, :H].set(embed_w @ w_ih).astype(jnp.bfloat16))
    whh_p  = jnp.zeros((H_pad, H_pad), jnp.float32).at[:H, :H].set(w_hh).astype(jnp.bfloat16)
    wout_p = jnp.zeros((H_pad, C_pad), jnp.float32).at[:H, :C].set(w_out).astype(jnp.bfloat16)
    brnn_p = jnp.zeros((1, H_pad), jnp.float32).at[:, :H].set(b_rnn)
    bout_p = jnp.zeros((1, C_pad), jnp.float32).at[:, :C].set(b_out)
    h0_p   = jnp.zeros((B_pad, H_pad), jnp.float32).at[:B, :H].set(h0)

    # ids: pad batch (pad rows use token 0, discarded at the end), then lay out
    # time-major per batch tile so every per-step access is a sublane-aligned
    # (b_half, H) slice at row offset t*b_tile (+ b_half).
    ids_p = jnp.zeros((B_pad, T), jnp.int32).at[:B, :].set(ids)
    ids_col = (ids_p.reshape(n_tiles, b_tile, T)
                     .transpose(0, 2, 1)
                     .reshape(n_tiles * T * b_tile, 1))

    # VMEM budget: double-buffered resident blocks + xwb scratch + headroom,
    # capped at 64 MiB so the same plan fits v7x's physical VMEM.
    blk_bytes = (T * b_tile * 4            # ids block
                 + V_pad * H_pad * 2       # fused table (bf16)
                 + H_pad * H_pad * 2       # W_hh
                 + H_pad * 4               # bias
                 + b_tile * H_pad * 4      # h0
                 + H_pad * C_pad * 2       # W_out
                 + C_pad * 4               # b_out
                 + b_tile * C_pad * 4)     # out block
    scratch_bytes = T * b_tile * H_pad * 4
    vmem_limit = min(max(2 * blk_bytes + scratch_bytes + (8 << 20), 32 << 20),
                     64 << 20)

    out_pad = pl.pallas_call(
        textrnn_kernel,
        out_shape=jax.ShapeDtypeStruct((B_pad, C_pad), jnp.float32),
        grid_spec=pltpu.PrefetchScalarGridSpec(
            num_scalar_prefetch=0,
            grid=(n_tiles,),
            in_specs=[
                pl.BlockSpec((T * b_tile, 1), lambda i: (i, 0)),   # ids (time-major)
                pl.BlockSpec((V_pad, H_pad),  lambda i: (0, 0)),   # embed @ W_ih (bf16)
                pl.BlockSpec((H_pad, H_pad),  lambda i: (0, 0)),   # W_hh
                pl.BlockSpec((1, H_pad),      lambda i: (0, 0)),   # b_ih + b_hh
                pl.BlockSpec((b_tile, H_pad), lambda i: (i, 0)),   # h0
                pl.BlockSpec((H_pad, C_pad),  lambda i: (0, 0)),   # W_out
                pl.BlockSpec((1, C_pad),      lambda i: (0, 0)),   # b_out
            ],
            out_specs=pl.BlockSpec((b_tile, C_pad), lambda i: (i, 0)),
            scratch_shapes=[pltpu.VMEM((T * b_tile, H_pad), jnp.float32)],
        ),
        compiler_params=pltpu.CompilerParams(
            dimension_semantics=("parallel",),     # batch tiles -> both TCs on v7x
            vmem_limit_bytes=vmem_limit),
    )(ids_col, w_fused, whh_p, brnn_p, h0_p, wout_p, bout_p)

    return out_pad[:B, :C]


def textrnn_reference(ids, embed_w, w_ih, w_hh, b_rnn, h0, w_out, b_out):
    """Pure-JAX reference: nn.Embedding + nn.RNN('tanh') + nn.Linear semantics.

    Mirrors the kernel's numerics (pre-fused embed@W_ih table rounded to bf16,
    bf16 weights/activations into the matmuls, f32 accumulation) so the
    comparison tolerance stays tight.
    """
    bf = lambda a: a.astype(jnp.bfloat16).astype(jnp.float32)
    xw = bf(embed_w @ w_ih)[ids] + b_rnn          # (B, T, H)
    wh, wo = bf(w_hh), bf(w_out)

    def step(h, xw_t):
        return jnp.tanh(xw_t + bf(h) @ wh), None

    h_final, _ = jax.lax.scan(step, h0, jnp.swapaxes(xw, 0, 1))
    return bf(h_final) @ wo + b_out               # (B, C)


if __name__ == "__main__":
    # Small, forward-consistent shapes.
    vocab_size, embedding_dim, hidden_size, num_classes = 100, 32, 32, 8
    batch_size, seq_len = 2, 8

    key = jax.random.PRNGKey(0)
    k_ids, k_emb, k_wih, k_whh, k_bih, k_bhh, k_h0, k_wout, k_bout = \
        jax.random.split(key, 9)

    ids = jax.random.randint(k_ids, (batch_size, seq_len), 0, vocab_size,
                             dtype=jnp.int32)

    # Deterministic synthetic parameters (shapes match the nn.Module __init__,
    # pre-transposed so the kernel computes x @ W rather than W @ x).
    embed_w = jax.random.normal(k_emb, (vocab_size, embedding_dim),
                                jnp.float32) * 0.1
    w_ih = jax.random.normal(k_wih, (embedding_dim, hidden_size),
                             jnp.float32) * 0.1   # weight_ih_l0.T
    w_hh = jax.random.normal(k_whh, (hidden_size, hidden_size),
                             jnp.float32) * 0.1   # weight_hh_l0.T
    b_rnn = (jax.random.normal(k_bih, (1, hidden_size), jnp.float32) * 0.1
             + jax.random.normal(k_bhh, (1, hidden_size), jnp.float32) * 0.1)
    h0 = jax.random.normal(k_h0, (batch_size, hidden_size), jnp.float32)
    w_out = jax.random.normal(k_wout, (hidden_size, num_classes),
                              jnp.float32) * 0.1  # hidden2label.weight.T
    b_out = jax.random.normal(k_bout, (1, num_classes), jnp.float32) * 0.1

    logits = textrnn_forward(ids, embed_w, w_ih, w_hh, b_rnn, h0, w_out, b_out)
    logits = jax.block_until_ready(logits)

    ref = textrnn_reference(ids, embed_w, w_ih, w_hh, b_rnn, h0, w_out, b_out)
    assert logits.shape == (batch_size, num_classes)
    err = jnp.max(jnp.abs(logits - ref))
    assert jnp.allclose(logits, ref, atol=2e-3, rtol=2e-3), f"mismatch: {err}"

    print("KERNEL_OK")
</pallas_src>

<mosaic_0001>
module attributes {stable_mosaic.version = 11 : i64} {
  func.func @textrnn_kernel(%arg0: i32, %arg1: memref<1024x1xi32, #tpu.memory_space<vmem>>, %arg2: memref<128x128xbf16, #tpu.memory_space<vmem>>, %arg3: memref<128x128xbf16, #tpu.memory_space<vmem>>, %arg4: memref<1x128xf32, #tpu.memory_space<vmem>>, %arg5: memref<128x128xf32, #tpu.memory_space<vmem>>, %arg6: memref<128x128xbf16, #tpu.memory_space<vmem>>, %arg7: memref<1x128xf32, #tpu.memory_space<vmem>>, %arg8: memref<128x128xf32, #tpu.memory_space<vmem>>, %arg9: memref<1024x128xf32, #tpu.memory_space<vmem>>) attributes {dimension_semantics = [#tpu.dimension_semantics<parallel>], iteration_bounds = array<i64: 1>, scalar_prefetch = 0 : i64, scratch_operands = 1 : i64, tpu.core_type = #tpu.core_type<tc>, window_params = [{transform_indices = @transform_0, window_bounds = array<i64: 1024, 1>}, {pipeline_mode = #tpu.pipeline_mode<synchronous>, transform_indices = @transform_1, window_bounds = array<i64: 128, 128>}, {pipeline_mode = #tpu.pipeline_mode<synchronous>, transform_indices = @transform_2, window_bounds = array<i64: 128, 128>}, {pipeline_mode = #tpu.pipeline_mode<synchronous>, transform_indices = @transform_3, window_bounds = array<i64: 1, 128>}, {transform_indices = @transform_4, window_bounds = array<i64: 128, 128>}, {pipeline_mode = #tpu.pipeline_mode<synchronous>, transform_indices = @transform_5, window_bounds = array<i64: 128, 128>}, {pipeline_mode = #tpu.pipeline_mode<synchronous>, transform_indices = @transform_6, window_bounds = array<i64: 1, 128>}, {transform_indices = @transform_7, window_bounds = array<i64: 128, 128>}]} {
    %0 = tpu.iota {dimensions = array<i32: 1>} : vector<1024x128xi32>
    %c0 = arith.constant 0 : index
    %c0_0 = arith.constant 0 : index
    %1 = vector.load %arg1[%c0, %c0_0] : memref<1024x1xi32, #tpu.memory_space<vmem>>, vector<1024x1xi32>
    %2 = vector.broadcast %1 : vector<1024x1xi32> to vector<1024x128xi32>
    %3 = arith.cmpi eq, %2, %0 : vector<1024x128xi32>
    %4 = arith.extui %3 : vector<1024x128xi1> to vector<1024x128xi32>
    %5 = arith.sitofp %4 : vector<1024x128xi32> to vector<1024x128xf32>
    %6 = arith.truncf %5 : vector<1024x128xf32> to vector<1024x128xbf16>
    %c0_1 = arith.constant 0 : index
    %c0_2 = arith.constant 0 : index
    %7 = vector.load %arg2[%c0_1, %c0_2] : memref<128x128xbf16, #tpu.memory_space<vmem>>, vector<128x128xbf16>
    %cst = arith.constant dense<0.000000e+00> : vector<1024x128xf32>
    %8 = tpu.matmul %6, %7, %cst {dimension_numbers = #tpu.dot_dimension_numbers<[1], [0], [0], [1], [0, 0, 1, 1], [], []>} : vector<1024x128xbf16>, vector<128x128xbf16>, vector<1024x128xf32> -> vector<1024x128xf32>
    %c0_3 = arith.constant 0 : index
    %c0_4 = arith.constant 0 : index
    %9 = vector.load %arg4[%c0_3, %c0_4] : memref<1x128xf32, #tpu.memory_space<vmem>>, vector<1x128xf32>
    %10 = vector.broadcast %9 : vector<1x128xf32> to vector<1024x128xf32>
    %11 = arith.addf %8, %10 : vector<1024x128xf32>
    %c0_5 = arith.constant 0 : index
    %c0_6 = arith.constant 0 : index
    %12 = vector.load %arg9[%c0_5, %c0_6] : memref<1024x128xf32, #tpu.memory_space<vmem>>, vector<1024x128xf32>
    tpu.vector_store %arg9[%c0_5, %c0_6], %11 {strides = array<i32>} : memref<1024x128xf32, #tpu.memory_space<vmem>>, vector<1024x128xf32>,
    %c0_7 = arith.constant 0 : index
    %c0_8 = arith.constant 0 : index
    %13 = vector.load %arg3[%c0_7, %c0_8] : memref<128x128xbf16, #tpu.memory_space<vmem>>, vector<128x128xbf16>
    %c0_9 = arith.constant 0 : index
    %c0_10 = arith.constant 0 : index
    %14 = vector.load %arg5[%c0_9, %c0_10] : memref<128x128xf32, #tpu.memory_space<vmem>>, vector<64x128xf32>
    %c64 = arith.constant 64 : index
    %c0_11 = arith.constant 0 : index
    %15 = vector.load %arg5[%c64, %c0_11] : memref<128x128xf32, #tpu.memory_space<vmem>>, vector<64x128xf32>
    %c0_i32 = arith.constant 0 : i32
    %c128_i32 = arith.constant 128 : i32
    %16 = arith.muli %c0_i32, %c128_i32 : i32
    %17 = tpu.assume_multiple %16, 128 : i32
    %c128_i32_12 = arith.constant 128 : i32
    %18 = arith.muli %c0_i32, %c128_i32_12 : i32
    %c64_i32 = arith.constant 64 : i32
    %19 = arith.addi %18, %c64_i32 : i32
    %20 = tpu.assume_multiple %19, 64 : i32
    %21 = arith.index_cast %17 : i32 to index
    %c0_13 = arith.constant 0 : index
    %22 = vector.load %arg9[%21, %c0_13] : memref<1024x128xf32, #tpu.memory_space<vmem>>, vector<64x128xf32>
    %23 = arith.index_cast %20 : i32 to index
    %c0_14 = arith.constant 0 : index
    %24 = vector.load %arg9[%23, %c0_14] : memref<1024x128xf32, #tpu.memory_space<vmem>>, vector<64x128xf32>
    %25 = arith.truncf %14 : vector<64x128xf32> to vector<64x128xbf16>
    %cst_15 = arith.constant dense<0.000000e+00> : vector<64x128xf32>
    %26 = tpu.matmul %25, %13, %cst_15 {dimension_numbers = #tpu.dot_dimension_numbers<[1], [0], [0], [1], [0, 0, 1, 1], [], []>} : vector<64x128xbf16>, vector<128x128xbf16>, vector<64x128xf32> -> vector<64x128xf32>
    %27 = arith.addf %22, %26 : vector<64x128xf32>
    %28 = math.tanh %27 : vector<64x128xf32>
    %29 = arith.truncf %15 : vector<64x128xf32> to vector<64x128xbf16>
    %cst_16 = arith.constant dense<0.000000e+00> : vector<64x128xf32>
    %30 = tpu.matmul %29, %13, %cst_16 {dimension_numbers = #tpu.dot_dimension_numbers<[1], [0], [0], [1], [0, 0, 1, 1], [], []>} : vector<64x128xbf16>, vector<128x128xbf16>, vector<64x128xf32> -> vector<64x128xf32>
    %31 = arith.addf %24, %30 : vector<64x128xf32>
    %32 = math.tanh %31 : vector<64x128xf32>
    %c1_i32 = arith.constant 1 : i32
    %c128_i32_17 = arith.constant 128 : i32
    %33 = arith.muli %c1_i32, %c128_i32_17 : i32
    %34 = tpu.assume_multiple %33, 128 : i32
    %c128_i32_18 = arith.constant 128 : i32
    %35 = arith.muli %c1_i32, %c128_i32_18 : i32
    %c64_i32_19 = arith.constant 64 : i32
    %36 = arith.addi %35, %c64_i32_19 : i32
    %37 = tpu.assume_multiple %36, 64 : i32
    %38 = arith.index_cast %34 : i32 to index
    %c0_20 = arith.constant 0 : index
    %39 = vector.load %arg9[%38, %c0_20] : memref<1024x128xf32, #tpu.memory_space<vmem>>, vector<64x128xf32>
    %40 = arith.index_cast %37 : i32 to index
    %c0_21 = arith.constant 0 : index
    %41 = vector.load %arg9[%40, %c0_21] : memref<1024x128xf32, #tpu.memory_space<vmem>>, vector<64x128xf32>
    %42 = arith.truncf %28 : vector<64x128xf32> to vector<64x128xbf16>
    %cst_22 = arith.constant dense<0.000000e+00> : vector<64x128xf32>
    %43 = tpu.matmul %42, %13, %cst_22 {dimension_numbers = #tpu.dot_dimension_numbers<[1], [0], [0], [1], [0, 0, 1, 1], [], []>} : vector<64x128xbf16>, vector<128x128xbf16>, vector<64x128xf32> -> vector<64x128xf32>
    %44 = arith.addf %39, %43 : vector<64x128xf32>
    %45 = math.tanh %44 : vector<64x128xf32>
    %46 = arith.truncf %32 : vector<64x128xf32> to vector<64x128xbf16>
    %cst_23 = arith.constant dense<0.000000e+00> : vector<64x128xf32>
    %47 = tpu.matmul %46, %13, %cst_23 {dimension_numbers = #tpu.dot_dimension_numbers<[1], [0], [0], [1], [0, 0, 1, 1], [], []>} : vector<64x128xbf16>, vector<128x128xbf16>, vector<64x128xf32> -> vector<64x128xf32>
    %48 = arith.addf %41, %47 : vector<64x128xf32>
    %49 = math.tanh %48 : vector<64x128xf32>
    %c2_i32 = arith.constant 2 : i32
    %c128_i32_24 = arith.constant 128 : i32
    %50 = arith.muli %c2_i32, %c128_i32_24 : i32
    %51 = tpu.assume_multiple %50, 128 : i32
    %c128_i32_25 = arith.constant 128 : i32
    %52 = arith.muli %c2_i32, %c128_i32_25 : i32
    %c64_i32_26 = arith.constant 64 : i32
    %53 = arith.addi %52, %c64_i32_26 : i32
    %54 = tpu.assume_multiple %53, 64 : i32
    %55 = arith.index_cast %51 : i32 to index
    %c0_27 = arith.constant 0 : index
    %56 = vector.load %arg9[%55, %c0_27] : memref<1024x128xf32, #tpu.memory_space<vmem>>, vector<64x128xf32>
    %57 = arith.index_cast %54 : i32 to index
    %c0_28 = arith.constant 0 : index
    %58 = vector.load %arg9[%57, %c0_28] : memref<1024x128xf32, #tpu.memory_space<vmem>>, vector<64x128xf32>
    %59 = arith.truncf %45 : vector<64x128xf32> to vector<64x128xbf16>
    %cst_29 = arith.constant dense<0.000000e+00> : vector<64x128xf32>
    %60 = tpu.matmul %59, %13, %cst_29 {dimension_numbers = #tpu.dot_dimension_numbers<[1], [0], [0], [1], [0, 0, 1, 1], [], []>} : vector<64x128xbf16>, vector<128x128xbf16>, vector<64x128xf32> -> vector<64x128xf32>
    %61 = arith.addf %56, %60 : vector<64x128xf32>
    %62 = math.tanh %61 : vector<64x128xf32>
    %63 = arith.truncf %49 : vector<64x128xf32> to vector<64x128xbf16>
    %cst_30 = arith.constant dense<0.000000e+00> : vector<64x128xf32>
    %64 = tpu.matmul %63, %13, %cst_30 {dimension_numbers = #tpu.dot_dimension_numbers<[1], [0], [0], [1], [0, 0, 1, 1], [], []>} : vector<64x128xbf16>, vector<128x128xbf16>, vector<64x128xf32> -> vector<64x128xf32>
    %65 = arith.addf %58, %64 : vector<64x128xf32>
    %66 = math.tanh %65 : vector<64x128xf32>
    %c3_i32 = arith.constant 3 : i32
    %c128_i32_31 = arith.constant 128 : i32
    %67 = arith.muli %c3_i32, %c128_i32_31 : i32
    %68 = tpu.assume_multiple %67, 128 : i32
    %c128_i32_32 = arith.constant 128 : i32
    %69 = arith.muli %c3_i32, %c128_i32_32 : i32
    %c64_i32_33 = arith.constant 64 : i32
    %70 = arith.addi %69, %c64_i32_33 : i32
    %71 = tpu.assume_multiple %70, 64 : i32
    %72 = arith.index_cast %68 : i32 to index
    %c0_34 = arith.constant 0 : index
    %73 = vector.load %arg9[%72, %c0_34] : memref<1024x128xf32, #tpu.memory_space<vmem>>, vector<64x128xf32>
    %74 = arith.index_cast %71 : i32 to index
    %c0_35 = arith.constant 0 : index
    %75 = vector.load %arg9[%74, %c0_35] : memref<1024x128xf32, #tpu.memory_space<vmem>>, vector<64x128xf32>
    %76 = arith.truncf %62 : vector<64x128xf32> to vector<64x128xbf16>
    %cst_36 = arith.constant dense<0.000000e+00> : vector<64x128xf32>
    %77 = tpu.matmul %76, %13, %cst_36 {dimension_numbers = #tpu.dot_dimension_numbers<[1], [0], [0], [1], [0, 0, 1, 1], [], []>} : vector<64x128xbf16>, vector<128x128xbf16>, vector<64x128xf32> -> vector<64x128xf32>
    %78 = arith.addf %73, %77 : vector<64x128xf32>
    %79 = math.tanh %78 : vector<64x128xf32>
    %80 = arith.truncf %66 : vector<64x128xf32> to vector<64x128xbf16>
    %cst_37 = arith.constant dense<0.000000e+00> : vector<64x128xf32>
    %81 = tpu.matmul %80, %13, %cst_37 {dimension_numbers = #tpu.dot_dimension_numbers<[1], [0], [0], [1], [0, 0, 1, 1], [], []>} : vector<64x128xbf16>, vector<128x128xbf16>, vector<64x128xf32> -> vector<64x128xf32>
    %82 = arith.addf %75, %81 : vector<64x128xf32>
    %83 = math.tanh %82 : vector<64x128xf32>
    %c4_i32 = arith.constant 4 : i32
    %c128_i32_38 = arith.constant 128 : i32
    %84 = arith.muli %c4_i32, %c128_i32_38 : i32
    %85 = tpu.assume_multiple %84, 128 : i32
    %c128_i32_39 = arith.constant 128 : i32
    %86 = arith.muli %c4_i32, %c128_i32_39 : i32
    %c64_i32_40 = arith.constant 64 : i32
    %87 = arith.addi %86, %c64_i32_40 : i32
    %88 = tpu.assume_multiple %87, 64 : i32
    %89 = arith.index_cast %85 : i32 to index
    %c0_41 = arith.constant 0 : index
    %90 = vector.load %arg9[%89, %c0_41] : memref<1024x128xf32, #tpu.memory_space<vmem>>, vector<64x128xf32>
    %91 = arith.index_cast %88 : i32 to index
    %c0_42 = arith.constant 0 : index
    %92 = vector.load %arg9[%91, %c0_42] : memref<1024x128xf32, #tpu.memory_space<vmem>>, vector<64x128xf32>
    %93 = arith.truncf %79 : vector<64x128xf32> to vector<64x128xbf16>
    %cst_43 = arith.constant dense<0.000000e+00> : vector<64x128xf32>
    %94 = tpu.matmul %93, %13, %cst_43 {dimension_numbers = #tpu.dot_dimension_numbers<[1], [0], [0], [1], [0, 0, 1, 1], [], []>} : vector<64x128xbf16>, vector<128x128xbf16>, vector<64x128xf32> -> vector<64x128xf32>
    %95 = arith.addf %90, %94 : vector<64x128xf32>
    %96 = math.tanh %95 : vector<64x128xf32>
    %97 = arith.truncf %83 : vector<64x128xf32> to vector<64x128xbf16>
    %cst_44 = arith.constant dense<0.000000e+00> : vector<64x128xf32>
    %98 = tpu.matmul %97, %13, %cst_44 {dimension_numbers = #tpu.dot_dimension_numbers<[1], [0], [0], [1], [0, 0, 1, 1], [], []>} : vector<64x128xbf16>, vector<128x128xbf16>, vector<64x128xf32> -> vector<64x128xf32>
    %99 = arith.addf %92, %98 : vector<64x128xf32>
    %100 = math.tanh %99 : vector<64x128xf32>
    %c5_i32 = arith.constant 5 : i32
    %c128_i32_45 = arith.constant 128 : i32
    %101 = arith.muli %c5_i32, %c128_i32_45 : i32
    %102 = tpu.assume_multiple %101, 128 : i32
    %c128_i32_46 = arith.constant 128 : i32
    %103 = arith.muli %c5_i32, %c128_i32_46 : i32
    %c64_i32_47 = arith.constant 64 : i32
    %104 = arith.addi %103, %c64_i32_47 : i32
    %105 = tpu.assume_multiple %104, 64 : i32
    %106 = arith.index_cast %102 : i32 to index
    %c0_48 = arith.constant 0 : index
    %107 = vector.load %arg9[%106, %c0_48] : memref<1024x128xf32, #tpu.memory_space<vmem>>, vector<64x128xf32>
    %108 = arith.index_cast %105 : i32 to index
    %c0_49 = arith.constant 0 : index
    %109 = vector.load %arg9[%108, %c0_49] : memref<1024x128xf32, #tpu.memory_space<vmem>>, vector<64x128xf32>
    %110 = arith.truncf %96 : vector<64x128xf32> to vector<64x128xbf16>
    %cst_50 = arith.constant dense<0.000000e+00> : vector<64x128xf32>
    %111 = tpu.matmul %110, %13, %cst_50 {dimension_numbers = #tpu.dot_dimension_numbers<[1], [0], [0], [1], [0, 0, 1, 1], [], []>} : vector<64x128xbf16>, vector<128x128xbf16>, vector<64x128xf32> -> vector<64x128xf32>
    %112 = arith.addf %107, %111 : vector<64x128xf32>
    %113 = math.tanh %112 : vector<64x128xf32>
    %114 = arith.truncf %100 : vector<64x128xf32> to vector<64x128xbf16>
    %cst_51 = arith.constant dense<0.000000e+00> : vector<64x128xf32>
    %115 = tpu.matmul %114, %13, %cst_51 {dimension_numbers = #tpu.dot_dimension_numbers<[1], [0], [0], [1], [0, 0, 1, 1], [], []>} : vector<64x128xbf16>, vector<128x128xbf16>, vector<64x128xf32> -> vector<64x128xf32>
    %116 = arith.addf %109, %115 : vector<64x128xf32>
    %117 = math.tanh %116 : vector<64x128xf32>
    %c6_i32 = arith.constant 6 : i32
    %c128_i32_52 = arith.constant 128 : i32
    %118 = arith.muli %c6_i32, %c128_i32_52 : i32
    %119 = tpu.assume_multiple %118, 128 : i32
    %c128_i32_53 = arith.constant 128 : i32
    %120 = arith.muli %c6_i32, %c128_i32_53 : i32
    %c64_i32_54 = arith.constant 64 : i32
    %121 = arith.addi %120, %c64_i32_54 : i32
    %122 = tpu.assume_multiple %121, 64 : i32
    %123 = arith.index_cast %119 : i32 to index
    %c0_55 = arith.constant 0 : index
    %124 = vector.load %arg9[%123, %c0_55] : memref<1024x128xf32, #tpu.memory_space<vmem>>, vector<64x128xf32>
    %125 = arith.index_cast %122 : i32 to index
    %c0_56 = arith.constant 0 : index
    %126 = vector.load %arg9[%125, %c0_56] : memref<1024x128xf32, #tpu.memory_space<vmem>>, vector<64x128xf32>
    %127 = arith.truncf %113 : vector<64x128xf32> to vector<64x128xbf16>
    %cst_57 = arith.constant dense<0.000000e+00> : vector<64x128xf32>
    %128 = tpu.matmul %127, %13, %cst_57 {dimension_numbers = #tpu.dot_dimension_numbers<[1], [0], [0], [1], [0, 0, 1, 1], [], []>} : vector<64x128xbf16>, vector<128x128xbf16>, vector<64x128xf32> -> vector<64x128xf32>
    %129 = arith.addf %124, %128 : vector<64x128xf32>
    %130 = math.tanh %129 : vector<64x128xf32>
    %131 = arith.truncf %117 : vector<64x128xf32> to vector<64x128xbf16>
    %cst_58 = arith.constant dense<0.000000e+00> : vector<64x128xf32>
    %132 = tpu.matmul %131, %13, %cst_58 {dimension_numbers = #tpu.dot_dimension_numbers<[1], [0], [0], [1], [0, 0, 1, 1], [], []>} : vector<64x128xbf16>, vector<128x128xbf16>, vector<64x128xf32> -> vector<64x128xf32>
    %133 = arith.addf %126, %132 : vector<64x128xf32>
    %134 = math.tanh %133 : vector<64x128xf32>
    %c7_i32 = arith.constant 7 : i32
    %c128_i32_59 = arith.constant 128 : i32
    %135 = arith.muli %c7_i32, %c128_i32_59 : i32
    %136 = tpu.assume_multiple %135, 128 : i32
    %c128_i32_60 = arith.constant 128 : i32
    %137 = arith.muli %c7_i32, %c128_i32_60 : i32
    %c64_i32_61 = arith.constant 64 : i32
    %138 = arith.addi %137, %c64_i32_61 : i32
    %139 = tpu.assume_multiple %138, 64 : i32
    %140 = arith.index_cast %136 : i32 to index
    %c0_62 = arith.constant 0 : index
    %141 = vector.load %arg9[%140, %c0_62] : memref<1024x128xf32, #tpu.memory_space<vmem>>, vector<64x128xf32>
    %142 = arith.index_cast %139 : i32 to index
    %c0_63 = arith.constant 0 : index
    %143 = vector.load %arg9[%142, %c0_63] : memref<1024x128xf32, #tpu.memory_space<vmem>>, vector<64x128xf32>
    %144 = arith.truncf %130 : vector<64x128xf32> to vector<64x128xbf16>
    %cst_64 = arith.constant dense<0.000000e+00> : vector<64x128xf32>
    %145 = tpu.matmul %144, %13, %cst_64 {dimension_numbers = #tpu.dot_dimension_numbers<[1], [0], [0], [1], [0, 0, 1, 1], [], []>} : vector<64x128xbf16>, vector<128x128xbf16>, vector<64x128xf32> -> vector<64x128xf32>
    %146 = arith.addf %141, %145 : vector<64x128xf32>
    %147 = math.tanh %146 : vector<64x128xf32>
    %148 = arith.truncf %134 : vector<64x128xf32> to vector<64x128xbf16>
    %cst_65 = arith.constant dense<0.000000e+00> : vector<64x128xf32>
    %149 = tpu.matmul %148, %13, %cst_65 {dimension_numbers = #tpu.dot_dimension_numbers<[1], [0], [0], [1], [0, 0, 1, 1], [], []>} : vector<64x128xbf16>, vector<128x128xbf16>, vector<64x128xf32> -> vector<64x128xf32>
    %150 = arith.addf %143, %149 : vector<64x128xf32>
    %151 = math.tanh %150 : vector<64x128xf32>
    %c8_i32 = arith.constant 8 : i32
    %c0_66 = arith.constant 0 : index
    %c0_67 = arith.constant 0 : index
    %152 = vector.load %arg6[%c0_66, %c0_67] : memref<128x128xbf16, #tpu.memory_space<vmem>>, vector<128x128xbf16>
    %c0_68 = arith.constant 0 : index
    %c0_69 = arith.constant 0 : index
    %153 = vector.load %arg7[%c0_68, %c0_69] : memref<1x128xf32, #tpu.memory_space<vmem>>, vector<1x128xf32>
    %154 = arith.truncf %147 : vector<64x128xf32> to vector<64x128xbf16>
    %cst_70 = arith.constant dense<0.000000e+00> : vector<64x128xf32>
    %155 = tpu.matmul %154, %152, %cst_70 {dimension_numbers = #tpu.dot_dimension_numbers<[1], [0], [0], [1], [0, 0, 1, 1], [], []>} : vector<64x128xbf16>, vector<128x128xbf16>, vector<64x128xf32> -> vector<64x128xf32>
    %156 = vector.broadcast %153 : vector<1x128xf32> to vector<64x128xf32>
    %157 = arith.addf %155, %156 : vector<64x128xf32>
    %c0_71 = arith.constant 0 : index
    %c0_72 = arith.constant 0 : index
    %158 = vector.load %arg8[%c0_71, %c0_72] : memref<128x128xf32, #tpu.memory_space<vmem>>, vector<64x128xf32>
    tpu.vector_store %arg8[%c0_71, %c0_72], %157 {strides = array<i32>} : memref<128x128xf32, #tpu.memory_space<vmem>>, vector<64x128xf32>,
    %159 = arith.truncf %151 : vector<64x128xf32> to vector<64x128xbf16>
    %cst_73 = arith.constant dense<0.000000e+00> : vector<64x128xf32>
    %160 = tpu.matmul %159, %152, %cst_73 {dimension_numbers = #tpu.dot_dimension_numbers<[1], [0], [0], [1], [0, 0, 1, 1], [], []>} : vector<64x128xbf16>, vector<128x128xbf16>, vector<64x128xf32> -> vector<64x128xf32>
    %161 = vector.broadcast %153 : vector<1x128xf32> to vector<64x128xf32>
    %162 = arith.addf %160, %161 : vector<64x128xf32>
    %c64_74 = arith.constant 64 : index
    %c0_75 = arith.constant 0 : index
    %163 = vector.load %arg8[%c64_74, %c0_75] : memref<128x128xf32, #tpu.memory_space<vmem>>, vector<64x128xf32>
    tpu.vector_store %arg8[%c64_74, %c0_75], %162 {strides = array<i32>} : memref<128x128xf32, #tpu.memory_space<vmem>>, vector<64x128xf32>,
    return
  }
  func.func @transform_0(%arg0: i32) -> (i32, i32) {
    %c0_i32 = arith.constant 0 : i32
    %c0_i32_0 = arith.constant 0 : i32
    return %arg0, %c0_i32 : i32, i32
  }
  func.func @transform_1(%arg0: i32) -> (i32, i32) {
    %c0_i32 = arith.constant 0 : i32
    %c0_i32_0 = arith.constant 0 : i32
    %c0_i32_1 = arith.constant 0 : i32
    return %c0_i32, %c0_i32_0 : i32, i32
  }
  func.func @transform_2(%arg0: i32) -> (i32, i32) {
    %c0_i32 = arith.constant 0 : i32
    %c0_i32_0 = arith.constant 0 : i32
    %c0_i32_1 = arith.constant 0 : i32
    return %c0_i32, %c0_i32_0 : i32, i32
  }
  func.func @transform_3(%arg0: i32) -> (i32, i32) {
    %c0_i32 = arith.constant 0 : i32
    %c0_i32_0 = arith.constant 0 : i32
    %c0_i32_1 = arith.constant 0 : i32
    return %c0_i32, %c0_i32_0 : i32, i32
  }
  func.func @transform_4(%arg0: i32) -> (i32, i32) {
    %c0_i32 = arith.constant 0 : i32
    %c0_i32_0 = arith.constant 0 : i32
    return %arg0, %c0_i32 : i32, i32
  }
  func.func @transform_5(%arg0: i32) -> (i32, i32) {
    %c0_i32 = arith.constant 0 : i32
    %c0_i32_0 = arith.constant 0 : i32
    %c0_i32_1 = arith.constant 0 : i32
    return %c0_i32, %c0_i32_0 : i32, i32
  }
  func.func @transform_6(%arg0: i32) -> (i32, i32) {
    %c0_i32 = arith.constant 0 : i32
    %c0_i32_0 = arith.constant 0 : i32
    %c0_i32_1 = arith.constant 0 : i32
    return %c0_i32, %c0_i32_0 : i32, i32
  }
  func.func @transform_7(%arg0: i32) -> (i32, i32) {
    %c0_i32 = arith.constant 0 : i32
    %c0_i32_0 = arith.constant 0 : i32
    return %arg0, %c0_i32 : i32, i32
  }
}

</mosaic_0001>

<bundles_post_ra>
// kernel: tpu_custom_call.1
= control target key start
LH: loop header
LB: loop body
LE: loop exit
PB: predicated region body
PF: predicated region fallthrough
CT: control target
= control target key end

     0   :  { %v3392_v3 = vmov 0   ;;  %s4830_s0 = inlined_call_operand.vmem [shape: s32[1024,1], index: 0, kind: input, shape index: {}]   ;;  %s4831_s1 = inlined_call_operand.vmem [shape: bf16[128,128], index: 1, kind: input, shape index: {}]   ;;  %s4832_s2 = inlined_call_operand.vmem [shape: bf16[128,128], index: 2, kind: input, shape index: {}]   ;;  %s4833_s3 = inlined_call_operand.vmem [shape: f32[1,128], index: 3, kind: input, shape index: {}]   ;;  %s4834_s4 = inlined_call_operand.vmem [shape: f32[128,128], index: 4, kind: input, shape index: {}]   ;;  %s4835_s5 = inlined_call_operand.vmem [shape: bf16[128,128], index: 5, kind: input, shape index: {}]   ;;  %s4836_s6 = inlined_call_operand.vmem [shape: f32[1,128], index: 6, kind: input, shape index: {}]   ;;  %s4837_s7 = inlined_call_operand.hbm [shape: f32[128,128], index: 7, kind: output, shape index: {}]  }
   0x1   :  { %v117_v0 = vld [vmem:[%s4830_s0 + $0x2c0] sm:$0xff]  ;;  %v99_v1 = vld [vmem:[%s4830_s0 + $0x230] sm:$0xff]  ;;  %3096 = vset.pattern.permute.xlu2 %v3392_v3  ;;  %3095 = vset.pattern.permute.xlu1 %v3392_v3 }
   0x2   :  { %v97_v2 = vld [vmem:[%s4830_s0 + $0x220] sm:$0xff]  ;;  %3094 = vset.pattern.permute.xlu0 %v3392_v3  ;;  %422 = vperm.xlu1 %3095, %v117_v0  }
   0x3   :  { %368 = vperm.xlu2 %3096, %v99_v1   ;;  %362 = vperm.xlu0 %3094, %v97_v2  }
   0x4   :  { %12 = vsyncpa [#allocation4], 0  ;;  %v118_v4 = vld [vmem:[%s4830_s0 + $0x2c8] sm:$0xff]  ;;  %v100_v5 = vld [vmem:[%s4830_s0 + $0x238] sm:$0xff]  ;;  %v27_v60 = vlaneseq  ;;  %s2677_s26 = sshll.u32 %s4837_s7, 4  ;;  %s3396_s27 = smov 8   ;;  %s2678_s26 = int_to_ptr.hbm [resolvable:$true] %s2677_s26 }
   0x5   :  { %v98_v6 = vld [vmem:[%s4830_s0 + $0x228] sm:$0xff]  ;;  %v120_v7 = vld [vmem:[%s4830_s0 + $0x2d8] sm:$0xff]  ;;  %v101_v8 = vld [vmem:[%s4830_s0 + $0x240] sm:$0xff] }
   0x6   :  { %v119_v9 = vld [vmem:[%s4830_s0 + $0x2d0] sm:$0xff]  ;;  %v121_v10 = vld [vmem:[%s4830_s0 + $0x2e0] sm:$0xff]  ;;  %v122_v11 = vld [vmem:[%s4830_s0 + $0x2e8] sm:$0xff]  ;;  %v3629_v2 = vand.u32 127, %v27_v60 }
   0x7   :  { %v102_v12 = vld [vmem:[%s4830_s0 + $0x248] sm:$0xff]  ;;  %v104_v13 = vld [vmem:[%s4830_s0 + $0x258] sm:$0xff]  ;;  %v123_v14 = vld [vmem:[%s4830_s0 + $0x2f0] sm:$0xff] }
   0x8   :  { %v103_v15 = vld [vmem:[%s4830_s0 + $0x250] sm:$0xff]  ;;  %v105_v16 = vld [vmem:[%s4830_s0 + $0x260] sm:$0xff]  ;;  %v106_v17 = vld [vmem:[%s4830_s0 + $0x268] sm:$0xff] }
   0x9   :  { %v124_v18 = vld [vmem:[%s4830_s0 + $0x2f8] sm:$0xff]  ;;  %v126_v19 = vld [vmem:[%s4830_s0 + $0x308] sm:$0xff]  ;;  %v107_v20 = vld [vmem:[%s4830_s0 + $0x270] sm:$0xff] }
   0xa   :  { %425 = vperm.xlu1 %3095, %v118_v4   ;;  %v125_v21 = vld [vmem:[%s4830_s0 + $0x300] sm:$0xff]  ;;  %v127_v22 = vld [vmem:[%s4830_s0 + $0x310] sm:$0xff]  ;;  %v128_v23 = vld [vmem:[%s4830_s0 + $0x318] sm:$0xff] }
   0xb   :  { %371 = vperm.xlu2 %3096, %v100_v5   ;;  %365 = vperm.xlu0 %3094, %v98_v6   ;;  %v108_v24 = vld [vmem:[%s4830_s0 + $0x278] sm:$0xff]  ;;  %v110_v26 = vld [vmem:[%s4830_s0 + $0x288] sm:$0xff]  ;;  %v129_v27 = vld [vmem:[%s4830_s0 + $0x320] sm:$0xff]  ;;  %v4838_v6 = vmov 1.0|1.0  }
   0xc   :  { %v3048_v25 = vld [vmem:[%s4831_s1 + $0x38] sm:$0xff]  ;;  %v109_v28 = vld [vmem:[%s4830_s0 + $0x280] sm:$0xff]  ;;  %v3047_v29 = vld [vmem:[%s4831_s1 + $0x30] sm:$0xff] }
   0xd   :  { %3065 = vmatpush.bf16.msra.mxu1 %v3048_v25  ;;  %3066 = vmatpush.bf16.msra.mxu2 %v3048_v25  ;;  %v29_v30 = vld [vmem:[%s4830_s0] sm:$0xff]  ;;  %v3046_v31 = vld [vmem:[%s4831_s1 + $0x28] sm:$0xff]  ;;  %v3044_v35 = vld [vmem:[%s4831_s1 + $0x18] sm:$0xff] }
   0xe   :  { %1057 = vmatpush.bf16.msra.mxu0 %v3048_v25  ;;  %3067 = vmatpush.bf16.msra.mxu3 %v3048_v25  ;;  %v130_v32 = vld [vmem:[%s4830_s0 + $0x328] sm:$0xff]  ;;  %v3045_v34 = vld [vmem:[%s4831_s1 + $0x20] sm:$0xff]  ;;  %v112_v36 = vld [vmem:[%s4830_s0 + $0x298] sm:$0xff] }
   0xf   :  { %v30_v33 = vld [vmem:[%s4830_s0 + $0x8] sm:$0xff]  ;;  %v111_v37 = vld [vmem:[%s4830_s0 + $0x290] sm:$0xff]  ;;  %v132_v42 = vld [vmem:[%s4830_s0 + $0x338] sm:$0xff] }
  0x10   :  { %v131_v38 = vld [vmem:[%s4830_s0 + $0x330] sm:$0xff]  ;;  %v3042_v40 = vld [vmem:[%s4831_s1 + $0x8] sm:$0xff]  ;;  %v32_v43 = vld [vmem:[%s4830_s0 + $0x18] sm:$0xff] }
  0x11   :  { %3068 = vmatpush.bf16.msra.mxu1 %v3047_v29  ;;  %3069 = vmatpush.bf16.msra.mxu2 %v3047_v29  ;;  %v3043_v39 = vld [vmem:[%s4831_s1 + $0x10] sm:$0xff]  ;;  %v3041_v44 = vld [vmem:[%s4831_s1] sm:$0xff]  ;;  %v114_v46 = vld [vmem:[%s4830_s0 + $0x2a8] sm:$0xff]  ;;  %s3395_s1 = smov 128  }
  0x12   :  { %431 = vperm.xlu1 %3095, %v120_v7   ;;  %1058 = vmatpush.bf16.msra.mxu0 %v3047_v29  ;;  %v31_v41 = vld [vmem:[%s4830_s0 + $0x10] sm:$0xff]  ;;  %v113_v47 = vld [vmem:[%s4830_s0 + $0x2a0] sm:$0xff]  ;;  %v3583_v49 = vld [vmem:[%s4832_s2 + $0x38] sm:$0xff] }
  0x13   :  { %374 = vperm.xlu2 %3096, %v101_v8   ;;  %428 = vperm.xlu0 %3094, %v119_v9   ;;  %v133_v48 = vld [vmem:[%s4830_s0 + $0x340] sm:$0xff]  ;;  %v134_v52 = vld [vmem:[%s4830_s0 + $0x348] sm:$0xff]  ;;  %v116_v55 = vld [vmem:[%s4830_s0 + $0x2b8] sm:$0xff] }
  0x14   :  { %3070 = vmatpush.bf16.msra.mxu3 %v3047_v29  ;;  %v33_v51 = vld [vmem:[%s4830_s0 + $0x20] sm:$0xff]  ;;  %v34_v53 = vld [vmem:[%s4830_s0 + $0x28] sm:$0xff]  ;;  %v115_v56 = vld [vmem:[%s4830_s0 + $0x2b0] sm:$0xff] }
  0x15   :  { %3071 = vmatpush.bf16.msra.mxu1 %v3046_v31  ;;  %3072 = vmatpush.bf16.msra.mxu2 %v3046_v31  ;;  %v135_v57 = vld [vmem:[%s4830_s0 + $0x350] sm:$0xff]  ;;  %v137_v63 = vld [vmem:[%s4830_s0 + $0x360] sm:$0xff]  ;;  %v136_v0 = vld [vmem:[%s4830_s0 + $0x358] sm:$0xff] }
  0x16   :  { %1059 = vmatpush.bf16.msra.mxu0 %v3046_v31  ;;  %v3613_v58 = vld [vmem:[%s4832_s2 + $0x30] sm:$0xff]  ;;  %v138_v1 = vld [vmem:[%s4830_s0 + $0x368] sm:$0xff]  ;;  %v36_v7 = vld [vmem:[%s4830_s0 + $0x38] sm:$0xff] }
  0x17   :  { %v35_v8 = vld [vmem:[%s4830_s0 + $0x30] sm:$0xff]  ;;  %v3701_v29 = vld [vmem:[%s4832_s2 + $0x20] sm:$0xff] }
  0x18   :  { %3073 = vmatpush.bf16.msra.mxu3 %v3046_v31  ;;  %v139_v9 = vld [vmem:[%s4830_s0 + $0x370] sm:$0xff] }
  0x19   :  { %3074 = vmatpush.bf16.msra.mxu1 %v3045_v34  ;;  %3075 = vmatpush.bf16.msra.mxu2 %v3045_v34  ;;  %v143_v25 = vld [vmem:[%s4830_s0 + $0x390] sm:$0xff] }
  0x1a   :  { %434 = vperm.xlu1 %3095, %v121_v10   ;;  %1060 = vmatpush.bf16.msra.mxu0 %v3045_v34  ;;  %v47_v60 = vld [vmem:[%s4830_s0 + $0x90] sm:$0xff] }
  0x1b   :  { %437 = vperm.xlu2 %3096, %v122_v11   ;;  %377 = vperm.xlu0 %3094, %v102_v12  }
  0x1c   :  { %3076 = vmatpush.bf16.msra.mxu3 %v3045_v34  ;;  %v145_v34 = vld [vmem:[%s4830_s0 + $0x3a0] sm:$0xff] }
  0x1d   :  { %3077 = vmatpush.bf16.msra.mxu1 %v3044_v35  ;;  %3078 = vmatpush.bf16.msra.mxu2 %v3044_v35 }
  0x1e   :  { %1061 = vmatpush.bf16.msra.mxu0 %v3044_v35 }
  0x20   :  { %3079 = vmatpush.bf16.msra.mxu3 %v3044_v35 }
  0x21   :  { %3080 = vmatpush.bf16.msra.mxu1 %v3043_v39  ;;  %3081 = vmatpush.bf16.msra.mxu2 %v3043_v39 }
  0x22   :  { %383 = vperm.xlu1 %3095, %v104_v13   ;;  %1062 = vmatpush.bf16.msra.mxu0 %v3043_v39  ;;  %v37_v13 = vld [vmem:[%s4830_s0 + $0x40] sm:$0xff] }
  0x23   :  { %440 = vperm.xlu2 %3096, %v123_v14   ;;  %380 = vperm.xlu0 %3094, %v103_v15   ;;  %v3656_v14 = vld [vmem:[%s4832_s2 + $0x28] sm:$0xff]  ;;  %v140_v15 = vld [vmem:[%s4830_s0 + $0x378] sm:$0xff] }
  0x24   :  { %3082 = vmatpush.bf16.msra.mxu3 %v3043_v39  ;;  %v146_v39 = vld [vmem:[%s4830_s0 + $0x3a8] sm:$0xff] }
  0x25   :  { %3083 = vmatpush.bf16.msra.mxu1 %v3042_v40  ;;  %3084 = vmatpush.bf16.msra.mxu2 %v3042_v40 }
  0x26   :  { %1063 = vmatpush.bf16.msra.mxu0 %v3042_v40 }
  0x28   :  { %3085 = vmatpush.bf16.msra.mxu3 %v3042_v40  ;;  %v44_v40 = vld [vmem:[%s4830_s0 + $0x78] sm:$0xff] }
  0x29   :  { %3086 = vmatpush.bf16.msra.mxu1 %v3041_v44  ;;  %3087 = vmatpush.bf16.msra.mxu2 %v3041_v44 }
  0x2a   :  { %386 = vperm.xlu1 %3095, %v105_v16   ;;  %1064 = vmatpush.bf16.msra.mxu0 %v3041_v44  ;;  %v38_v16 = vld [vmem:[%s4830_s0 + $0x48] sm:$0xff] }
  0x2b   :  { %389 = vperm.xlu2 %3096, %v106_v17   ;;  %443 = vperm.xlu0 %3094, %v124_v18  }
  0x2c   :  { %3088 = vmatpush.bf16.msra.mxu3 %v3041_v44  ;;  %v148_v44 = vld [vmem:[%s4830_s0 + $0x3b8] sm:$0xff] }
  0x2d   :  { %1615 = vmatpush.bf16.msrb.mxu1 %v3583_v49  ;;  %1664 = vmatpush.bf16.msrb.mxu2 %v3583_v49 }
  0x30   :  { %1731 = vmatpush.bf16.msrb.mxu3 %v3583_v49 }
  0x31   :  { %1616 = vmatpush.bf16.msrb.mxu1 %v3613_v58  ;;  %1665 = vmatpush.bf16.msrb.mxu2 %v3613_v58 }
  0x32   :  { %449 = vperm.xlu1 %3095, %v126_v19   ;;  %v142_v19 = vld [vmem:[%s4830_s0 + $0x388] sm:$0xff] }
  0x33   :  { %392 = vperm.xlu2 %3096, %v107_v20   ;;  %446 = vperm.xlu0 %3094, %v125_v21   ;;  %v141_v21 = vld [vmem:[%s4830_s0 + $0x380] sm:$0xff] }
  0x34   :  { %1732 = vmatpush.bf16.msrb.mxu3 %v3613_v58 }
  0x35   :  { %1617 = vmatpush.bf16.msrb.mxu1 %v3656_v14  ;;  %1666 = vmatpush.bf16.msrb.mxu2 %v3656_v14 }
  0x38   :  { %1733 = vmatpush.bf16.msrb.mxu3 %v3656_v14 }
  0x39   :  { %1618 = vmatpush.bf16.msrb.mxu1 %v3701_v29  ;;  %1667 = vmatpush.bf16.msrb.mxu2 %v3701_v29 }
  0x3a   :  { %452 = vperm.xlu1 %3095, %v127_v22   ;;  %v39_v22 = vld [vmem:[%s4830_s0 + $0x50] sm:$0xff] }
  0x3b   :  { %455 = vperm.xlu2 %3096, %v128_v23   ;;  %395 = vperm.xlu0 %3094, %v108_v24  }
  0x3c   :  { %1734 = vmatpush.bf16.msrb.mxu3 %v3701_v29 }
  0x42   :  { %401 = vperm.xlu1 %3095, %v110_v26   ;;  %v40_v26 = vld [vmem:[%s4830_s0 + $0x58] sm:$0xff] }
  0x43   :  { %458 = vperm.xlu2 %3096, %v129_v27   ;;  %398 = vperm.xlu0 %3094, %v109_v28   ;;  %v144_v27 = vld [vmem:[%s4830_s0 + $0x398] sm:$0xff] }
  0x4a   :  { %158 = vperm.xlu1 %3095, %v29_v30  }
  0x4b   :  { %461 = vperm.xlu0 %3094, %v130_v32   ;;  %161 = vperm.xlu2 %3096, %v30_v33   ;;  %v42_v32 = vld [vmem:[%s4830_s0 + $0x68] sm:$0xff]  ;;  %v41_v33 = vld [vmem:[%s4830_s0 + $0x60] sm:$0xff] }
  0x52   :  { %407 = vperm.xlu1 %3095, %v112_v36  }
  0x53   :  { %404 = vperm.xlu0 %3094, %v111_v37   ;;  %464 = vperm.xlu2 %3096, %v131_v38   ;;  %v43_v38 = vld [vmem:[%s4830_s0 + $0x70] sm:$0xff] }
  0x5a   :  { %164 = vperm.xlu1 %3095, %v31_v41  }
  0x5b   :  { %467 = vperm.xlu0 %3094, %v132_v42   ;;  %167 = vperm.xlu2 %3096, %v32_v43  }
  0x5d   :  { %v3569_v45 = vpop.permute.xlu2 %368 }
  0x5e   :  { %vm611_vm8 = vcmp.eq.s32.totalorder %v3569_v45, %v3629_v2  ;;  %v147_v45 = vld [vmem:[%s4830_s0 + $0x3b0] sm:$0xff] }
  0x62   :  { %413 = vperm.xlu1 %3095, %v114_v46   ;;  %v149_v46 = vld [vmem:[%s4830_s0 + $0x3c0] sm:$0xff] }
  0x63   :  { %410 = vperm.xlu0 %3094, %v113_v47   ;;  %470 = vperm.xlu2 %3096, %v133_v48   ;;  %v3758_v47 = vld [vmem:[%s4832_s2 + $0x18] sm:$0xff] }
  0x64   :  { %1619 = vmatpush.bf16.msrb.mxu1 %v3758_v47  ;;  %1668 = vmatpush.bf16.msrb.mxu2 %v3758_v47 }
  0x65   :  { %v3588_v50 = vpop.permute.xlu2 %371  ;;  %1735 = vmatpush.bf16.msrb.mxu3 %v3758_v47 }
  0x66   :  { %vm612_vm9 = vcmp.eq.s32.totalorder %v3588_v50, %v3629_v2 }
  0x67   :  { %vm2919_vm11 = vmpackc.low %vm612_vm9, %vm611_vm8 }
  0x6a   :  { %170 = vperm.xlu1 %3095, %v33_v51   ;;  %v45_v51 = vld [vmem:[%s4830_s0 + $0x80] sm:$0xff] }
  0x6b   :  { %473 = vperm.xlu0 %3094, %v134_v52   ;;  %173 = vperm.xlu2 %3096, %v34_v53   ;;  %v150_v53 = vld [vmem:[%s4830_s0 + $0x3c8] sm:$0xff] }
  0x6d   :  { %v3599_v54 = vpop.permute.xlu2 %374 }
  0x6e   :  { %vm613_vm15 = vcmp.eq.s32.totalorder %v3599_v54, %v3629_v2  ;;  %v46_v54 = vld [vmem:[%s4830_s0 + $0x88] sm:$0xff] }
  0x72   :  { %419 = vperm.xlu1 %3095, %v116_v55  }
  0x73   :  { %416 = vperm.xlu0 %3094, %v115_v56   ;;  %476 = vperm.xlu2 %3096, %v135_v57   ;;  %v152_v57 = vld [vmem:[%s4830_s0 + $0x3d8] sm:$0xff] }
  0x74   :  { %v423_v59 = vpop.permute.xlu1 %422 }
  0x75   :  { %v3615_v61 = vpop.permute.xlu2 %437  ;;  %v363_v62 = vpop.permute.xlu0 %362  ;;  %vm629_vm0 = vcmp.eq.s32.totalorder %v423_v59, %v3629_v2  ;;  %v151_v59 = vld [vmem:[%s4830_s0 + $0x3d0] sm:$0xff] }
  0x76   :  { %vm609_vm2 = vcmp.eq.s32.totalorder %v363_v62, %v3629_v2  ;;  %vm634_vm14 = vcmp.eq.s32.totalorder %v3615_v61, %v3629_v2  ;;  %v3803_v62 = vld [vmem:[%s4832_s2 + $0x10] sm:$0xff] }
  0x77   :  { %1620 = vmatpush.bf16.msrb.mxu1 %v3803_v62  ;;  %1669 = vmatpush.bf16.msrb.mxu2 %v3803_v62 }
  0x78   :  { %1736 = vmatpush.bf16.msrb.mxu3 %v3803_v62 }
  0x7a   :  { %482 = vperm.xlu1 %3095, %v137_v63  }
  0x7b   :  { %479 = vperm.xlu0 %3094, %v136_v0   ;;  %485 = vperm.xlu2 %3096, %v138_v1   ;;  %v153_v1 = vld [vmem:[%s4830_s0 + $0x3e0] sm:$0xff] }
  0x7c   :  { %v426_v3 = vpop.permute.xlu1 %425 }
  0x7d   :  { %vm630_vm1 = vcmp.eq.s32.totalorder %v426_v3, %v3629_v2  ;;  %v3633_v4 = vpop.permute.xlu2 %440  ;;  %v366_v5 = vpop.permute.xlu0 %365  ;;  %v48_v3 = vld [vmem:[%s4830_s0 + $0x98] sm:$0xff] }
  0x7e   :  { %vm2937_vm3 = vmpackc.low %vm630_vm1, %vm629_vm0  ;;  %vm610_vm4 = vcmp.eq.s32.totalorder %v366_v5, %v3629_v2 }
  0x7f   :  { %vm2917_vm5 = vmpackc.low %vm610_vm4, %vm609_vm2  ;;  %2938 = vmatmul.msk.bf16.vlgmr.msra.gmra.mxu2 %vm2937_vm3, %v4838_v6 }
  0x80   :  { %2918 = vmatmul.msk.bf16.vlgmr.msra.gmra.mxu1 %vm2917_vm5, %v4838_v6  ;;  %vm635_vm5 = vcmp.eq.s32.totalorder %v3633_v4, %v3629_v2  ;;  %v154_v4 = vld [vmem:[%s4830_s0 + $0x3e8] sm:$0xff] }
  0x82   :  { %179 = vperm.xlu1 %3095, %v36_v7  }
  0x83   :  { %176 = vperm.xlu0 %3094, %v35_v8   ;;  %488 = vperm.xlu2 %3096, %v139_v9   ;;  %v50_v9 = vld [vmem:[%s4830_s0 + $0xa8] sm:$0xff] }
  0x84   :  { %v432_v10 = vpop.permute.xlu1 %431 }
  0x85   :  { %v429_v11 = vpop.permute.xlu0 %428  ;;  %v3648_v12 = vpop.permute.xlu2 %389  ;;  %vm632_vm6 = vcmp.eq.s32.totalorder %v432_v10, %v3629_v2  ;;  %v49_v10 = vld [vmem:[%s4830_s0 + $0xa0] sm:$0xff] }
  0x86   :  { %vm631_vm7 = vcmp.eq.s32.totalorder %v429_v11, %v3629_v2  ;;  %v155_v11 = vld [vmem:[%s4830_s0 + $0x3f0] sm:$0xff] }
  0x87   :  { %vm2939_vm10 = vmpackc.low %vm632_vm6, %vm631_vm7 }
  0x8a   :  { %182 = vperm.xlu1 %3095, %v37_v13  }
  0x8b   :  { %491 = vperm.xlu0 %3094, %v140_v15   ;;  %185 = vperm.xlu2 %3096, %v38_v16   ;;  %v51_v16 = vld [vmem:[%s4830_s0 + $0xb0] sm:$0xff] }
  0x8c   :  { %v435_v17 = vpop.permute.xlu1 %434 }
  0x8d   :  { %v378_v18 = vpop.permute.xlu0 %377  ;;  %v3677_v20 = vpop.permute.xlu2 %392  ;;  %vm633_vm12 = vcmp.eq.s32.totalorder %v435_v17, %v3629_v2  ;;  %v156_v17 = vld [vmem:[%s4830_s0 + $0x3f8] sm:$0xff] }
  0x8e   :  { %vm614_vm13 = vcmp.eq.s32.totalorder %v378_v18, %v3629_v2  ;;  %vm2941_vm0 = vmpackc.low %vm634_vm14, %vm633_vm12  ;;  %vm618_vm14 = vcmp.eq.s32.totalorder %v3648_v12, %v3629_v2  ;;  %v52_v18 = vld [vmem:[%s4830_s0 + $0xb8] sm:$0xff] }
  0x8f   :  { %2940 = vmatmul.msk.bf16.gmra.mxu2 %vm2939_vm10, %v4838_v6  ;;  %vm2921_vm1 = vmpackc.low %vm614_vm13, %vm613_vm15 }
  0x90   :  { %2920 = vmatmul.msk.bf16.gmra.mxu1 %vm2919_vm11, %v4838_v6 }
  0x92   :  { %497 = vperm.xlu1 %3095, %v142_v19   ;;  %v3863_v19 = vld [vmem:[%s4832_s2 + $0x8] sm:$0xff] }
  0x93   :  { %494 = vperm.xlu0 %3094, %v141_v21   ;;  %188 = vperm.xlu2 %3096, %v39_v22   ;;  %v54_v22 = vld [vmem:[%s4830_s0 + $0xc8] sm:$0xff] }
  0x94   :  { %v384_v23 = vpop.permute.xlu1 %383  ;;  %1621 = vmatpush.bf16.msrb.mxu1 %v3863_v19  ;;  %1670 = vmatpush.bf16.msrb.mxu2 %v3863_v19 }
  0x95   :  { %v381_v24 = vpop.permute.xlu0 %380  ;;  %v3695_v28 = vpop.permute.xlu2 %455  ;;  %vm616_vm3 = vcmp.eq.s32.totalorder %v384_v23, %v3629_v2  ;;  %1737 = vmatpush.bf16.msrb.mxu3 %v3863_v19 }
  0x96   :  { %vm615_vm4 = vcmp.eq.s32.totalorder %v381_v24, %v3629_v2  ;;  %v53_v24 = vld [vmem:[%s4830_s0 + $0xc0] sm:$0xff] }
  0x97   :  { %vm2923_vm7 = vmpackc.low %vm616_vm3, %vm615_vm4 }
  0x9a   :  { %500 = vperm.xlu1 %3095, %v143_v25   ;;  %v55_v25 = vld [vmem:[%s4830_s0 + $0xd0] sm:$0xff] }
  0x9b   :  { %191 = vperm.xlu0 %3094, %v40_v26   ;;  %503 = vperm.xlu2 %3096, %v144_v27  }
  0x9c   :  { %v3704_v30 = vpop.permute.xlu1 %386 }
  0x9d   :  { %v444_v31 = vpop.permute.xlu0 %443  ;;  %v3724_v35 = vpop.permute.xlu2 %458  ;;  %vm617_vm10 = vcmp.eq.s32.totalorder %v3704_v30, %v3629_v2  ;;  %v56_v30 = vld [vmem:[%s4830_s0 + $0xd8] sm:$0xff] }
  0x9e   :  { %vm636_vm2 = vcmp.eq.s32.totalorder %v444_v31, %v3629_v2  ;;  %v58_v31 = vld [vmem:[%s4830_s0 + $0xe8] sm:$0xff] }
  0x9f   :  { %2942 = vmatmul.msk.bf16.gmra.mxu2 %vm2941_vm0, %v4838_v6  ;;  %vm2943_vm6 = vmpackc.low %vm636_vm2, %vm635_vm5  ;;  %vm640_vm2 = vcmp.eq.s32.totalorder %v3695_v28, %v3629_v2  ;;  %v57_v28 = vld [vmem:[%s4830_s0 + $0xe0] sm:$0xff] }
  0xa0   :  { %2922 = vmatmul.msk.bf16.gmra.mxu1 %vm2921_vm1, %v4838_v6  ;;  %vm2925_vm0 = vmpackc.low %vm618_vm14, %vm617_vm10 }
  0xa2   :  { %197 = vperm.xlu1 %3095, %v42_v32  }
  0xa3   :  { %194 = vperm.xlu0 %3094, %v41_v33   ;;  %506 = vperm.xlu2 %3096, %v145_v34   ;;  %v3912_v33 = vld [vmem:[%s4832_s2] sm:$0xff] }
  0xa4   :  { %v450_v36 = vpop.permute.xlu1 %449  ;;  %1622 = vmatpush.bf16.msrb.mxu1 %v3912_v33  ;;  %1671 = vmatpush.bf16.msrb.mxu2 %v3912_v33 }
  0xa5   :  { %v447_v37 = vpop.permute.xlu0 %446  ;;  %v162_v43 = vpop.permute.xlu2 %161  ;;  %vm638_vm8 = vcmp.eq.s32.totalorder %v450_v36, %v3629_v2  ;;  %1738 = vmatpush.bf16.msrb.mxu3 %v3912_v33  ;;  %v60_v36 = vld [vmem:[%s4830_s0 + $0xf8] sm:$0xff] }
  0xa6   :  { %vm637_vm9 = vcmp.eq.s32.totalorder %v447_v37, %v3629_v2  ;;  %vm542_vm12 = vcmp.eq.s32.totalorder %v162_v43, %v3629_v2  ;;  %v59_v37 = vld [vmem:[%s4830_s0 + $0xf0] sm:$0xff]  ;;  %v64_v43 = vld [vmem:[%s4830_s0 + $0x118] sm:$0xff] }
  0xa7   :  { %vm2945_vm11 = vmpackc.low %vm638_vm8, %vm637_vm9 }
  0xa8   :  { %1780 = vmatpush.bf16.msra.mxu1 %v3583_v49  ;;  %1847 = vmatpush.bf16.msra.mxu2 %v3583_v49 }
  0xaa   :  { %200 = vperm.xlu1 %3095, %v43_v38   ;;  %v61_v38 = vld [vmem:[%s4830_s0 + $0x100] sm:$0xff] }
  0xab   :  { %509 = vperm.xlu0 %3094, %v146_v39   ;;  %203 = vperm.xlu2 %3096, %v44_v40  }
  0xac   :  { %v3738_v41 = vpop.permute.xlu1 %452  ;;  %1781 = vmatpush.bf16.msra.mxu1 %v3613_v58  ;;  %1848 = vmatpush.bf16.msra.mxu2 %v3613_v58 }
  0xad   :  { %v3742_v42 = vpop.permute.xlu0 %395  ;;  %v3770_v52 = vpop.permute.xlu2 %464  ;;  %vm639_vm1 = vcmp.eq.s32.totalorder %v3738_v41, %v3629_v2  ;;  %v63_v41 = vld [vmem:[%s4830_s0 + $0x110] sm:$0xff] }
  0xae   :  { %vm620_vm3 = vcmp.eq.s32.totalorder %v3742_v42, %v3629_v2  ;;  %vm2947_vm4 = vmpackc.low %vm640_vm2, %vm639_vm1  ;;  %v62_v42 = vld [vmem:[%s4830_s0 + $0x108] sm:$0xff] }
  0xaf   :  { %2944 = vmatmul.msk.bf16.gmra.mxu2 %vm2943_vm6, %v4838_v6 }
  0xb0   :  { %2924 = vmatmul.msk.bf16.gmra.mxu1 %vm2923_vm7, %v4838_v6  ;;  %vm619_vm7 = vcmp.eq.s32.totalorder %v3677_v20, %v3629_v2  ;;  %1849 = vmatpush.bf16.msra.mxu2 %v3656_v14 }
  0xb1   :  { %vm2927_vm9 = vmpackc.low %vm620_vm3, %vm619_vm7  ;;  %1782 = vmatpush.bf16.msra.mxu1 %v3656_v14 }
  0xb2   :  { %515 = vperm.xlu1 %3095, %v148_v44  }
  0xb3   :  { %512 = vperm.xlu0 %3094, %v147_v45   ;;  %518 = vperm.xlu2 %3096, %v149_v46  }
  0xb4   :  { %v3761_v48 = vpop.permute.xlu1 %401  ;;  %1850 = vmatpush.bf16.msra.mxu2 %v3701_v29 }
  0xb5   :  { %v3765_v50 = vpop.permute.xlu0 %398  ;;  %v168_v61 = vpop.permute.xlu2 %167  ;;  %1783 = vmatpush.bf16.msra.mxu1 %v3701_v29 }
  0xb6   :  { %vm544_vm5 = vcmp.eq.s32.totalorder %v168_v61, %v3629_v2 }
  0xb8   :  { %1851 = vmatpush.bf16.msra.mxu2 %v3758_v47 }
  0xb9   :  { %1784 = vmatpush.bf16.msra.mxu1 %v3758_v47 }
  0xba   :  { %206 = vperm.xlu1 %3095, %v45_v51   ;;  %v65_v51 = vld [vmem:[%s4830_s0 + $0x120] sm:$0xff] }
  0xbb   :  { %521 = vperm.xlu0 %3094, %v150_v53   ;;  %209 = vperm.xlu2 %3096, %v46_v54  }
  0xbc   :  { %v159_v55 = vpop.permute.xlu1 %158  ;;  %1852 = vmatpush.bf16.msra.mxu2 %v3803_v62 }
  0xbd   :  { %v3783_v56 = vpop.permute.xlu0 %461  ;;  %vm541_vm13 = vcmp.eq.s32.totalorder %v159_v55, %v3629_v2  ;;  %v3827_v5 = vpop.permute.xlu2 %470  ;;  %1785 = vmatpush.bf16.msra.mxu1 %v3803_v62 }
  0xbe   :  { %vm2849_vm15 = vmpackc.low %vm542_vm12, %vm541_vm13  ;;  %vm642_vm10 = vcmp.eq.s32.totalorder %v3783_v56, %v3629_v2  ;;  %vm622_vm12 = vcmp.eq.s32.totalorder %v3761_v48, %v3629_v2  ;;  %vm621_vm13 = vcmp.eq.s32.totalorder %v3765_v50, %v3629_v2  ;;  %v66_v50 = vld [vmem:[%s4830_s0 + $0x128] sm:$0xff] }
  0xbf   :  { %2850 = vmatmul.msk.bf16.vlgmr.msra.gmra.mxu0 %vm2849_vm15, %v4838_v6  ;;  %2946 = vmatmul.msk.bf16.gmra.mxu2 %vm2945_vm11, %v4838_v6  ;;  %vm641_vm11 = vcmp.eq.s32.totalorder %v3724_v35, %v3629_v2  ;;  %vm2929_vm2 = vmpackc.low %vm622_vm12, %vm621_vm13 }
  0xc0   :  { %2926 = vmatmul.msk.bf16.gmra.mxu1 %vm2925_vm0, %v4838_v6  ;;  %vm2949_vm14 = vmpackc.low %vm642_vm10, %vm641_vm11  ;;  %1853 = vmatpush.bf16.msra.mxu2 %v3863_v19 }
  0xc1   :  { %1786 = vmatpush.bf16.msra.mxu1 %v3863_v19 }
  0xc2   :  { %527 = vperm.xlu1 %3095, %v152_v57   ;;  %v69_v57 = vld [vmem:[%s4830_s0 + $0x140] sm:$0xff] }
  0xc3   :  { %524 = vperm.xlu0 %3094, %v151_v59   ;;  %212 = vperm.xlu2 %3096, %v47_v60   ;;  %v68_v59 = vld [vmem:[%s4830_s0 + $0x138] sm:$0xff]  ;;  %v70_v60 = vld [vmem:[%s4830_s0 + $0x148] sm:$0xff] }
  0xc4   :  { %v3805_v63 = vpop.permute.xlu1 %407  ;;  %1854 = vmatpush.bf16.msra.mxu2 %v3912_v33 }
  0xc5   :  { %v3807_v0 = vpop.permute.xlu0 %404  ;;  %v174_v15 = vpop.permute.xlu2 %173  ;;  %1787 = vmatpush.bf16.msra.mxu1 %v3912_v33 }
  0xc6   :  { %vm546_vm15 = vcmp.eq.s32.totalorder %v174_v15, %v3629_v2  ;;  %v1538_v15 = vld [vmem:[%s4834_s4 + $0x40] sm:$0xff] }
  0xca   :  { %530 = vperm.xlu1 %3095, %v153_v1   ;;  %v72_v1 = vld [vmem:[%s4830_s0 + $0x158] sm:$0xff] }
  0xcb   :  { %215 = vperm.xlu0 %3094, %v48_v3   ;;  %533 = vperm.xlu2 %3096, %v154_v4   ;;  %v71_v3 = vld [vmem:[%s4830_s0 + $0x150] sm:$0xff]  ;;  %v73_v4 = vld [vmem:[%s4830_s0 + $0x160] sm:$0xff] }
  0xcc   :  { %v165_v7 = vpop.permute.xlu1 %164 }
  0xcd   :  { %v3830_v8 = vpop.permute.xlu0 %467  ;;  %vm543_vm6 = vcmp.eq.s32.totalorder %v165_v7, %v3629_v2  ;;  %v3885_v23 = vpop.permute.xlu2 %476 }
  0xce   :  { %vm2851_vm8 = vmpackc.low %vm544_vm5, %vm543_vm6  ;;  %vm644_vm3 = vcmp.eq.s32.totalorder %v3830_v8, %v3629_v2  ;;  %vm623_vm5 = vcmp.eq.s32.totalorder %v3807_v0, %v3629_v2  ;;  %vm624_vm6 = vcmp.eq.s32.totalorder %v3805_v63, %v3629_v2 }
  0xcf   :  { %2852 = vmatmul.msk.bf16.gmra.mxu0 %vm2851_vm8, %v4838_v6  ;;  %2948 = vmatmul.msk.bf16.gmra.mxu2 %vm2947_vm4, %v4838_v6  ;;  %vm643_vm4 = vcmp.eq.s32.totalorder %v3770_v52, %v3629_v2  ;;  %vm2931_vm11 = vmpackc.low %vm624_vm6, %vm623_vm5  ;;  %v67_v52 = vld [vmem:[%s4830_s0 + $0x130] sm:$0xff] }
  0xd0   :  { %2928 = vmatmul.msk.bf16.gmra.mxu1 %vm2927_vm9, %v4838_v6  ;;  %vm2951_vm7 = vmpackc.low %vm644_vm3, %vm643_vm4 }
  0xd2   :  { %221 = vperm.xlu1 %3095, %v50_v9  }
  0xd3   :  { %218 = vperm.xlu0 %3094, %v49_v10   ;;  %536 = vperm.xlu2 %3096, %v155_v11   ;;  %v74_v11 = vld [vmem:[%s4830_s0 + $0x168] sm:$0xff] }
  0xd4   :  { %v3847_v12 = vpop.permute.xlu1 %413 }
  0xd5   :  { %v3849_v13 = vpop.permute.xlu0 %410  ;;  %v486_v32 = vpop.permute.xlu2 %485 }
  0xd6   :  { %vm650_vm8 = vcmp.eq.s32.totalorder %v486_v32, %v3629_v2 }
  0xda   :  { %224 = vperm.xlu1 %3095, %v51_v16   ;;  %v1539_v16 = vld [vmem:[%s4834_s4 + $0x48] sm:$0xff] }
  0xdb   :  { %539 = vperm.xlu0 %3094, %v156_v17   ;;  %227 = vperm.xlu2 %3096, %v52_v18   ;;  %v1530_v17 = vld [vmem:[%s4834_s4] sm:$0xff]  ;;  %v1531_v18 = vld [vmem:[%s4834_s4 + $0x8] sm:$0xff] }
  0xdc   :  { %v171_v20 = vpop.permute.xlu1 %170 }
  0xdd   :  { %v3877_v21 = vpop.permute.xlu0 %473  ;;  %vm545_vm0 = vcmp.eq.s32.totalorder %v171_v20, %v3629_v2  ;;  %v489_v44 = vpop.permute.xlu2 %488 }
  0xde   :  { %vm2853_vm1 = vmpackc.low %vm546_vm15, %vm545_vm0  ;;  %vm625_vm15 = vcmp.eq.s32.totalorder %v3849_v13, %v3629_v2  ;;  %vm626_vm0 = vcmp.eq.s32.totalorder %v3847_v12, %v3629_v2  ;;  %vm651_vm5 = vcmp.eq.s32.totalorder %v489_v44, %v3629_v2  ;;  %v75_v12 = vld [vmem:[%s4830_s0 + $0x170] sm:$0xff]  ;;  %v76_v13 = vld [vmem:[%s4830_s0 + $0x178] sm:$0xff] }
  0xdf   :  { %2854 = vmatmul.msk.bf16.gmra.mxu0 %vm2853_vm1, %v4838_v6  ;;  %2950 = vmatmul.msk.bf16.gmra.mxu2 %vm2949_vm14, %v4838_v6  ;;  %vm646_vm1 = vcmp.eq.s32.totalorder %v3877_v21, %v3629_v2  ;;  %vm2933_vm3 = vmpackc.low %vm626_vm0, %vm625_vm15  ;;  %vm647_vm0 = vcmp.eq.s32.totalorder %v3885_v23, %v3629_v2  ;;  %v1563_v23 = vpack.c.bf16 %v1531_v18, %v1530_v17 }
  0xe0   :  { %2930 = vmatmul.msk.bf16.gmra.mxu1 %vm2929_vm2, %v4838_v6  ;;  %vm645_vm2 = vcmp.eq.s32.totalorder %v3827_v5, %v3629_v2 }
  0xe1   :  { %vm2953_vm4 = vmpackc.low %vm646_vm1, %vm645_vm2 }
  0xe2   :  { %233 = vperm.xlu1 %3095, %v54_v22   ;;  %v1660_v22 = vpack.c.bf16 %v1539_v16, %v1538_v15  ;;  %v89_v15 = vld [vmem:[%s4830_s0 + $0x1e0] sm:$0xff]  ;;  %v91_v16 = vld [vmem:[%s4830_s0 + $0x1f0] sm:$0xff] }
  0xe3   :  { %230 = vperm.xlu0 %3094, %v53_v24   ;;  %236 = vperm.xlu2 %3096, %v55_v25  }
  0xe4   :  { %v3894_v26 = vpop.permute.xlu1 %419 }
  0xe5   :  { %v3896_v27 = vpop.permute.xlu0 %416  ;;  %v186_v54 = vpop.permute.xlu2 %185 }
  0xea   :  { %242 = vperm.xlu1 %3095, %v57_v28   ;;  %v79_v28 = vld [vmem:[%s4830_s0 + $0x190] sm:$0xff] }
  0xeb   :  { %239 = vperm.xlu0 %3094, %v56_v30   ;;  %245 = vperm.xlu2 %3096, %v58_v31  }
  0xec   :  { %v483_v34 = vpop.permute.xlu1 %482 }
  0xed   :  { %v3921_v35 = vpop.permute.xlu0 %479  ;;  %vm649_vm9 = vcmp.eq.s32.totalorder %v483_v34, %v3629_v2  ;;  %v189_v5 = vpop.permute.xlu2 %188 }
  0xee   :  { %vm2957_vm10 = vmpackc.low %vm650_vm8, %vm649_vm9  ;;  %vm550_vm9 = vcmp.eq.s32.totalorder %v186_v54, %v3629_v2 }
  0xef   :  { %2952 = vmatmul.msk.bf16.gmra.mxu2 %vm2951_vm7, %v4838_v6  ;;  %2958 = vmatmul.msk.bf16.vlgmr.msra.gmra.mxu3 %vm2957_vm10, %v4838_v6 }
  0xf0   :  { %2932 = vmatmul.msk.bf16.gmra.mxu1 %vm2931_vm11, %v4838_v6  ;;  %1896 = vmatpush.bf16.msra.mxu3 %v3583_v49  ;;  %vm627_vm11 = vcmp.eq.s32.totalorder %v3896_v27, %v3629_v2  ;;  %v77_v27 = vld [vmem:[%s4830_s0 + $0x180] sm:$0xff] }
  0xf2   :  { %251 = vperm.xlu1 %3095, %v60_v36   ;;  %v82_v36 = vld [vmem:[%s4830_s0 + $0x1a8] sm:$0xff] }
  0xf3   :  { %248 = vperm.xlu0 %3094, %v59_v37   ;;  %254 = vperm.xlu2 %3096, %v61_v38   ;;  %v1541_v37 = vld [vmem:[%s4834_s4 + $0x58] sm:$0xff] }
  0xf4   :  { %v180_v39 = vpop.permute.xlu1 %179  ;;  %1897 = vmatpush.bf16.msra.mxu3 %v3613_v58 }
  0xf5   :  { %v177_v40 = vpop.permute.xlu0 %176  ;;  %vm548_vm12 = vcmp.eq.s32.totalorder %v180_v39, %v3629_v2  ;;  %v504_v21 = vpop.permute.xlu2 %503  ;;  %v1532_v39 = vld [vmem:[%s4834_s4 + $0x10] sm:$0xff] }
  0xf6   :  { %vm547_vm13 = vcmp.eq.s32.totalorder %v177_v40, %v3629_v2  ;;  %v1533_v40 = vld [vmem:[%s4834_s4 + $0x18] sm:$0xff] }
  0xf7   :  { %vm2855_vm14 = vmpackc.low %vm548_vm12, %vm547_vm13  ;;  %vm628_vm12 = vcmp.eq.s32.totalorder %v3894_v26, %v3629_v2  ;;  %vm648_vm13 = vcmp.eq.s32.totalorder %v3921_v35, %v3629_v2  ;;  %v78_v26 = vld [vmem:[%s4830_s0 + $0x188] sm:$0xff]  ;;  %v81_v35 = vld [vmem:[%s4830_s0 + $0x1a0] sm:$0xff] }
  0xf8   :  { %2856 = vmatmul.msk.bf16.gmra.mxu0 %vm2855_vm14, %v4838_v6  ;;  %1898 = vmatpush.bf16.msra.mxu3 %v3656_v14  ;;  %vm2935_vm1 = vmpackc.low %vm628_vm12, %vm627_vm11 }
  0xf9   :  { %vm2955_vm2 = vmpackc.low %vm648_vm13, %vm647_vm0 }
  0xfa   :  { %260 = vperm.xlu1 %3095, %v63_v41  }
  0xfb   :  { %257 = vperm.xlu0 %3094, %v62_v42   ;;  %263 = vperm.xlu2 %3096, %v64_v43   ;;  %v1564_v43 = vpack.c.bf16 %v1533_v40, %v1532_v39  ;;  %v96_v40 = vld [vmem:[%s4830_s0 + $0x218] sm:$0xff] }
  0xfc   :  { %1899 = vmatpush.bf16.msra.mxu3 %v3701_v29  ;;  %v183_v48 = vpop.permute.xlu1 %182 }
  0xfd   :  { %v492_v45 = vpop.permute.xlu0 %491  ;;  %v3973_v46 = vpop.f32.mrf.mxu1  ;;  %vm549_vm8 = vcmp.eq.s32.totalorder %v183_v48, %v3629_v2 }
  0xfe   :  { %vm652_vm6 = vcmp.eq.s32.totalorder %v492_v45, %v3629_v2  ;;  %vm2857_vm10 = vmpackc.low %vm550_vm9, %vm549_vm8  ;;  %vm656_vm8 = vcmp.eq.s32.totalorder %v504_v21, %v3629_v2  ;;  %v507_v32 = vpop.permute.xlu2 %506 }
  0xff   :  { %vm2959_vm7 = vmpackc.low %vm652_vm6, %vm651_vm5  ;;  %2954 = vmatmul.msk.bf16.gmra.mxu2 %vm2953_vm4, %v4838_v6  ;;  %vm551_vm5 = vcmp.eq.s32.totalorder %v189_v5, %v3629_v2 }
 0x100   :  { %2934 = vmatmul.msk.bf16.gmra.mxu1 %vm2933_vm3, %v4838_v6  ;;  %2960 = vmatmul.msk.bf16.gmra.mxu3 %vm2959_vm7, %v4838_v6 }
 0x101   :  { %1900 = vmatpush.bf16.msra.mxu3 %v3758_v47 }
 0x102   :  { %269 = vperm.xlu1 %3095, %v66_v50   ;;  %v3990_v53 = vpop.f32.mrf.mxu2  ;;  %v83_v50 = vld [vmem:[%s4830_s0 + $0x1b0] sm:$0xff] }
 0x103   :  { %266 = vperm.xlu0 %3094, %v65_v51   ;;  %272 = vperm.xlu2 %3096, %v67_v52  }
 0x104   :  { %v498_v61 = vpop.permute.xlu1 %497 }
 0x105   :  { %1901 = vmatpush.bf16.msra.mxu3 %v3803_v62  ;;  %v3997_v55 = vpop.f32.mrf.mxu1  ;;  %v495_v56 = vpop.permute.xlu0 %494  ;;  %vm654_vm15 = vcmp.eq.s32.totalorder %v498_v61, %v3629_v2 }
 0x106   :  { %vm653_vm14 = vcmp.eq.s32.totalorder %v495_v56, %v3629_v2  ;;  %v204_v48 = vpop.permute.xlu2 %203 }
 0x107   :  { %vm2961_vm3 = vmpackc.low %vm654_vm15, %vm653_vm14  ;;  %vm657_vm14 = vcmp.eq.s32.totalorder %v507_v32, %v3629_v2  ;;  %v1545_v32 = vld [vmem:[%s4834_s4 + $0x78] sm:$0xff] }
 0x108   :  { %2858 = vmatmul.msk.bf16.gmra.mxu0 %vm2857_vm10, %v4838_v6 }
 0x109   :  { %1902 = vmatpush.bf16.msra.mxu3 %v3863_v19 }
 0x10a   :  { %278 = vperm.xlu1 %3095, %v69_v57   ;;  %v4016_v63 = vpop.f32.mrf.mxu2  ;;  %v87_v57 = vld [vmem:[%s4830_s0 + $0x1d0] sm:$0xff] }
 0x10b   :  { %275 = vperm.xlu0 %3094, %v68_v59   ;;  %281 = vperm.xlu2 %3096, %v70_v60   ;;  %v1542_v59 = vld [vmem:[%s4834_s4 + $0x60] sm:$0xff]  ;;  %v1543_v60 = vld [vmem:[%s4834_s4 + $0x68] sm:$0xff] }
 0x10c   :  { %v501_v10 = vpop.permute.xlu1 %500  ;;  %v1662_v5 = vpack.c.bf16 %v1543_v60, %v1542_v59 }
 0x10d   :  { %1903 = vmatpush.bf16.msra.mxu3 %v3912_v33  ;;  %v4027_v0 = vpop.f32.mrf.mxu1  ;;  %v192_v7 = vpop.permute.xlu0 %191  ;;  %vm655_vm7 = vcmp.eq.s32.totalorder %v501_v10, %v3629_v2 }
 0x10e   :  { %vm552_vm4 = vcmp.eq.s32.totalorder %v192_v7, %v3629_v2  ;;  %vm2963_vm9 = vmpackc.low %vm656_vm8, %vm655_vm7  ;;  %v519_v61 = vpop.permute.xlu2 %518 }
 0x10f   :  { %2956 = vmatmul.msk.bf16.gmra.mxu2 %vm2955_vm2, %v4838_v6  ;;  %vm2859_vm6 = vmpackc.low %vm552_vm4, %vm551_vm5 }
 0x110   :  { %2936 = vmatmul.msk.bf16.gmra.mxu1 %vm2935_vm1, %v4838_v6  ;;  %2962 = vmatmul.msk.bf16.gmra.mxu3 %vm2961_vm3, %v4838_v6  ;;  %vm556_vm1 = vcmp.eq.s32.totalorder %v204_v48, %v3629_v2 }
 0x112   :  { %287 = vperm.xlu1 %3095, %v72_v1   ;;  %v4041_v8 = vpop.f32.mrf.mxu2  ;;  %v1534_v1 = vld [vmem:[%s4834_s4 + $0x20] sm:$0xff] }
 0x113   :  { %284 = vperm.xlu0 %3094, %v71_v3   ;;  %290 = vperm.xlu2 %3096, %v73_v4   ;;  %v1535_v3 = vld [vmem:[%s4834_s4 + $0x28] sm:$0xff] }
 0x114   :  { %v198_v30 = vpop.permute.xlu1 %197  ;;  %v1565_v10 = vpack.c.bf16 %v1535_v3, %v1534_v1 }
 0x115   :  { %v4045_v9 = vpop.f32.mrf.mxu1  ;;  %v195_v25 = vpop.permute.xlu0 %194  ;;  %vm554_vm11 = vcmp.eq.s32.totalorder %v198_v30, %v3629_v2  ;;  %v1544_v30 = vld [vmem:[%s4834_s4 + $0x70] sm:$0xff] }
 0x116   :  { %vm553_vm10 = vcmp.eq.s32.totalorder %v195_v25, %v3629_v2  ;;  %v210_v21 = vpop.permute.xlu2 %209 }
 0x117   :  { %vm2861_vm12 = vmpackc.low %vm554_vm11, %vm553_vm10  ;;  %vm558_vm7 = vcmp.eq.s32.totalorder %v210_v21, %v3629_v2  ;;  %vm661_vm10 = vcmp.eq.s32.totalorder %v519_v61, %v3629_v2 }
 0x118   :  { %2860 = vmatmul.msk.bf16.gmra.mxu0 %vm2859_vm6, %v4838_v6 }
 0x11a   :  { %296 = vperm.xlu1 %3095, %v75_v12   ;;  %v4069_v20 = vpop.f32.mrf.mxu2 }
 0x11b   :  { %293 = vperm.xlu0 %3094, %v74_v11   ;;  %299 = vperm.xlu2 %3096, %v76_v13   ;;  %v90_v13 = vld [vmem:[%s4830_s0 + $0x1e8] sm:$0xff] }
 0x11c   :  { %v201_v44 = vpop.permute.xlu1 %200 }
 0x11d   :  { %v4073_v24 = vpop.f32.mrf.mxu1  ;;  %v510_v38 = vpop.permute.xlu0 %509  ;;  %vm555_vm0 = vcmp.eq.s32.totalorder %v201_v44, %v3629_v2 }
 0x11e   :  { %vm658_vm13 = vcmp.eq.s32.totalorder %v510_v38, %v3629_v2  ;;  %vm2863_vm2 = vmpackc.low %vm556_vm1, %vm555_vm0 }
 0x11f   :  { %1672 = vmatmul.bf16.vlgmr.msrb.gmra.mxu2 %v1660_v22  ;;  %vm2965_vm15 = vmpackc.low %vm658_vm13, %vm657_vm14 }
 0x120   :  { %2964 = vmatmul.msk.bf16.gmra.mxu3 %vm2963_vm9, %v4838_v6  ;;  %1623 = vmatmul.bf16.vlgmr.msrb.gmra.mxu1 %v1563_v23 }
 0x121   :  { %1963 = vmatpush.bf16.msrb.mxu1 %v3583_v49  ;;  %2012 = vmatpush.bf16.msrb.mxu2 %v3583_v49  ;;  %v80_v49 = vld [vmem:[%s4830_s0 + $0x198] sm:$0xff] }
 0x122   :  { %305 = vperm.xlu1 %3095, %v78_v26   ;;  %v4087_v31 = vpop.f32.mrf.mxu2  ;;  %v92_v26 = vld [vmem:[%s4830_s0 + $0x1f8] sm:$0xff] }
 0x123   :  { %302 = vperm.xlu0 %3094, %v77_v27   ;;  %308 = vperm.xlu2 %3096, %v79_v28   ;;  %v93_v27 = vld [vmem:[%s4830_s0 + $0x200] sm:$0xff]  ;;  %v94_v28 = vld [vmem:[%s4830_s0 + $0x208] sm:$0xff] }
 0x124   :  { %v516_v56 = vpop.permute.xlu1 %515 }
 0x125   :  { %1964 = vmatpush.bf16.msrb.mxu1 %v3613_v58  ;;  %2013 = vmatpush.bf16.msrb.mxu2 %v3613_v58  ;;  %v4093_v34 = vpop.f32.mrf.mxu1  ;;  %v1540_v58 = vld [vmem:[%s4834_s4 + $0x50] sm:$0xff]  ;;  %v513_v52 = vpop.permute.xlu0 %512  ;;  %vm660_vm4 = vcmp.eq.s32.totalorder %v516_v56, %v3629_v2 }
 0x126   :  { %v1661_v42 = vpack.c.bf16 %v1541_v37, %v1540_v58  ;;  %vm659_vm3 = vcmp.eq.s32.totalorder %v513_v52, %v3629_v2  ;;  %v1663_v58 = vpack.c.bf16 %v1545_v32, %v1544_v30 }
 0x127   :  { %vm2967_vm5 = vmpackc.low %vm660_vm4, %vm659_vm3 }
 0x128   :  { %2862 = vmatmul.msk.bf16.gmra.mxu0 %vm2861_vm12, %v4838_v6 }
 0x129   :  { %1965 = vmatpush.bf16.msrb.mxu1 %v3656_v14  ;;  %2014 = vmatpush.bf16.msrb.mxu2 %v3656_v14  ;;  %v84_v14 = vld [vmem:[%s4830_s0 + $0x1b8] sm:$0xff] }
 0x12a   :  { %314 = vperm.xlu1 %3095, %v81_v35   ;;  %v4119_v41 = vpop.f32.mrf.mxu2  ;;  %v1537_v35 = vld [vmem:[%s4834_s4 + $0x38] sm:$0xff] }
 0x12b   :  { %311 = vperm.xlu0 %3094, %v80_v49   ;;  %317 = vperm.xlu2 %3096, %v82_v36   ;;  %v1536_v49 = vld [vmem:[%s4834_s4 + $0x30] sm:$0xff] }
 0x12c   :  { %v207_v17 = vpop.permute.xlu1 %206  ;;  %v1566_v37 = vpack.c.bf16 %v1537_v35, %v1536_v49 }
 0x12d   :  { %1966 = vmatpush.bf16.msrb.mxu1 %v3701_v29  ;;  %2015 = vmatpush.bf16.msrb.mxu2 %v3701_v29  ;;  %v4125_v45 = vpop.f32.mrf.mxu1  ;;  %v85_v29 = vld [vmem:[%s4830_s0 + $0x1c0] sm:$0xff]  ;;  %v522_v11 = vpop.permute.xlu0 %521  ;;  %vm557_vm6 = vcmp.eq.s32.totalorder %v207_v17, %v3629_v2 }
 0x12e   :  { %vm2865_vm8 = vmpackc.low %vm558_vm7, %vm557_vm6  ;;  %vm662_vm9 = vcmp.eq.s32.totalorder %v522_v11, %v3629_v2 }
 0x12f   :  { %1677 = vmatmul.bf16.gmra.mxu2 %v1661_v42  ;;  %vm2969_vm11 = vmpackc.low %vm662_vm9, %vm661_vm10 }
 0x130   :  { %2966 = vmatmul.msk.bf16.gmra.mxu3 %vm2965_vm15, %v4838_v6  ;;  %1628 = vmatmul.bf16.gmra.mxu1 %v1564_v43  ;;  %v95_v43 = vld [vmem:[%s4830_s0 + $0x210] sm:$0xff] }
 0x131   :  { %1967 = vmatpush.bf16.msrb.mxu1 %v3758_v47  ;;  %2016 = vmatpush.bf16.msrb.mxu2 %v3758_v47  ;;  %v86_v47 = vld [vmem:[%s4830_s0 + $0x1c8] sm:$0xff] }
 0x132   :  { %323 = vperm.xlu1 %3095, %v84_v14   ;;  %v4139_v51 = vpop.f32.mrf.mxu2  ;;  %v213_v14 = vpop.permute.xlu2 %212 }
 0x133   :  { %320 = vperm.xlu0 %3094, %v83_v50   ;;  %326 = vperm.xlu2 %3096, %v85_v29   ;;  %vm559_vm13 = vcmp.eq.s32.totalorder %v213_v14, %v3629_v2 }
 0x134   :  { %v528_v38 = vpop.permute.xlu1 %527 }
 0x135   :  { %1968 = vmatpush.bf16.msrb.mxu1 %v3803_v62  ;;  %2017 = vmatpush.bf16.msrb.mxu2 %v3803_v62  ;;  %v4145_v54 = vpop.f32.mrf.mxu1  ;;  %v88_v62 = vld [vmem:[%s4830_s0 + $0x1d8] sm:$0xff]  ;;  %v525_v25 = vpop.permute.xlu0 %524  ;;  %vm664_vm0 = vcmp.eq.s32.totalorder %v528_v38, %v3629_v2 }
 0x136   :  { %vm663_vm15 = vcmp.eq.s32.totalorder %v525_v25, %v3629_v2 }
 0x137   :  { %vm2971_vm1 = vmpackc.low %vm664_vm0, %vm663_vm15 }
 0x138   :  { %2864 = vmatmul.msk.bf16.gmra.mxu0 %vm2863_vm2, %v4838_v6 }
 0x139   :  { %1969 = vmatpush.bf16.msrb.mxu1 %v3863_v19  ;;  %2018 = vmatpush.bf16.msrb.mxu2 %v3863_v19 }
 0x13a   :  { %332 = vperm.xlu1 %3095, %v87_v57   ;;  %v4171_v4 = vpop.f32.mrf.mxu2  ;;  %v534_v57 = vpop.permute.xlu2 %533 }
 0x13b   :  { %329 = vperm.xlu0 %3094, %v86_v47   ;;  %335 = vperm.xlu2 %3096, %v88_v62   ;;  %vm666_vm6 = vcmp.eq.s32.totalorder %v534_v57, %v3629_v2 }
 0x13c   :  { %v4175_v7 = vpop.f32.mrf.mxu0  ;;  %v531_v29 = vpop.permute.xlu1 %530 }
 0x13d   :  { %1970 = vmatpush.bf16.msrb.mxu1 %v3912_v33  ;;  %2019 = vmatpush.bf16.msrb.mxu2 %v3912_v33  ;;  %v4179_v12 = vpop.f32.mrf.mxu1  ;;  %v216_v44 = vpop.permute.xlu0 %215 }
 0x13e   :  { %vm560_vm12 = vcmp.eq.s32.totalorder %v216_v44, %v3629_v2 }
 0x13f   :  { %1682 = vmatmul.bf16.gmra.mxu2 %v1662_v5  ;;  %vm2867_vm14 = vmpackc.low %vm560_vm12, %vm559_vm13 }
 0x140   :  { %2968 = vmatmul.msk.bf16.gmra.mxu3 %vm2967_vm5, %v4838_v6  ;;  %1633 = vmatmul.bf16.gmra.mxu1 %v1565_v10  ;;  %vm665_vm5 = vcmp.eq.s32.totalorder %v531_v29, %v3629_v2 }
 0x141   :  { %vm2973_vm7 = vmpackc.low %vm666_vm6, %vm665_vm5 }
 0x142   :  { %341 = vperm.xlu1 %3095, %v90_v13   ;;  %v4191_v18 = vpop.f32.mrf.mxu2  ;;  %v537_v3 = vpop.permute.xlu2 %536 }
 0x143   :  { %4840 = vst [vmem:[#allocation6_spill] sm:$0xff] %v4191_v18  ;;  %338 = vperm.xlu0 %3094, %v89_v15   ;;  %344 = vperm.xlu2 %3096, %v91_v16   ;;  %vm667_vm12 = vcmp.eq.s32.totalorder %v537_v3, %v3629_v2 }
 0x144   :  { %v4195_v22 = vpop.f32.mrf.mxu0  ;;  %v222_v59 = vpop.permute.xlu1 %221 }
 0x145   :  { %v4197_v23 = vpop.f32.mrf.mxu1  ;;  %v219_v62 = vpop.permute.xlu0 %218  ;;  %vm562_vm3 = vcmp.eq.s32.totalorder %v222_v59, %v3629_v2 }
 0x146   :  { %vm561_vm2 = vcmp.eq.s32.totalorder %v219_v62, %v3629_v2 }
 0x147   :  { %vm2869_vm4 = vmpackc.low %vm562_vm3, %vm561_vm2 }
 0x148   :  { %2866 = vmatmul.msk.bf16.gmra.mxu0 %vm2865_vm8, %v4838_v6 }
 0x14a   :  { %350 = vperm.xlu1 %3095, %v93_v27   ;;  %v4221_v36 = vpop.f32.mrf.mxu2  ;;  %v228_v17 = vpop.permute.xlu2 %227 }
 0x14b   :  { %4841 = vst [vmem:[#allocation7_spill] sm:$0xff] %v4221_v36  ;;  %347 = vperm.xlu0 %3094, %v92_v26   ;;  %353 = vperm.xlu2 %3096, %v94_v28   ;;  %vm564_vm9 = vcmp.eq.s32.totalorder %v228_v17, %v3629_v2 }
 0x14c   :  { %v4230_v42 = vpop.f32.mrf.mxu0  ;;  %v225_v13 = vpop.permute.xlu1 %224 }
 0x14d   :  { %v4225_v39 = vpop.f32.mrf.mxu1  ;;  %vm563_vm8 = vcmp.eq.s32.totalorder %v225_v13, %v3629_v2  ;;  %v540_v26 = vpop.permute.xlu0 %539 }
 0x14e   :  { %vm2871_vm10 = vmpackc.low %vm564_vm9, %vm563_vm8 }
 0x14f   :  { %1687 = vmatmul.bf16.gmra.mxu2 %v1663_v58 }
 0x150   :  { %2970 = vmatmul.msk.bf16.gmra.mxu3 %vm2969_vm11, %v4838_v6  ;;  %1638 = vmatmul.bf16.gmra.mxu1 %v1566_v37  ;;  %vm668_vm11 = vcmp.eq.s32.totalorder %v540_v26, %v3629_v2 }
 0x151   :  { %vm2975_vm13 = vmpackc.low %vm668_vm11, %vm667_vm12 }
 0x152   :  { %359 = vperm.xlu1 %3095, %v96_v40   ;;  %v4236_v48 = vpop.f32.mrf.mxu2  ;;  %v237_v59 = vpop.permute.xlu2 %236 }
 0x153   :  { %4842 = vst [vmem:[#allocation8_spill] sm:$0xff] %v4236_v48  ;;  %356 = vperm.xlu0 %3094, %v95_v43   ;;  %vm567_vm2 = vcmp.eq.s32.totalorder %v237_v59, %v3629_v2 }
 0x154   :  { %v4243_v52 = vpop.f32.mrf.mxu0  ;;  %v234_v35 = vpop.permute.xlu1 %233 }
 0x155   :  { %v4240_v50 = vpop.f32.mrf.mxu1  ;;  %v231_v49 = vpop.permute.xlu0 %230  ;;  %vm566_vm15 = vcmp.eq.s32.totalorder %v234_v35, %v3629_v2 }
 0x158   :  { %2868 = vmatmul.msk.bf16.gmra.mxu0 %vm2867_vm14, %v4838_v6  ;;  %vm565_vm14 = vcmp.eq.s32.totalorder %v231_v49, %v3629_v2 }
 0x159   :  { %vm2873_vm0 = vmpackc.low %vm566_vm15, %vm565_vm14 }
 0x15a   :  { %v4245_v56 = vpop.f32.mrf.mxu2 }
 0x15b   :  { %4843 = vst [vmem:[#allocation9_spill] sm:$0xff] %v4245_v56 }
 0x15c   :  { %v4256_v61 = vpop.f32.mrf.mxu0 }
 0x15d   :  { %v4249_v47 = vpop.f32.mrf.mxu1  ;;  %v240_v57 = vpop.permute.xlu0 %239 }
 0x160   :  { %2972 = vmatmul.msk.bf16.gmra.mxu3 %vm2971_vm1, %v4838_v6  ;;  %vm568_vm1 = vcmp.eq.s32.totalorder %v240_v57, %v3629_v2  ;;  %v243_v57 = vpop.permute.xlu1 %242 }
 0x161   :  { %vm2875_vm3 = vmpackc.low %vm568_vm1, %vm567_vm2 }
 0x162   :  { %v4252_v60 = vpop.f32.mrf.mxu2 }
 0x163   :  { %4844 = vst [vmem:[#allocation10_spill] sm:$0xff] %v4252_v60 }
 0x164   :  { %v4265_v10 = vpop.f32.mrf.mxu0 }
 0x165   :  { %v4258_v1 = vpop.f32.mrf.mxu1 }
 0x168   :  { %2870 = vmatmul.msk.bf16.gmra.mxu0 %vm2869_vm4, %v4838_v6  ;;  %vm569_vm4 = vcmp.eq.s32.totalorder %v243_v57, %v3629_v2 }
 0x16a   :  { %v4261_v5 = vpop.f32.mrf.mxu2 }
 0x16b   :  { %4845 = vst [vmem:[#allocation11_spill] sm:$0xff] %v4261_v5 }
 0x16d   :  { %v4267_v11 = vpop.f32.mrf.mxu1 }
 0x170   :  { %2974 = vmatmul.msk.bf16.gmra.mxu3 %vm2973_vm7, %v4838_v6 }
 0x172   :  { %v4270_v15 = vpop.f32.mrf.mxu2  ;;  %v4272_v16 = vpop.f32.mrf.mxu3 }
 0x173   :  { %4846 = vst [vmem:[#allocation12_spill] sm:$0xff] %v4270_v15  ;;  %v246_v15 = vpop.permute.xlu2 %245 }
 0x174   :  { %4847 = vst [vmem:[#allocation13_spill] sm:$0xff] %v4272_v16  ;;  %vm570_vm5 = vcmp.eq.s32.totalorder %v246_v15, %v3629_v2 }
 0x175   :  { %v4276_v21 = vpop.f32.mrf.mxu0  ;;  %v4278_v25 = vpop.f32.mrf.mxu1  ;;  %vm2877_vm6 = vmpackc.low %vm570_vm5, %vm569_vm4 }
 0x178   :  { %2872 = vmatmul.msk.bf16.gmra.mxu0 %vm2871_vm10, %v4838_v6 }
 0x17a   :  { %v4281_v27 = vpop.f32.mrf.mxu2  ;;  %v4283_v28 = vpop.f32.mrf.mxu3 }
 0x17b   :  { %4848 = vst [vmem:[#allocation14_spill] sm:$0xff] %v4281_v27 }
 0x17c   :  { %4849 = vst [vmem:[#allocation15_spill] sm:$0xff] %v4283_v28 }
 0x17d   :  { %v4287_v30 = vpop.f32.mrf.mxu0  ;;  %v4289_v32 = vpop.f32.mrf.mxu1 }
 0x180   :  { %2976 = vmatmul.msk.bf16.gmra.mxu3 %vm2975_vm13, %v4838_v6 }
 0x182   :  { %v4292_v58 = vpop.f32.mrf.mxu2 }
 0x183   :  { %4850 = vst [vmem:[#allocation16_spill] sm:$0xff] %v4292_v58  ;;  %v4294_v37 = vpop.f32.mrf.mxu3 }
 0x184   :  { %4851 = vst [vmem:[#allocation17_spill] sm:$0xff] %v4294_v37 }
 0x185   :  { %v1086_v38 = vpop.f32.mrf.mxu0  ;;  %v4298_v40 = vpop.f32.mrf.mxu1 }
 0x188   :  { %2874 = vmatmul.msk.bf16.gmra.mxu0 %vm2873_vm0, %v4838_v6 }
 0x18a   :  { %v4301_v43 = vpop.f32.mrf.mxu2 }
 0x18b   :  { %4852 = vst [vmem:[#allocation18_spill] sm:$0xff] %v4301_v43  ;;  %v4303_v44 = vpop.f32.mrf.mxu3 }
 0x18c   :  { %4853 = vst [vmem:[#allocation19_spill] sm:$0xff] %v4303_v44  ;;  %v4321_v44 = vld [vmem:[%s4833_s3] ss:$0 sm:$0xff] }
 0x18d   :  { %v1088_v14 = vpop.f32.mrf.mxu0  ;;  %v4305_v29 = vpop.f32.mrf.mxu1  ;;  %v1067_v59 = vadd.f32 %v4321_v44, %v4175_v7  ;;  %v1087_v28 = vadd.f32 %v4321_v44, %v1086_v38  ;;  %v4859_v7 = vmov 1.0|1.0  }
 0x192   :  { %v4307_v62 = vpop.f32.mrf.mxu2 }
 0x193   :  { %4854 = vst [vmem:[#allocation20_spill] sm:$0xff] %v4307_v62  ;;  %v4313_v17 = vpop.f32.mrf.mxu3 }
 0x194   :  { %4856 = vst [vmem:[#allocation22_spill] sm:$0xff] %v4313_v17  ;;  %v1069_v17 = vadd.f32 %v4321_v44, %v4195_v22 }
 0x195   :  { %v1091_v3 = vpop.f32.mrf.mxu0  ;;  %v4311_v13 = vpop.f32.mrf.mxu1 }
 0x196   :  { %4855 = vst [vmem:[#allocation21_spill] sm:$0xff] %v4311_v13 }
 0x198   :  { %2876 = vmatmul.msk.bf16.gmra.mxu0 %vm2875_vm3, %v4838_v6 }
 0x19a   :  { %v4316_v26 = vpop.f32.mrf.mxu2 }
 0x19b   :  { %4857 = vst [vmem:[#allocation23_spill] sm:$0xff] %v4316_v26  ;;  %v4323_v37 = vpop.f32.mrf.mxu3  ;;  %v1089_v26 = vadd.f32 %v4321_v44, %v1088_v14 }
 0x19c   :  { %4858 = vst [vmem:[#allocation24_spill] sm:$0xff] %v4323_v37 }
 0x19d   :  { %v1093_v49 = vpop.f32.mrf.mxu0  ;;  %v1624_v35 = vpop.f32.mrf.mxu1 }
 0x19e   :  { %v1644_v6 = vadd.f32 %v1624_v35, %v1067_v59 }
 0x1a0   :  { %3099 = vtanh.f32 %v1644_v6  ;;  %v252_v6 = vpop.permute.xlu1 %251 }
 0x1a1   :  { %vm572_vm8 = vcmp.eq.s32.totalorder %v252_v6, %v3629_v2 }
 0x1a2   :  { %v1673_v27 = vpop.f32.mrf.mxu2 }
 0x1a3   :  { %v1693_v60 = vadd.f32 %v1673_v27, %v1087_v28  ;;  %v4336_v57 = vpop.f32.mrf.mxu3  ;;  %v1072_v28 = vadd.f32 %v4321_v44, %v4230_v42 }
 0x1a4   :  { %4860 = vst [vmem:[#allocation25_spill] sm:$0xff] %v4336_v57 }
 0x1a5   :  { %v4332_v16 = vpop.f32.mrf.mxu0  ;;  %v1626_v5 = vpop.f32.mrf.mxu1 }
 0x1a6   :  { %v1645_v37 = vadd.f32 %v1626_v5, %v1069_v17  ;;  %v3100_v15 = vpop.eup %3099  ;;  %v249_v5 = vpop.permute.xlu0 %248 }
 0x1a7   :  { %vm571_vm7 = vcmp.eq.s32.totalorder %v249_v5, %v3629_v2  ;;  %v4361_v5 = vld [vmem:[%s4832_s2 + $0x30] sm:$0xff] }
 0x1a8   :  { %2878 = vmatmul.msk.bf16.gmra.mxu0 %vm2877_vm6, %v4859_v7  ;;  %3101 = vtanh.f32 %v1645_v37  ;;  %vm2879_vm9 = vmpackc.low %vm572_vm8, %vm571_vm7 }
 0x1a9   :  { %3103 = vtanh.f32 %v1693_v60  ;;  %v4345_v60 = vld [vmem:[%s4832_s2 + $0x38] sm:$0xff] }
 0x1aa   :  { %v1675_v35 = vpop.f32.mrf.mxu2 }
 0x1ab   :  { %v1694_v22 = vadd.f32 %v1675_v35, %v1089_v26  ;;  %v1074_v26 = vadd.f32 %v4321_v44, %v4243_v52  ;;  %v4352_v42 = vpop.f32.mrf.mxu3 }
 0x1ac   :  { %4861 = vst [vmem:[#allocation26_spill] sm:$0xff] %v4352_v42 }
 0x1ad   :  { %3105 = vtanh.f32 %v1694_v22  ;;  %v4338_v38 = vpop.f32.mrf.mxu0  ;;  %v1629_v59 = vpop.f32.mrf.mxu1 }
 0x1ae   :  { %v3102_v62 = vpop.eup %3101  ;;  %v1646_v17 = vadd.f32 %v1629_v59, %v1072_v28 }
 0x1af   :  { %v1727_v56 = vpack.c.bf16 %v3102_v62, %v3100_v15  ;;  %v3104_v27 = vpop.eup %3103 }
 0x1b0   :  { %3107 = vtanh.f32 %v1646_v17  ;;  %v4381_v17 = vld [vmem:[%s4832_s2 + $0x20] sm:$0xff] }
 0x1b1   :  { %1739 = vmatmul.bf16.vlgmr.msrb.gmra.mxu3 %v1727_v56  ;;  %v1092_v56 = vadd.f32 %v4321_v44, %v1091_v3  ;;  %v1094_v3 = vadd.f32 %v4321_v44, %v1093_v49 }
 0x1b2   :  { %v1678_v37 = vpop.f32.mrf.mxu2  ;;  %2079 = vmatpush.bf16.msrb.mxu3 %v4345_v60 }
 0x1b3   :  { %v3106_v14 = vpop.eup %3105  ;;  %v1695_v52 = vadd.f32 %v1678_v37, %v1092_v56  ;;  %v4375_v49 = vpop.f32.mrf.mxu3 }
 0x1b4   :  { %v1776_v62 = vpack.c.bf16 %v3106_v14, %v3104_v27  ;;  %v4370_v27 = vld [vmem:[%s4832_s2 + $0x28] sm:$0xff]  ;;  %4862 = vst [vmem:[#allocation27_spill] sm:$0xff] %v4375_v49  ;;  %v258_v56 = vpop.permute.xlu0 %257 }
 0x1b5   :  { %v4355_v35 = vpop.f32.mrf.mxu0  ;;  %v1631_v22 = vpop.f32.mrf.mxu1  ;;  %vm574_vm10 = vcmp.eq.s32.totalorder %v258_v56, %v3629_v2 }
 0x1b6   :  { %1788 = vmatmul.bf16.vlgmr.msra.gmra.mxu1 %v1776_v62  ;;  %v1647_v15 = vadd.f32 %v1631_v22, %v1074_v26  ;;  %2080 = vmatpush.bf16.msrb.mxu3 %v4361_v5  ;;  %v3108_v28 = vpop.eup %3107 }
 0x1b7   :  { %2128 = vmatpush.bf16.msra.mxu1 %v4345_v60 }
 0x1b8   :  { %2880 = vmatmul.msk.bf16.gmra.mxu0 %vm2879_vm9, %v4859_v7  ;;  %3109 = vtanh.f32 %v1647_v15  ;;  %v1077_v15 = vadd.f32 %v4321_v44, %v4256_v61  ;;  %v1079_v61 = vadd.f32 %v4321_v44, %v4265_v10 }
 0x1b9   :  { %3111 = vtanh.f32 %v1695_v52 }
 0x1ba   :  { %v1680_v59 = vpop.f32.mrf.mxu2  ;;  %2081 = vmatpush.bf16.msrb.mxu3 %v4370_v27 }
 0x1bb   :  { %v1696_v6 = vadd.f32 %v1680_v59, %v1094_v3  ;;  %2129 = vmatpush.bf16.msra.mxu1 %v4361_v5  ;;  %v255_v59 = vpop.permute.xlu2 %254  ;;  %v4411_v56 = vpop.f32.mrf.mxu3 }
 0x1bc   :  { %vm573_vm11 = vcmp.eq.s32.totalorder %v255_v59, %v3629_v2  ;;  %4863 = vst [vmem:[#allocation28_spill] sm:$0xff] %v4411_v56 }
 0x1bd   :  { %3113 = vtanh.f32 %v1696_v6  ;;  %v4373_v37 = vpop.f32.mrf.mxu0  ;;  %v1634_v14 = vpop.f32.mrf.mxu1  ;;  %v4390_v6 = vld [vmem:[%s4832_s2 + $0x18] sm:$0xff]  ;;  %vm2881_vm12 = vmpackc.low %vm574_vm10, %vm573_vm11 }
 0x1be   :  { %v3110_v62 = vpop.eup %3109  ;;  %2082 = vmatpush.bf16.msrb.mxu3 %v4381_v17 }
 0x1bf   :  { %2130 = vmatpush.bf16.msra.mxu1 %v4370_v27  ;;  %v1728_v26 = vpack.c.bf16 %v3110_v62, %v3108_v28  ;;  %v3112_v22 = vpop.eup %3111  ;;  %v1648_v28 = vadd.f32 %v1634_v14, %v1077_v15  ;;  %v4405_v14 = vld [vmem:[%s4832_s2 + $0x10] sm:$0xff] }
 0x1c1   :  { %1744 = vmatmul.bf16.gmra.mxu3 %v1728_v26  ;;  %v1097_v26 = vadd.f32 %v4321_v44, %v4332_v16  ;;  %3115 = vtanh.f32 %v1648_v28  ;;  %v1099_v16 = vadd.f32 %v4321_v44, %v4338_v38  ;;  %v261_v28 = vpop.permute.xlu1 %260 }
 0x1c2   :  { %v1683_v52 = vpop.f32.mrf.mxu2  ;;  %2083 = vmatpush.bf16.msrb.mxu3 %v4390_v6  ;;  %vm575_vm13 = vcmp.eq.s32.totalorder %v261_v28, %v3629_v2 }
 0x1c3   :  { %v3114_v3 = vpop.eup %3113  ;;  %2131 = vmatpush.bf16.msra.mxu1 %v4381_v17  ;;  %v1697_v10 = vadd.f32 %v1683_v52, %v1097_v26 }
 0x1c4   :  { %v1777_v62 = vpack.c.bf16 %v3114_v3, %v3112_v22 }
 0x1c5   :  { %v4399_v49 = vpop.f32.mrf.mxu0  ;;  %v1636_v42 = vpop.f32.mrf.mxu1 }
 0x1c6   :  { %1793 = vmatmul.bf16.gmra.mxu1 %v1777_v62  ;;  %v1649_v57 = vadd.f32 %v1636_v42, %v1079_v61  ;;  %2084 = vmatpush.bf16.msrb.mxu3 %v4405_v14  ;;  %v1082_v62 = vadd.f32 %v4321_v44, %v4276_v21  ;;  %v1102_v21 = vadd.f32 %v4321_v44, %v4355_v35 }
 0x1c7   :  { %2132 = vmatpush.bf16.msra.mxu1 %v4390_v6  ;;  %v3116_v15 = vpop.eup %3115 }
 0x1c8   :  { %2882 = vmatmul.msk.bf16.gmra.mxu0 %vm2881_vm12, %v4859_v7  ;;  %3117 = vtanh.f32 %v1649_v57 }
 0x1c9   :  { %3119 = vtanh.f32 %v1697_v10  ;;  %v264_v10 = vpop.permute.xlu2 %263 }
 0x1ca   :  { %v1685_v42 = vpop.f32.mrf.mxu2  ;;  %2085 = vmatpush.bf16.msrb.mxu3 %v3863_v19  ;;  %vm576_vm14 = vcmp.eq.s32.totalorder %v264_v10, %v3629_v2 }
 0x1cb   :  { %v1698_v22 = vadd.f32 %v1685_v42, %v1099_v16  ;;  %2133 = vmatpush.bf16.msra.mxu1 %v4405_v14  ;;  %v4421_v16 = vpop.f32.mrf.mxu3  ;;  %vm2883_vm15 = vmpackc.low %vm576_vm14, %vm575_vm13 }
 0x1cc   :  { %4864 = vst [vmem:[#allocation29_spill] sm:$0xff] %v4421_v16 }
 0x1cd   :  { %3121 = vtanh.f32 %v1698_v22  ;;  %v4415_v3 = vpop.f32.mrf.mxu0  ;;  %v1639_v52 = vpop.f32.mrf.mxu1  ;;  %v1084_v22 = vadd.f32 %v4321_v44, %v4287_v30 }
 0x1ce   :  { %v3118_v59 = vpop.eup %3117  ;;  %2086 = vmatpush.bf16.msrb.mxu3 %v3912_v33  ;;  %v1650_v42 = vadd.f32 %v1639_v52, %v1082_v62  ;;  %v1104_v52 = vadd.f32 %v4321_v44, %v4373_v37 }
 0x1cf   :  { %2134 = vmatpush.bf16.msra.mxu1 %v3863_v19  ;;  %v1729_v38 = vpack.c.bf16 %v3118_v59, %v3116_v15  ;;  %v3120_v57 = vpop.eup %3119 }
 0x1d0   :  { %3123 = vtanh.f32 %v1650_v42  ;;  %v270_v42 = vpop.permute.xlu1 %269 }
 0x1d1   :  { %1749 = vmatmul.bf16.gmra.mxu3 %v1729_v38  ;;  %vm578_vm1 = vcmp.eq.s32.totalorder %v270_v42, %v3629_v2 }
 0x1d2   :  { %v1688_v61 = vpop.f32.mrf.mxu2 }
 0x1d3   :  { %v3122_v26 = vpop.eup %3121  ;;  %2135 = vmatpush.bf16.msra.mxu1 %v3912_v33  ;;  %v1699_v33 = vadd.f32 %v1688_v61, %v1102_v21 }
 0x1d4   :  { %v1778_v19 = vpack.c.bf16 %v3122_v26, %v3120_v57  ;;  %v4435_v57 = vpop.f32.mrf.mxu3 }
 0x1d5   :  { %v4430_v15 = vpop.f32.mrf.mxu0  ;;  %v1641_v59 = vpop.f32.mrf.mxu1  ;;  %4865 = vst [vmem:[#allocation30_spill] sm:$0xff] %v4435_v57 }
 0x1d6   :  { %1798 = vmatmul.bf16.gmra.mxu1 %v1778_v19  ;;  %v1651_v38 = vadd.f32 %v1641_v59, %v1084_v22  ;;  %v3124_v35 = vpop.eup %3123  ;;  %v267_v19 = vpop.permute.xlu0 %266 }
 0x1d7   :  { %vm577_vm0 = vcmp.eq.s32.totalorder %v267_v19, %v3629_v2 }
 0x1d8   :  { %2884 = vmatmul.msk.bf16.gmra.mxu0 %vm2883_vm15, %v4859_v7  ;;  %3125 = vtanh.f32 %v1651_v38  ;;  %vm2885_vm2 = vmpackc.low %vm578_vm1, %vm577_vm0 }
 0x1d9   :  { %3127 = vtanh.f32 %v1699_v33 }
 0x1da   :  { %v1690_v30 = vpop.f32.mrf.mxu2 }
 0x1db   :  { %v1700_v28 = vadd.f32 %v1690_v30, %v1104_v52  ;;  %v273_v30 = vpop.permute.xlu2 %272 }
 0x1dc   :  { %v4441_v21 = vpop.f32.mrf.mxu3  ;;  %vm579_vm4 = vcmp.eq.s32.totalorder %v273_v30, %v3629_v2 }
 0x1dd   :  { %3129 = vtanh.f32 %v1700_v28  ;;  %v4437_v62 = vpop.f32.mrf.mxu0  ;;  %4866 = vst [vmem:[#allocation31_spill] sm:$0xff] %v4441_v21 }
 0x1de   :  { %v3126_v26 = vpop.eup %3125  ;;  %v276_v38 = vpop.permute.xlu0 %275 }
 0x1df   :  { %v1730_v10 = vpack.c.bf16 %v3126_v26, %v3124_v35  ;;  %v3128_v61 = vpop.eup %3127  ;;  %vm580_vm3 = vcmp.eq.s32.totalorder %v276_v38, %v3629_v2  ;;  %v279_v26 = vpop.permute.xlu1 %278 }
 0x1e0   :  { %vm2887_vm5 = vmpackc.low %vm580_vm3, %vm579_vm4  ;;  %vm581_vm6 = vcmp.eq.s32.totalorder %v279_v26, %v3629_v2 }
 0x1e1   :  { %1754 = vmatmul.bf16.gmra.mxu3 %v1730_v10 }
 0x1e3   :  { %v3130_v22 = vpop.eup %3129  ;;  %v282_v10 = vpop.permute.xlu2 %281 }
 0x1e4   :  { %v1779_v37 = vpack.c.bf16 %v3130_v22, %v3128_v61  ;;  %v4446_v33 = vpop.f32.mrf.mxu3  ;;  %vm582_vm7 = vcmp.eq.s32.totalorder %v282_v10, %v3629_v2 }
 0x1e5   :  { %v4443_v59 = vpop.f32.mrf.mxu0  ;;  %4867 = vst [vmem:[#allocation32_spill] sm:$0xff] %v4446_v33  ;;  %vm2889_vm8 = vmpackc.low %vm582_vm7, %vm581_vm6 }
 0x1e6   :  { %1803 = vmatmul.bf16.gmra.mxu1 %v1779_v37  ;;  %v285_v37 = vpop.permute.xlu0 %284 }
 0x1e7   :  { %v288_v38 = vpop.permute.xlu1 %287  ;;  %vm583_vm9 = vcmp.eq.s32.totalorder %v285_v37, %v3629_v2 }
 0x1e8   :  { %2886 = vmatmul.msk.bf16.gmra.mxu0 %vm2885_vm2, %v4859_v7  ;;  %vm584_vm10 = vcmp.eq.s32.totalorder %v288_v38, %v3629_v2 }
 0x1e9   :  { %vm2891_vm11 = vmpackc.low %vm584_vm10, %vm583_vm9 }
 0x1eb   :  { %v291_v10 = vpop.permute.xlu2 %290 }
 0x1ec   :  { %v4453_v28 = vpop.f32.mrf.mxu3  ;;  %vm585_vm13 = vcmp.eq.s32.totalorder %v291_v10, %v3629_v2  ;;  %v1107_v10 = vadd.f32 %v4321_v44, %v4399_v49 }
 0x1ed   :  { %v4448_v52 = vpop.f32.mrf.mxu0  ;;  %4868 = vst [vmem:[#allocation33_spill] sm:$0xff] %v4453_v28 }
 0x1ee   :  { %v294_v57 = vpop.permute.xlu0 %293 }
 0x1ef   :  { %vm586_vm12 = vcmp.eq.s32.totalorder %v294_v57, %v3629_v2 }
 0x1f0   :  { %vm2893_vm14 = vmpackc.low %vm586_vm12, %vm585_vm13 }
 0x1f4   :  { %v4458_v19 = vpop.f32.mrf.mxu3 }
 0x1f5   :  { %v4455_v35 = vpop.f32.mrf.mxu0  ;;  %4869 = vst [vmem:[#allocation34_spill] sm:$0xff] %v4458_v19  ;;  %v300_v19 = vpop.permute.xlu2 %299 }
 0x1f6   :  { %vm588_vm0 = vcmp.eq.s32.totalorder %v300_v19, %v3629_v2  ;;  %v303_v36 = vpop.permute.xlu0 %302 }
 0x1f7   :  { %vm589_vm2 = vcmp.eq.s32.totalorder %v303_v36, %v3629_v2 }
 0x1f8   :  { %2888 = vmatmul.msk.bf16.gmra.mxu0 %vm2887_vm5, %v4859_v7 }
 0x1fc   :  { %v4464_v61 = vpop.f32.mrf.mxu3 }
 0x1fd   :  { %v4460_v42 = vpop.f32.mrf.mxu0  ;;  %4870 = vst [vmem:[#allocation35_spill] sm:$0xff] %v4464_v61  ;;  %v297_v61 = vpop.permute.xlu1 %296 }
 0x1fe   :  { %vm587_vm15 = vcmp.eq.s32.totalorder %v297_v61, %v3629_v2  ;;  %v1109_v61 = vadd.f32 %v4321_v44, %v4415_v3 }
 0x1ff   :  { %vm2895_vm1 = vmpackc.low %vm588_vm0, %vm587_vm15 }
 0x204   :  { %v4469_v30 = vpop.f32.mrf.mxu3 }
 0x205   :  { %v1126_v22 = vpop.f32.mrf.mxu0  ;;  %4871 = vst [vmem:[#allocation36_spill] sm:$0xff] %v4469_v30 }
 0x208   :  { %2890 = vmatmul.msk.bf16.gmra.mxu0 %vm2889_vm8, %v4859_v7 }
 0x20c   :  { %v4471_v16 = vpop.f32.mrf.mxu3 }
 0x20d   :  { %v1128_v26 = vpop.f32.mrf.mxu0  ;;  %4872 = vst [vmem:[#allocation37_spill] sm:$0xff] %v4471_v16  ;;  %v1127_v16 = vadd.f32 %v4321_v44, %v1126_v22  ;;  %v306_v22 = vpop.permute.xlu1 %305 }
 0x20e   :  { %v1129_v33 = vadd.f32 %v4321_v44, %v1128_v26  ;;  %vm590_vm3 = vcmp.eq.s32.totalorder %v306_v22, %v3629_v2  ;;  %v309_v22 = vpop.permute.xlu2 %308 }
 0x20f   :  { %vm2897_vm4 = vmpackc.low %vm590_vm3, %vm589_vm2  ;;  %vm591_vm6 = vcmp.eq.s32.totalorder %v309_v22, %v3629_v2 }
 0x214   :  { %v4476_v37 = vpop.f32.mrf.mxu3 }
 0x215   :  { %v1131_v56 = vpop.f32.mrf.mxu0  ;;  %4873 = vst [vmem:[#allocation38_spill] sm:$0xff] %v4476_v37 }
 0x218   :  { %2892 = vmatmul.msk.bf16.gmra.mxu0 %vm2891_vm11, %v4859_v7 }
 0x21d   :  { %v1133_v38 = vpop.f32.mrf.mxu0 }
 0x21e   :  { %v1134_v36 = vadd.f32 %v4321_v44, %v1133_v38 }
 0x225   :  { %v4481_v57 = vpop.f32.mrf.mxu0 }
 0x228   :  { %2894 = vmatmul.msk.bf16.gmra.mxu0 %vm2893_vm14, %v4859_v7 }
 0x22d   :  { %v1138_v18 = vpop.f32.mrf.mxu0 }
 0x233   :  { %v1789_v28 = vpop.f32.mrf.mxu1 }
 0x234   :  { %v1740_v30 = vpop.f32.mrf.mxu3  ;;  %v1809_v37 = vadd.f32 %v1789_v28, %v1127_v16 }
 0x235   :  { %v1760_v21 = vadd.f32 %v1740_v30, %v1107_v10 }
 0x236   :  { %3131 = vtanh.f32 %v1809_v37 }
 0x238   :  { %2896 = vmatmul.msk.bf16.gmra.mxu0 %vm2895_vm1, %v4859_v7 }
 0x23b   :  { %v1791_v48 = vpop.f32.mrf.mxu1 }
 0x23c   :  { %v1810_v43 = vadd.f32 %v1791_v48, %v1129_v33  ;;  %v1742_v19 = vpop.f32.mrf.mxu3  ;;  %v3132_v13 = vpop.eup %3131  ;;  %v1132_v33 = vadd.f32 %v4321_v44, %v1131_v56  ;;  %v1114_v56 = vadd.f32 %v4321_v44, %v4437_v62 }
 0x23d   :  { %v1761_v58 = vadd.f32 %v1742_v19, %v1109_v61 }
 0x23e   :  { %3133 = vtanh.f32 %v1810_v43 }
 0x23f   :  { %3135 = vtanh.f32 %v1760_v21 }
 0x240   :  { %3137 = vtanh.f32 %v1761_v58  ;;  %v1112_v58 = vadd.f32 %v4321_v44, %v4430_v15  ;;  %v312_v15 = vpop.permute.xlu0 %311 }
 0x241   :  { %vm592_vm5 = vcmp.eq.s32.totalorder %v312_v15, %v3629_v2  ;;  %v318_v15 = vpop.permute.xlu2 %317 }
 0x242   :  { %vm2899_vm7 = vmpackc.low %vm592_vm5, %vm591_vm6  ;;  %vm594_vm9 = vcmp.eq.s32.totalorder %v318_v15, %v3629_v2 }
 0x243   :  { %v1794_v49 = vpop.f32.mrf.mxu1 }
 0x244   :  { %v3134_v16 = vpop.eup %3133  ;;  %v1745_v3 = vpop.f32.mrf.mxu3  ;;  %v1811_v21 = vadd.f32 %v1794_v49, %v1132_v33  ;;  %v1137_v33 = vadd.f32 %v4321_v44, %v4481_v57  ;;  %v1119_v57 = vadd.f32 %v4321_v44, %v4448_v52 }
 0x245   :  { %v3136_v28 = vpop.eup %3135  ;;  %v1892_v30 = vpack.c.bf16 %v3134_v16, %v3132_v13  ;;  %v4498_v13 = vpop.f32.mrf.mxu0  ;;  %v1762_v26 = vadd.f32 %v1745_v3, %v1112_v58  ;;  %v1117_v58 = vadd.f32 %v4321_v44, %v4443_v59 }
 0x246   :  { %v3138_v48 = vpop.eup %3137  ;;  %3139 = vtanh.f32 %v1811_v21  ;;  %v315_v52 = vpop.permute.xlu1 %314 }
 0x247   :  { %v1843_v43 = vpack.c.bf16 %v3138_v48, %v3136_v28  ;;  %1904 = vmatmul.bf16.vlgmr.msra.gmra.mxu3 %v1892_v30  ;;  %vm593_vm8 = vcmp.eq.s32.totalorder %v315_v52, %v3629_v2 }
 0x248   :  { %2898 = vmatmul.msk.bf16.gmra.mxu0 %vm2897_vm4, %v4859_v7  ;;  %2244 = vmatpush.bf16.msra.mxu3 %v4345_v60  ;;  %vm2901_vm10 = vmpackc.low %vm594_vm9, %vm593_vm8 }
 0x249   :  { %1855 = vmatmul.bf16.vlgmr.msra.gmra.mxu2 %v1843_v43 }
 0x24a   :  { %2195 = vmatpush.bf16.msra.mxu2 %v4345_v60 }
 0x24b   :  { %v1796_v37 = vpop.f32.mrf.mxu1 }
 0x24c   :  { %v1812_v10 = vadd.f32 %v1796_v37, %v1134_v36  ;;  %2245 = vmatpush.bf16.msra.mxu3 %v4361_v5  ;;  %v1747_v61 = vpop.f32.mrf.mxu3  ;;  %v3140_v38 = vpop.eup %3139  ;;  %v1139_v36 = vadd.f32 %v4321_v44, %v1138_v18  ;;  %v4527_v18 = vld [vmem:[%s4832_s2 + $0x8] sm:$0xff] }
 0x24d   :  { %v1763_v19 = vadd.f32 %v1747_v61, %v1114_v56  ;;  %v1143_v28 = vpop.f32.mrf.mxu0 }
 0x24e   :  { %3141 = vtanh.f32 %v1812_v10  ;;  %2196 = vmatpush.bf16.msra.mxu2 %v4361_v5 }
 0x24f   :  { %3143 = vtanh.f32 %v1762_v26 }
 0x250   :  { %3145 = vtanh.f32 %v1763_v19  ;;  %2246 = vmatpush.bf16.msra.mxu3 %v4370_v27 }
 0x252   :  { %2197 = vmatpush.bf16.msra.mxu2 %v4370_v27 }
 0x253   :  { %v1799_v49 = vpop.f32.mrf.mxu1 }
 0x254   :  { %v3142_v62 = vpop.eup %3141  ;;  %2247 = vmatpush.bf16.msra.mxu3 %v4381_v17  ;;  %v1750_v30 = vpop.f32.mrf.mxu3  ;;  %v1813_v21 = vadd.f32 %v1799_v49, %v1137_v33  ;;  %v4535_v49 = vld [vmem:[%s4832_s2] sm:$0xff] }
 0x255   :  { %v3144_v16 = vpop.eup %3143  ;;  %v1893_v3 = vpack.c.bf16 %v3142_v62, %v3140_v38  ;;  %v1764_v26 = vadd.f32 %v1750_v30, %v1117_v58  ;;  %v4522_v59 = vpop.f32.mrf.mxu0 }
 0x256   :  { %v3146_v48 = vpop.eup %3145  ;;  %2198 = vmatpush.bf16.msra.mxu2 %v4381_v17  ;;  %3147 = vtanh.f32 %v1813_v21 }
 0x257   :  { %v1844_v43 = vpack.c.bf16 %v3146_v48, %v3144_v16  ;;  %1909 = vmatmul.bf16.gmra.mxu3 %v1893_v3  ;;  %v1142_v48 = vadd.f32 %v4321_v44, %v4498_v13 }
 0x258   :  { %2900 = vmatmul.msk.bf16.gmra.mxu0 %vm2899_vm7, %v4859_v7  ;;  %2248 = vmatpush.bf16.msra.mxu3 %v4390_v6 }
 0x259   :  { %1860 = vmatmul.bf16.gmra.mxu2 %v1844_v43  ;;  %v1122_v43 = vadd.f32 %v4321_v44, %v4455_v35  ;;  %v324_v35 = vpop.permute.xlu1 %323 }
 0x25a   :  { %2199 = vmatpush.bf16.msra.mxu2 %v4390_v6  ;;  %vm596_vm12 = vcmp.eq.s32.totalorder %v324_v35, %v3629_v2 }
 0x25b   :  { %v1801_v37 = vpop.f32.mrf.mxu1 }
 0x25c   :  { %v1814_v56 = vadd.f32 %v1801_v37, %v1139_v36  ;;  %2249 = vmatpush.bf16.msra.mxu3 %v4405_v14  ;;  %v1752_v10 = vpop.f32.mrf.mxu3  ;;  %v3148_v19 = vpop.eup %3147  ;;  %v1144_v36 = vadd.f32 %v4321_v44, %v1143_v28 }
 0x25d   :  { %v1765_v61 = vadd.f32 %v1752_v10, %v1119_v57  ;;  %v4545_v58 = vpop.f32.mrf.mxu0  ;;  %v1124_v57 = vadd.f32 %v4321_v44, %v4460_v42 }
 0x25e   :  { %3149 = vtanh.f32 %v1814_v56  ;;  %2200 = vmatpush.bf16.msra.mxu2 %v4405_v14 }
 0x25f   :  { %3151 = vtanh.f32 %v1764_v26 }
 0x260   :  { %3153 = vtanh.f32 %v1765_v61  ;;  %2250 = vmatpush.bf16.msra.mxu3 %v4527_v18  ;;  %v321_v61 = vpop.permute.xlu0 %320 }
 0x261   :  { %vm595_vm11 = vcmp.eq.s32.totalorder %v321_v61, %v3629_v2 }
 0x262   :  { %2201 = vmatpush.bf16.msra.mxu2 %v4527_v18  ;;  %vm2903_vm13 = vmpackc.low %vm596_vm12, %vm595_vm11 }
 0x263   :  { %v1804_v38 = vpop.f32.mrf.mxu1 }
 0x264   :  { %v3150_v22 = vpop.eup %3149  ;;  %2251 = vmatpush.bf16.msra.mxu3 %v4535_v49  ;;  %v1755_v16 = vpop.f32.mrf.mxu3  ;;  %v1815_v21 = vadd.f32 %v1804_v38, %v1142_v48 }
 0x265   :  { %v3152_v62 = vpop.eup %3151  ;;  %v1894_v30 = vpack.c.bf16 %v3150_v22, %v3148_v19  ;;  %v1766_v26 = vadd.f32 %v1755_v16, %v1122_v43  ;;  %v4550_v19 = vpop.f32.mrf.mxu0 }
 0x266   :  { %v3154_v3 = vpop.eup %3153  ;;  %2202 = vmatpush.bf16.msra.mxu2 %v4535_v49  ;;  %3155 = vtanh.f32 %v1815_v21  ;;  %v333_v48 = vpop.permute.xlu1 %332 }
 0x267   :  { %v1845_v33 = vpack.c.bf16 %v3154_v3, %v3152_v62  ;;  %1914 = vmatmul.bf16.gmra.mxu3 %v1894_v30  ;;  %v327_v30 = vpop.permute.xlu2 %326  ;;  %vm599_vm1 = vcmp.eq.s32.totalorder %v333_v48, %v3629_v2 }
 0x268   :  { %2902 = vmatmul.msk.bf16.gmra.mxu0 %vm2901_vm10, %v4859_v7  ;;  %v330_v16 = vpop.permute.xlu0 %329  ;;  %vm597_vm15 = vcmp.eq.s32.totalorder %v327_v30, %v3629_v2 }
 0x269   :  { %1865 = vmatmul.bf16.gmra.mxu2 %v1845_v33  ;;  %vm598_vm14 = vcmp.eq.s32.totalorder %v330_v16, %v3629_v2 }
 0x26a   :  { %vm2905_vm0 = vmpackc.low %vm598_vm14, %vm597_vm15 }
 0x26b   :  { %v1806_v37 = vpop.f32.mrf.mxu1 }
 0x26c   :  { %v1816_v56 = vadd.f32 %v1806_v37, %v1144_v36  ;;  %v1757_v13 = vpop.f32.mrf.mxu3  ;;  %v3156_v52 = vpop.eup %3155 }
 0x26d   :  { %v1767_v10 = vadd.f32 %v1757_v13, %v1124_v57  ;;  %v4555_v62 = vpop.f32.mrf.mxu0 }
 0x26e   :  { %3157 = vtanh.f32 %v1816_v56 }
 0x26f   :  { %3159 = vtanh.f32 %v1766_v26  ;;  %v336_v43 = vpop.permute.xlu2 %335  ;;  %v342_v26 = vpop.permute.xlu1 %341 }
 0x270   :  { %3161 = vtanh.f32 %v1767_v10  ;;  %vm600_vm2 = vcmp.eq.s32.totalorder %v336_v43, %v3629_v2  ;;  %v339_v36 = vpop.permute.xlu0 %338  ;;  %vm602_vm5 = vcmp.eq.s32.totalorder %v342_v26, %v3629_v2 }
 0x271   :  { %vm2907_vm3 = vmpackc.low %vm600_vm2, %vm599_vm1  ;;  %vm601_vm4 = vcmp.eq.s32.totalorder %v339_v36, %v3629_v2 }
 0x272   :  { %vm2909_vm6 = vmpackc.low %vm602_vm5, %vm601_vm4 }
 0x274   :  { %v3158_v15 = vpop.eup %3157 }
 0x275   :  { %v3160_v28 = vpop.eup %3159  ;;  %v1895_v38 = vpack.c.bf16 %v3158_v15, %v3156_v52  ;;  %v4559_v3 = vpop.f32.mrf.mxu0 }
 0x276   :  { %v3162_v42 = vpop.eup %3161 }
 0x277   :  { %v1846_v22 = vpack.c.bf16 %v3162_v42, %v3160_v28  ;;  %1919 = vmatmul.bf16.gmra.mxu3 %v1895_v38  ;;  %v345_v13 = vpop.permute.xlu2 %344  ;;  %v351_v61 = vpop.permute.xlu1 %350 }
 0x278   :  { %2904 = vmatmul.msk.bf16.gmra.mxu0 %vm2903_vm13, %v4859_v7  ;;  %v348_v56 = vpop.permute.xlu0 %347  ;;  %vm603_vm8 = vcmp.eq.s32.totalorder %v345_v13, %v3629_v2  ;;  %vm605_vm10 = vcmp.eq.s32.totalorder %v351_v61, %v3629_v2 }
 0x279   :  { %1870 = vmatmul.bf16.gmra.mxu2 %v1846_v22  ;;  %vm604_vm7 = vcmp.eq.s32.totalorder %v348_v56, %v3629_v2  ;;  %v1147_v22 = vadd.f32 %v4321_v44, %v4522_v59  ;;  %v1149_v56 = vadd.f32 %v4321_v44, %v4545_v58 }
 0x27a   :  { %vm2911_vm9 = vmpackc.low %vm604_vm7, %vm603_vm8 }
 0x27d   :  { %v4562_v33 = vpop.f32.mrf.mxu0 }
 0x27f   :  { %v354_v35 = vpop.permute.xlu2 %353  ;;  %v360_v48 = vpop.permute.xlu1 %359 }
 0x280   :  { %vm606_vm11 = vcmp.eq.s32.totalorder %v354_v35, %v3629_v2  ;;  %v357_v30 = vpop.permute.xlu0 %356  ;;  %vm608_vm14 = vcmp.eq.s32.totalorder %v360_v48, %v3629_v2 }
 0x281   :  { %vm2913_vm12 = vmpackc.low %vm606_vm11, %vm605_vm10  ;;  %vm607_vm13 = vcmp.eq.s32.totalorder %v357_v30, %v3629_v2 }
 0x282   :  { %vm2915_vm15 = vmpackc.low %vm608_vm14, %vm607_vm13 }
 0x285   :  { %v4567_v21 = vpop.f32.mrf.mxu0 }
 0x288   :  { %2906 = vmatmul.msk.bf16.gmra.mxu0 %vm2905_vm0, %v4859_v7 }
 0x28d   :  { %v4571_v37 = vpop.f32.mrf.mxu0 }
 0x295   :  { %v1166_v57 = vpop.f32.mrf.mxu0 }
 0x296   :  { %v1167_v42 = vadd.f32 %v4321_v44, %v1166_v57 }
 0x298   :  { %2908 = vmatmul.msk.bf16.gmra.mxu0 %vm2907_vm3, %v4859_v7 }
 0x29d   :  { %v1168_v10 = vpop.f32.mrf.mxu0 }
 0x29e   :  { %v1169_v43 = vadd.f32 %v4321_v44, %v1168_v10 }
 0x2a5   :  { %v1171_v52 = vpop.f32.mrf.mxu0 }
 0x2a6   :  { %v1172_v30 = vadd.f32 %v4321_v44, %v1171_v52 }
 0x2a8   :  { %2910 = vmatmul.msk.bf16.gmra.mxu0 %vm2909_vm6, %v4859_v7 }
 0x2ad   :  { %v1173_v38 = vpop.f32.mrf.mxu0 }
 0x2b5   :  { %v1176_v59 = vpop.f32.mrf.mxu0 }
 0x2b8   :  { %2912 = vmatmul.msk.bf16.gmra.mxu0 %vm2911_vm9, %v4859_v7 }
 0x2c8   :  { %2914 = vmatmul.msk.bf16.gmra.mxu0 %vm2913_vm12, %v4859_v7 }
 0x2ca   :  { %v1905_v15 = vpop.f32.mrf.mxu3 }
 0x2cb   :  { %v1925_v16 = vadd.f32 %v1905_v15, %v1167_v42 }
 0x2cc   :  { %v1856_v28 = vpop.f32.mrf.mxu2 }
 0x2cd   :  { %v1876_v36 = vadd.f32 %v1856_v28, %v1147_v22  ;;  %3163 = vtanh.f32 %v1925_v16  ;;  %v1152_v16 = vadd.f32 %v4321_v44, %v4550_v19 }
 0x2d2   :  { %v1907_v26 = vpop.f32.mrf.mxu3 }
 0x2d3   :  { %v1926_v13 = vadd.f32 %v1907_v26, %v1169_v43  ;;  %v3164_v10 = vpop.eup %3163  ;;  %v1178_v43 = vpop.f32.mrf.mxu0 }
 0x2d4   :  { %v1858_v57 = vpop.f32.mrf.mxu2 }
 0x2d5   :  { %v1877_v61 = vadd.f32 %v1858_v57, %v1149_v56  ;;  %3165 = vtanh.f32 %v1926_v13  ;;  %v1154_v56 = vadd.f32 %v4321_v44, %v4555_v62 }
 0x2d6   :  { %3167 = vtanh.f32 %v1876_v36 }
 0x2d7   :  { %3169 = vtanh.f32 %v1877_v61 }
 0x2d8   :  { %2916 = vmatmul.msk.bf16.gmra.mxu0 %vm2915_vm15, %v4859_v7  ;;  %v1174_v7 = vadd.f32 %v4321_v44, %v1173_v38 }
 0x2da   :  { %v1910_v35 = vpop.f32.mrf.mxu3 }
 0x2db   :  { %v3166_v15 = vpop.eup %3165  ;;  %v1927_v48 = vadd.f32 %v1910_v35, %v1172_v30 }
 0x2dc   :  { %v3168_v28 = vpop.eup %3167  ;;  %v2008_v58 = vpack.c.bf16 %v3166_v15, %v3164_v10  ;;  %v1861_v42 = vpop.f32.mrf.mxu2 }
 0x2dd   :  { %v3170_v22 = vpop.eup %3169  ;;  %v1878_v36 = vadd.f32 %v1861_v42, %v1152_v16  ;;  %3171 = vtanh.f32 %v1927_v48  ;;  %v1181_v10 = vpop.f32.mrf.mxu0 }
 0x2de   :  { %v1959_v2 = vpack.c.bf16 %v3170_v22, %v3168_v28  ;;  %2020 = vmatmul.bf16.vlgmr.msrb.gmra.mxu2 %v2008_v58  ;;  %v1177_v58 = vadd.f32 %v4321_v44, %v1176_v59  ;;  %v1157_v22 = vadd.f32 %v4321_v44, %v4559_v3 }
 0x2df   :  { %2360 = vmatpush.bf16.msrb.mxu2 %v4345_v60 }
 0x2e0   :  { %1971 = vmatmul.bf16.vlgmr.msrb.gmra.mxu1 %v1959_v2  ;;  %v1179_v2 = vadd.f32 %v4321_v44, %v1178_v43 }
 0x2e1   :  { %2311 = vmatpush.bf16.msrb.mxu1 %v4345_v60 }
 0x2e2   :  { %v1912_v26 = vpop.f32.mrf.mxu3 }
 0x2e3   :  { %v1928_v52 = vadd.f32 %v1912_v26, %v1174_v7  ;;  %2361 = vmatpush.bf16.msrb.mxu2 %v4361_v5  ;;  %v3172_v19 = vpop.eup %3171  ;;  %v1159_v7 = vadd.f32 %v4321_v44, %v4562_v33 }
 0x2e4   :  { %v1863_v13 = vpop.f32.mrf.mxu2 }
 0x2e5   :  { %v1879_v57 = vadd.f32 %v1863_v13, %v1154_v56  ;;  %3173 = vtanh.f32 %v1928_v52  ;;  %2312 = vmatpush.bf16.msrb.mxu1 %v4361_v5  ;;  %v1183_v26 = vpop.f32.mrf.mxu0 }
 0x2e6   :  { %3175 = vtanh.f32 %v1878_v36 }
 0x2e7   :  { %3177 = vtanh.f32 %v1879_v57  ;;  %2362 = vmatpush.bf16.msrb.mxu2 %v4370_v27 }
 0x2e9   :  { %2313 = vmatpush.bf16.msrb.mxu1 %v4370_v27 }
 0x2ea   :  { %v1915_v38 = vpop.f32.mrf.mxu3 }
 0x2eb   :  { %v3174_v61 = vpop.eup %3173  ;;  %2363 = vmatpush.bf16.msrb.mxu2 %v4381_v17  ;;  %v1929_v30 = vadd.f32 %v1915_v38, %v1177_v58  ;;  %v1182_v38 = vadd.f32 %v4321_v44, %v1181_v10 }
 0x2ec   :  { %v3176_v62 = vpop.eup %3175  ;;  %v1866_v35 = vpop.f32.mrf.mxu2  ;;  %v2009_v15 = vpack.c.bf16 %v3174_v61, %v3172_v19 }
 0x2ed   :  { %v3178_v28 = vpop.eup %3177  ;;  %2314 = vmatpush.bf16.msrb.mxu1 %v4381_v17  ;;  %v1880_v16 = vadd.f32 %v1866_v35, %v1157_v22  ;;  %3179 = vtanh.f32 %v1929_v30  ;;  %v1162_v35 = vadd.f32 %v4321_v44, %v4567_v21  ;;  %v1164_v22 = vadd.f32 %v4321_v44, %v4571_v37 }
 0x2ee   :  { %v1960_v42 = vpack.c.bf16 %v3178_v28, %v3176_v62  ;;  %2025 = vmatmul.bf16.gmra.mxu2 %v2009_v15  ;;  %v1186_v62 = vpop.f32.mrf.mxu0  ;;  %v1184_v28 = vadd.f32 %v4321_v44, %v1183_v26 }
 0x2ef   :  { %2364 = vmatpush.bf16.msrb.mxu2 %v4390_v6 }
 0x2f0   :  { %1976 = vmatmul.bf16.gmra.mxu1 %v1960_v42 }
 0x2f1   :  { %2315 = vmatpush.bf16.msrb.mxu1 %v4390_v6 }
 0x2f2   :  { %v1917_v48 = vpop.f32.mrf.mxu3 }
 0x2f3   :  { %v1930_v36 = vadd.f32 %v1917_v48, %v1179_v2  ;;  %2365 = vmatpush.bf16.msrb.mxu2 %v4405_v14  ;;  %v3180_v3 = vpop.eup %3179 }
 0x2f4   :  { %v1868_v59 = vpop.f32.mrf.mxu2 }
 0x2f5   :  { %v1881_v56 = vadd.f32 %v1868_v59, %v1159_v7  ;;  %3181 = vtanh.f32 %v1930_v36  ;;  %2316 = vmatpush.bf16.msrb.mxu1 %v4405_v14 }
 0x2f6   :  { %3183 = vtanh.f32 %v1880_v16  ;;  %v1188_v10 = vpop.f32.mrf.mxu0 }
 0x2f7   :  { %3185 = vtanh.f32 %v1881_v56  ;;  %2366 = vmatpush.bf16.msrb.mxu2 %v4527_v18 }
 0x2f9   :  { %2317 = vmatpush.bf16.msrb.mxu1 %v4527_v18 }
 0x2fa   :  { %v1920_v43 = vpop.f32.mrf.mxu3 }
 0x2fb   :  { %v3182_v52 = vpop.eup %3181  ;;  %2367 = vmatpush.bf16.msrb.mxu2 %v4535_v49  ;;  %v1931_v15 = vadd.f32 %v1920_v43, %v1182_v38 }
 0x2fc   :  { %v3184_v33 = vpop.eup %3183  ;;  %v1871_v13 = vpop.f32.mrf.mxu2  ;;  %v2010_v57 = vpack.c.bf16 %v3182_v52, %v3180_v3 }
 0x2fd   :  { %v3186_v19 = vpop.eup %3185  ;;  %2318 = vmatpush.bf16.msrb.mxu1 %v4535_v49  ;;  %v1882_v58 = vadd.f32 %v1871_v13, %v1162_v35  ;;  %3187 = vtanh.f32 %v1931_v15 }
 0x2fe   :  { %v1961_v61 = vpack.c.bf16 %v3186_v19, %v3184_v33  ;;  %2030 = vmatmul.bf16.gmra.mxu2 %v2010_v57  ;;  %v1191_v26 = vpop.f32.mrf.mxu0  ;;  %v4634_v19 = vld [vmem:[%s4833_s3] ss:$0 sm:$0xff] }
 0x2ff   :  { %v1187_v38 = vadd.f32 %v4634_v19, %v1186_v62 }
 0x300   :  { %1981 = vmatmul.bf16.gmra.mxu1 %v1961_v61 }
 0x302   :  { %v1922_v42 = vpop.f32.mrf.mxu3 }
 0x303   :  { %v1932_v30 = vadd.f32 %v1922_v42, %v1184_v28  ;;  %v3188_v48 = vpop.eup %3187  ;;  %v1189_v28 = vadd.f32 %v4634_v19, %v1188_v10  ;;  %v1192_v10 = vadd.f32 %v4634_v19, %v1191_v26 }
 0x304   :  { %v1873_v2 = vpop.f32.mrf.mxu2 }
 0x305   :  { %v1883_v16 = vadd.f32 %v1873_v2, %v1164_v22  ;;  %3189 = vtanh.f32 %v1932_v30 }
 0x306   :  { %3191 = vtanh.f32 %v1882_v58  ;;  %v1193_v3 = vpop.f32.mrf.mxu0 }
 0x307   :  { %3193 = vtanh.f32 %v1883_v16 }
 0x30b   :  { %v3190_v7 = vpop.eup %3189 }
 0x30c   :  { %v3192_v21 = vpop.eup %3191  ;;  %v2011_v36 = vpack.c.bf16 %v3190_v7, %v3188_v48 }
 0x30d   :  { %v3194_v59 = vpop.eup %3193 }
 0x30e   :  { %v1962_v56 = vpack.c.bf16 %v3194_v59, %v3192_v21  ;;  %2035 = vmatmul.bf16.gmra.mxu2 %v2011_v36  ;;  %v4623_v43 = vpop.f32.mrf.mxu0 }
 0x310   :  { %1986 = vmatmul.bf16.gmra.mxu1 %v1962_v56 }
 0x316   :  { %v4625_v44 = vpop.f32.mrf.mxu0 }
 0x31e   :  { %v4627_v37 = vpop.f32.mrf.mxu0 }
 0x326   :  { %v4629_v52 = vpop.f32.mrf.mxu0 }
 0x32e   :  { %v1206_v33 = vpop.f32.mrf.mxu0 }
 0x32f   :  { %v1207_v58 = vadd.f32 %v4634_v19, %v1206_v33 }
 0x336   :  { %v1208_v13 = vpop.f32.mrf.mxu0 }
 0x337   :  { %v1209_v2 = vadd.f32 %v4634_v19, %v1208_v13 }
 0x33e   :  { %v1211_v35 = vpop.f32.mrf.mxu0 }
 0x346   :  { %v1213_v62 = vpop.f32.mrf.mxu0 }
 0x34e   :  { %v1216_v26 = vpop.f32.mrf.mxu0 }
 0x35d   :  { %v1972_v57 = vpop.f32.mrf.mxu1 }
 0x35e   :  { %v1992_v15 = vadd.f32 %v1972_v57, %v1187_v38 }
 0x360   :  { %3195 = vtanh.f32 %v1992_v15  ;;  %v1212_v15 = vadd.f32 %v4634_v19, %v1211_v35 }
 0x361   :  { %v2021_v61 = vpop.f32.mrf.mxu2 }
 0x362   :  { %v2041_v30 = vadd.f32 %v2021_v61, %v1207_v58  ;;  %v1194_v61 = vadd.f32 %v4634_v19, %v1193_v3 }
 0x365   :  { %v1974_v42 = vpop.f32.mrf.mxu1 }
 0x366   :  { %v1993_v22 = vadd.f32 %v1974_v42, %v1189_v28  ;;  %v3196_v7 = vpop.eup %3195  ;;  %v3364_v42 = vld [vmem:[%s4832_s2 + $0x38] sm:$0xff] }
 0x368   :  { %3197 = vtanh.f32 %v1993_v22 }
 0x369   :  { %v2023_v16 = vpop.f32.mrf.mxu2  ;;  %3199 = vtanh.f32 %v2041_v30 }
 0x36a   :  { %v2042_v48 = vadd.f32 %v2023_v16, %v1209_v2 }
 0x36c   :  { %3201 = vtanh.f32 %v2042_v48 }
 0x36d   :  { %v1977_v21 = vpop.f32.mrf.mxu1 }
 0x36e   :  { %v3198_v36 = vpop.eup %3197  ;;  %v1994_v13 = vadd.f32 %v1977_v21, %v1192_v10  ;;  %v1218_v21 = vpop.f32.mrf.mxu0  ;;  %v1217_v10 = vadd.f32 %v4634_v19, %v1216_v26 }
 0x36f   :  { %v2075_v59 = vpack.c.bf16 %v3198_v36, %v3196_v7  ;;  %v3200_v56 = vpop.eup %3199 }
 0x370   :  { %3203 = vtanh.f32 %v1994_v13 }
 0x371   :  { %2087 = vmatmul.bf16.vlgmr.msrb.gmra.mxu3 %v2075_v59  ;;  %v2026_v33 = vpop.f32.mrf.mxu2 }
 0x372   :  { %v3202_v57 = vpop.eup %3201  ;;  %2427 = vmatpush.bf16.msrb.mxu3 %v4345_v60  ;;  %v2043_v22 = vadd.f32 %v2026_v33, %v1212_v15  ;;  %v1214_v60 = vadd.f32 %v4634_v19, %v1213_v62  ;;  %v1197_v62 = vadd.f32 %v4634_v19, %v4623_v43 }
 0x373   :  { %v2124_v38 = vpack.c.bf16 %v3202_v57, %v3200_v56 }
 0x375   :  { %v1979_v28 = vpop.f32.mrf.mxu1  ;;  %2136 = vmatmul.bf16.vlgmr.msra.gmra.mxu1 %v2124_v38 }
 0x376   :  { %v1995_v58 = vadd.f32 %v1979_v28, %v1194_v61  ;;  %2476 = vmatpush.bf16.msra.mxu1 %v3364_v42  ;;  %2428 = vmatpush.bf16.msrb.mxu3 %v4361_v5  ;;  %v3204_v35 = vpop.eup %3203  ;;  %v1202_v42 = vadd.f32 %v4634_v19, %v4627_v37 }
 0x378   :  { %3205 = vtanh.f32 %v1995_v58 }
 0x379   :  { %v2028_v30 = vpop.f32.mrf.mxu2  ;;  %3207 = vtanh.f32 %v2043_v22 }
 0x37a   :  { %v2044_v3 = vadd.f32 %v2028_v30, %v1214_v60  ;;  %2477 = vmatpush.bf16.msra.mxu1 %v4361_v5  ;;  %2429 = vmatpush.bf16.msrb.mxu3 %v4370_v27  ;;  %v1204_v30 = vadd.f32 %v4634_v19, %v4629_v52 }
 0x37c   :  { %3209 = vtanh.f32 %v2044_v3 }
 0x37d   :  { %v1982_v2 = vpop.f32.mrf.mxu1 }
 0x37e   :  { %v3206_v16 = vpop.eup %3205  ;;  %2478 = vmatpush.bf16.msra.mxu1 %v4370_v27  ;;  %2430 = vmatpush.bf16.msrb.mxu3 %v4381_v17  ;;  %v1996_v59 = vadd.f32 %v1982_v2, %v1197_v62  ;;  %v1199_v27 = vadd.f32 %v4634_v19, %v4625_v44  ;;  %v1221_v44 = vpop.f32.mrf.mxu0 }
 0x37f   :  { %v2076_v48 = vpack.c.bf16 %v3206_v16, %v3204_v35  ;;  %v3208_v7 = vpop.eup %3207  ;;  %v1222_v3 = vadd.f32 %v4634_v19, %v1221_v44 }
 0x380   :  { %3211 = vtanh.f32 %v1996_v59 }
 0x381   :  { %2092 = vmatmul.bf16.gmra.mxu3 %v2076_v48  ;;  %v2031_v36 = vpop.f32.mrf.mxu2 }
 0x382   :  { %v3210_v5 = vpop.eup %3209  ;;  %2479 = vmatpush.bf16.msra.mxu1 %v4381_v17  ;;  %2431 = vmatpush.bf16.msrb.mxu3 %v4390_v6  ;;  %v2045_v43 = vadd.f32 %v2031_v36, %v1217_v10  ;;  %v1219_v17 = vadd.f32 %v4634_v19, %v1218_v21 }
 0x383   :  { %v2125_v56 = vpack.c.bf16 %v3210_v5, %v3208_v7 }
 0x385   :  { %v1984_v33 = vpop.f32.mrf.mxu1  ;;  %2141 = vmatmul.bf16.gmra.mxu1 %v2125_v56 }
 0x386   :  { %v1997_v57 = vadd.f32 %v1984_v33, %v1199_v27  ;;  %2480 = vmatpush.bf16.msra.mxu1 %v4390_v6  ;;  %2432 = vmatpush.bf16.msrb.mxu3 %v4405_v14  ;;  %v3212_v61 = vpop.eup %3211  ;;  %v1247_v33 = vadd.f32 %v4634_v19, %v4073_v24 }
 0x388   :  { %3213 = vtanh.f32 %v1997_v57 }
 0x389   :  { %v2033_v38 = vpop.f32.mrf.mxu2  ;;  %3215 = vtanh.f32 %v2045_v43 }
 0x38a   :  { %v2046_v13 = vadd.f32 %v2033_v38, %v1219_v17  ;;  %2481 = vmatpush.bf16.msra.mxu1 %v4405_v14  ;;  %2433 = vmatpush.bf16.msrb.mxu3 %v4527_v18  ;;  %v1249_v17 = vadd.f32 %v4634_v19, %v4093_v34  ;;  %v1252_v34 = vadd.f32 %v4634_v19, %v4125_v45 }
 0x38c   :  { %3217 = vtanh.f32 %v2046_v13 }
 0x38d   :  { %v1987_v15 = vpop.f32.mrf.mxu1 }
 0x38e   :  { %v3214_v28 = vpop.eup %3213  ;;  %2482 = vmatpush.bf16.msra.mxu1 %v4527_v18  ;;  %2434 = vmatpush.bf16.msrb.mxu3 %v4535_v49  ;;  %v1998_v22 = vadd.f32 %v1987_v15, %v1202_v42  ;;  %v1223_v18 = vpop.f32.mrf.mxu0 }
 0x38f   :  { %v2077_v6 = vpack.c.bf16 %v3214_v28, %v3212_v61  ;;  %v3216_v58 = vpop.eup %3215  ;;  %v1224_v37 = vadd.f32 %v4634_v19, %v1223_v18 }
 0x390   :  { %3219 = vtanh.f32 %v1998_v22 }
 0x391   :  { %2097 = vmatmul.bf16.gmra.mxu3 %v2077_v6  ;;  %v2036_v26 = vpop.f32.mrf.mxu2 }
 0x392   :  { %v3218_v14 = vpop.eup %3217  ;;  %2483 = vmatpush.bf16.msra.mxu1 %v4535_v49  ;;  %v2047_v16 = vadd.f32 %v2036_v26, %v1222_v3 }
 0x393   :  { %v2126_v60 = vpack.c.bf16 %v3218_v14, %v3216_v58 }
 0x395   :  { %v1989_v35 = vpop.f32.mrf.mxu1  ;;  %2146 = vmatmul.bf16.gmra.mxu1 %v2126_v60 }
 0x396   :  { %v1999_v2 = vadd.f32 %v1989_v35, %v1204_v30  ;;  %v3220_v49 = vpop.eup %3219  ;;  %v1226_v59 = vpop.f32.mrf.mxu0 }
 0x397   :  { %v1227_v57 = vadd.f32 %v4634_v19, %v1226_v59 }
 0x398   :  { %3221 = vtanh.f32 %v1999_v2  ;;  %v1254_v2 = vadd.f32 %v4634_v19, %v4145_v54  ;;  %v1257_v54 = vadd.f32 %v4634_v19, %v4179_v12 }
 0x399   :  { %v2038_v48 = vpop.f32.mrf.mxu2  ;;  %3223 = vtanh.f32 %v2047_v16 }
 0x39a   :  { %v2048_v7 = vadd.f32 %v2038_v48, %v1224_v37 }
 0x39c   :  { %3225 = vtanh.f32 %v2048_v7 }
 0x39e   :  { %v3222_v62 = vpop.eup %3221  ;;  %v1228_v27 = vpop.f32.mrf.mxu0 }
 0x39f   :  { %v2078_v21 = vpack.c.bf16 %v3222_v62, %v3220_v49  ;;  %v3224_v36 = vpop.eup %3223  ;;  %v1229_v44 = vadd.f32 %v4634_v19, %v1228_v27 }
 0x3a1   :  { %2102 = vmatmul.bf16.gmra.mxu3 %v2078_v21 }
 0x3a2   :  { %v3226_v52 = vpop.eup %3225 }
 0x3a3   :  { %v2127_v5 = vpack.c.bf16 %v3226_v52, %v3224_v36 }
 0x3a5   :  { %2151 = vmatmul.bf16.gmra.mxu1 %v2127_v5 }
 0x3a6   :  { %v1231_v6 = vpop.f32.mrf.mxu0 }
 0x3a7   :  { %v1232_v3 = vadd.f32 %v4634_v19, %v1231_v6 }
 0x3ae   :  { %v1233_v18 = vpop.f32.mrf.mxu0 }
 0x3af   :  { %v1234_v48 = vadd.f32 %v4634_v19, %v1233_v18 }
 0x3f2   :  { %v2137_v56 = vpop.f32.mrf.mxu1 }
 0x3f3   :  { %v2157_v43 = vadd.f32 %v2137_v56, %v1247_v33 }
 0x3f4   :  { %v2088_v10 = vpop.f32.mrf.mxu3 }
 0x3f5   :  { %v2108_v38 = vadd.f32 %v2088_v10, %v1227_v57  ;;  %3227 = vtanh.f32 %v2157_v43  ;;  %v1237_v10 = vadd.f32 %v4634_v19, %v3973_v46  ;;  %v1259_v57 = vadd.f32 %v4634_v19, %v4197_v23 }
 0x3f6   :  { %v1262_v23 = vadd.f32 %v4634_v19, %v4225_v39 }
 0x3fa   :  { %v2139_v13 = vpop.f32.mrf.mxu1 }
 0x3fb   :  { %v2158_v61 = vadd.f32 %v2139_v13, %v1249_v17  ;;  %v3228_v58 = vpop.eup %3227 }
 0x3fc   :  { %v2090_v15 = vpop.f32.mrf.mxu3 }
 0x3fd   :  { %v2109_v28 = vadd.f32 %v2090_v15, %v1229_v44  ;;  %3229 = vtanh.f32 %v2158_v61 }
 0x3fe   :  { %3231 = vtanh.f32 %v2108_v38  ;;  %v1239_v38 = vadd.f32 %v4634_v19, %v3997_v55  ;;  %v1242_v55 = vadd.f32 %v4634_v19, %v4027_v0 }
 0x3ff   :  { %3233 = vtanh.f32 %v2109_v28 }
 0x402   :  { %v2142_v24 = vpop.f32.mrf.mxu1 }
 0x403   :  { %v3230_v42 = vpop.eup %3229  ;;  %v2159_v35 = vadd.f32 %v2142_v24, %v1252_v34  ;;  %v1244_v34 = vadd.f32 %v4634_v19, %v4045_v9  ;;  %v1287_v9 = vadd.f32 %v4634_v19, %v3990_v53 }
 0x404   :  { %v3232_v26 = vpop.eup %3231  ;;  %v2240_v14 = vpack.c.bf16 %v3230_v42, %v3228_v58  ;;  %v2093_v22 = vpop.f32.mrf.mxu3 }
 0x405   :  { %v3234_v60 = vpop.eup %3233  ;;  %v2110_v16 = vadd.f32 %v2093_v22, %v1232_v3  ;;  %3235 = vtanh.f32 %v2159_v35 }
 0x406   :  { %v2191_v30 = vpack.c.bf16 %v3234_v60, %v3232_v26  ;;  %2252 = vmatmul.bf16.vlgmr.msra.gmra.mxu3 %v2240_v14  ;;  %v1264_v14 = vadd.f32 %v4634_v19, %v4240_v50 }
 0x408   :  { %2203 = vmatmul.bf16.vlgmr.msra.gmra.mxu2 %v2191_v30 }
 0x40a   :  { %v2144_v37 = vpop.f32.mrf.mxu1 }
 0x40b   :  { %v2160_v7 = vadd.f32 %v2144_v37, %v1254_v2  ;;  %v3236_v45 = vpop.eup %3235 }
 0x40c   :  { %v2095_v49 = vpop.f32.mrf.mxu3 }
 0x40d   :  { %v2111_v62 = vadd.f32 %v2095_v49, %v1234_v48  ;;  %3237 = vtanh.f32 %v2160_v7  ;;  %v1267_v7 = vadd.f32 %v4634_v19, %v4249_v47 }
 0x40e   :  { %3239 = vtanh.f32 %v2110_v16 }
 0x40f   :  { %3241 = vtanh.f32 %v2111_v62  ;;  %v1289_v62 = vadd.f32 %v4634_v19, %v4016_v63  ;;  %v1292_v63 = vadd.f32 %v4634_v19, %v4041_v8 }
 0x412   :  { %v2147_v21 = vpop.f32.mrf.mxu1 }
 0x413   :  { %v3238_v36 = vpop.eup %3237  ;;  %v2161_v33 = vadd.f32 %v2147_v21, %v1257_v54 }
 0x414   :  { %v3240_v52 = vpop.eup %3239  ;;  %v2098_v5 = vpop.f32.mrf.mxu3  ;;  %v2241_v59 = vpack.c.bf16 %v3238_v36, %v3236_v45  ;;  %v1269_v36 = vadd.f32 %v4634_v19, %v4258_v1  ;;  %v1272_v1 = vadd.f32 %v4634_v19, %v4267_v11 }
 0x415   :  { %v3242_v56 = vpop.eup %3241  ;;  %v2112_v43 = vadd.f32 %v2098_v5, %v1237_v10  ;;  %3243 = vtanh.f32 %v2161_v33 }
 0x416   :  { %v2192_v27 = vpack.c.bf16 %v3242_v56, %v3240_v52  ;;  %2257 = vmatmul.bf16.gmra.mxu3 %v2241_v59 }
 0x418   :  { %2208 = vmatmul.bf16.gmra.mxu2 %v2192_v27 }
 0x41a   :  { %v2149_v17 = vpop.f32.mrf.mxu1 }
 0x41b   :  { %v2162_v13 = vadd.f32 %v2149_v17, %v1259_v57  ;;  %v3244_v12 = vpop.eup %3243  ;;  %v1294_v17 = vadd.f32 %v4634_v19, %v4069_v20  ;;  %v1297_v20 = vadd.f32 %v4634_v19, %v4087_v31 }
 0x41c   :  { %v2100_v44 = vpop.f32.mrf.mxu3 }
 0x41d   :  { %v2113_v61 = vadd.f32 %v2100_v44, %v1239_v38  ;;  %3245 = vtanh.f32 %v2162_v13  ;;  %v1274_v44 = vadd.f32 %v4634_v19, %v4278_v25  ;;  %v1277_v25 = vadd.f32 %v4634_v19, %v4289_v32 }
 0x41e   :  { %3247 = vtanh.f32 %v2112_v43 }
 0x41f   :  { %3249 = vtanh.f32 %v2113_v61 }
 0x422   :  { %v2152_v15 = vpop.f32.mrf.mxu1 }
 0x423   :  { %v3246_v46 = vpop.eup %3245  ;;  %v2163_v26 = vadd.f32 %v2152_v15, %v1262_v23 }
 0x424   :  { %v3248_v28 = vpop.eup %3247  ;;  %v2103_v6 = vpop.f32.mrf.mxu3  ;;  %v2242_v58 = vpack.c.bf16 %v3246_v46, %v3244_v12 }
 0x425   :  { %v3250_v24 = vpop.eup %3249  ;;  %v2114_v22 = vadd.f32 %v2103_v6, %v1242_v55  ;;  %3251 = vtanh.f32 %v2163_v26  ;;  %v1299_v55 = vadd.f32 %v4634_v19, %v4119_v41  ;;  %v1302_v41 = vadd.f32 %v4634_v19, %v4139_v51 }
 0x426   :  { %v2193_v42 = vpack.c.bf16 %v3250_v24, %v3248_v28  ;;  %2262 = vmatmul.bf16.gmra.mxu3 %v2242_v58 }
 0x428   :  { %2213 = vmatmul.bf16.gmra.mxu2 %v2193_v42 }
 0x42a   :  { %v2154_v60 = vpop.f32.mrf.mxu1 }
 0x42b   :  { %v2164_v30 = vadd.f32 %v2154_v60, %v1264_v14  ;;  %v3252_v39 = vpop.eup %3251 }
 0x42c   :  { %v2105_v3 = vpop.f32.mrf.mxu3 }
 0x42d   :  { %v2115_v18 = vadd.f32 %v2105_v3, %v1244_v34  ;;  %3253 = vtanh.f32 %v2164_v30 }
 0x42e   :  { %3255 = vtanh.f32 %v2114_v22  ;;  %v1279_v22 = vadd.f32 %v4634_v19, %v4298_v40  ;;  %v1282_v40 = vadd.f32 %v4634_v19, %v4305_v29 }
 0x42f   :  { %3257 = vtanh.f32 %v2115_v18 }
 0x433   :  { %v3254_v35 = vpop.eup %3253 }
 0x434   :  { %v3256_v0 = vpop.eup %3255  ;;  %v2243_v2 = vpack.c.bf16 %v3254_v35, %v3252_v39 }
 0x435   :  { %v3258_v16 = vpop.eup %3257 }
 0x436   :  { %v2194_v37 = vpack.c.bf16 %v3258_v16, %v3256_v0  ;;  %2267 = vmatmul.bf16.gmra.mxu3 %v2243_v2 }
 0x438   :  { %2218 = vmatmul.bf16.gmra.mxu2 %v2194_v37  ;;  %v1304_v37 = vadd.f32 %v4634_v19, %v4171_v4 }
 0x489   :  { %v2253_v50 = vpop.f32.mrf.mxu3 }
 0x48a   :  { %v2273_v49 = vadd.f32 %v2253_v50, %v1287_v9  ;;  %v4874_v9 = vld [vmem:[#allocation21_spill] sm:$0xff] }
 0x48b   :  { %v2204_v48 = vpop.f32.mrf.mxu2 }
 0x48c   :  { %v2224_v45 = vadd.f32 %v2204_v48, %v1267_v7  ;;  %3259 = vtanh.f32 %v2273_v49  ;;  %v1284_v7 = vadd.f32 %v4634_v19, %v4874_v9 }
 0x491   :  { %v2255_v21 = vpop.f32.mrf.mxu3 }
 0x492   :  { %v2274_v52 = vadd.f32 %v2255_v21, %v1289_v62  ;;  %v3260_v53 = vpop.eup %3259 }
 0x493   :  { %v2206_v5 = vpop.f32.mrf.mxu2 }
 0x494   :  { %v2225_v59 = vadd.f32 %v2206_v5, %v1269_v36  ;;  %3261 = vtanh.f32 %v2274_v52 }
 0x495   :  { %3263 = vtanh.f32 %v2224_v45 }
 0x496   :  { %3265 = vtanh.f32 %v2225_v59  ;;  %v4875_v59 = vld [vmem:[#allocation6_spill] sm:$0xff] }
 0x499   :  { %v2258_v56 = vpop.f32.mrf.mxu3 }
 0x49a   :  { %v3262_v54 = vpop.eup %3261  ;;  %v2275_v43 = vadd.f32 %v2258_v56, %v1292_v63 }
 0x49b   :  { %v3264_v47 = vpop.eup %3263  ;;  %v2356_v27 = vpack.c.bf16 %v3262_v54, %v3260_v53  ;;  %v2209_v10 = vpop.f32.mrf.mxu2  ;;  %v1307_v53 = vadd.f32 %v4634_v19, %v4875_v59 }
 0x49c   :  { %v3266_v33 = vpop.eup %3265  ;;  %v2226_v38 = vadd.f32 %v2209_v10, %v1272_v1  ;;  %3267 = vtanh.f32 %v2275_v43  ;;  %v4877_v10 = vld [vmem:[#allocation16_spill] sm:$0xff]  ;;  %v4878_v43 = vld [vmem:[#allocation18_spill] sm:$0xff] }
 0x49d   :  { %v2307_v57 = vpack.c.bf16 %v3266_v33, %v3264_v47  ;;  %2368 = vmatmul.bf16.vlgmr.msrb.gmra.mxu2 %v2356_v27  ;;  %v4876_v47 = vld [vmem:[#allocation7_spill] sm:$0xff]  ;;  %v1327_v33 = vadd.f32 %v4634_v19, %v4877_v10 }
 0x49e   :  { %v1309_v27 = vadd.f32 %v4634_v19, %v4876_v47 }
 0x49f   :  { %2319 = vmatmul.bf16.vlgmr.msrb.gmra.mxu1 %v2307_v57 }
 0x4a1   :  { %v2260_v13 = vpop.f32.mrf.mxu3 }
 0x4a2   :  { %v2276_v61 = vadd.f32 %v2260_v13, %v1294_v17  ;;  %v3268_v8 = vpop.eup %3267  ;;  %v1329_v17 = vadd.f32 %v4634_v19, %v4878_v43  ;;  %v3060_v43 = vld [vmem:[%s4835_s5 + $0x18] sm:$0xff] }
 0x4a3   :  { %v2211_v12 = vpop.f32.mrf.mxu2 }
 0x4a4   :  { %v2227_v15 = vadd.f32 %v2211_v12, %v1274_v44  ;;  %3269 = vtanh.f32 %v2276_v61 }
 0x4a5   :  { %3271 = vtanh.f32 %v2226_v38 }
 0x4a6   :  { %3273 = vtanh.f32 %v2227_v15 }
 0x4a9   :  { %v2263_v46 = vpop.f32.mrf.mxu3 }
 0x4aa   :  { %v3270_v11 = vpop.eup %3269  ;;  %v2277_v42 = vadd.f32 %v2263_v46, %v1297_v20  ;;  %v4879_v46 = vld [vmem:[#allocation8_spill] sm:$0xff]  ;;  %v4880_v20 = vld [vmem:[#allocation9_spill] sm:$0xff] }
 0x4ab   :  { %v3272_v28 = vpop.eup %3271  ;;  %v2214_v6 = vpop.f32.mrf.mxu2  ;;  %v2357_v58 = vpack.c.bf16 %v3270_v11, %v3268_v8  ;;  %v1312_v11 = vadd.f32 %v4634_v19, %v4879_v46  ;;  %v4890_v46 = vld [vmem:[#allocation19_spill] sm:$0xff] }
 0x4ac   :  { %v3274_v24 = vpop.eup %3273  ;;  %v2228_v26 = vadd.f32 %v2214_v6, %v1277_v25  ;;  %3275 = vtanh.f32 %v2277_v42  ;;  %v4881_v25 = vld [vmem:[#allocation20_spill] sm:$0xff] }
 0x4ad   :  { %v2308_v23 = vpack.c.bf16 %v3274_v24, %v3272_v28  ;;  %2373 = vmatmul.bf16.gmra.mxu2 %v2357_v58  ;;  %v1332_v42 = vadd.f32 %v4634_v19, %v4881_v25 }
 0x4af   :  { %2324 = vmatmul.bf16.gmra.mxu1 %v2308_v23  ;;  %v1314_v23 = vadd.f32 %v4634_v19, %v4880_v20 }
 0x4b1   :  { %v2265_v14 = vpop.f32.mrf.mxu3 }
 0x4b2   :  { %v2278_v60 = vadd.f32 %v2265_v14, %v1299_v55  ;;  %v3276_v31 = vpop.eup %3275 }
 0x4b3   :  { %v2216_v34 = vpop.f32.mrf.mxu2 }
 0x4b4   :  { %v2229_v30 = vadd.f32 %v2216_v34, %v1279_v22  ;;  %3277 = vtanh.f32 %v2278_v60  ;;  %v4882_v22 = vld [vmem:[#allocation23_spill] sm:$0xff] }
 0x4b5   :  { %3279 = vtanh.f32 %v2228_v26  ;;  %v1334_v60 = vadd.f32 %v4634_v19, %v4882_v22 }
 0x4b6   :  { %3281 = vtanh.f32 %v2229_v30 }
 0x4b9   :  { %v2268_v3 = vpop.f32.mrf.mxu3 }
 0x4ba   :  { %v3278_v32 = vpop.eup %3277  ;;  %v2279_v16 = vadd.f32 %v2268_v3, %v1302_v41 }
 0x4bb   :  { %v3280_v18 = vpop.eup %3279  ;;  %v2219_v39 = vpop.f32.mrf.mxu2  ;;  %v2358_v35 = vpack.c.bf16 %v3278_v32, %v3276_v31 }
 0x4bc   :  { %v3282_v0 = vpop.eup %3281  ;;  %v2230_v50 = vadd.f32 %v2219_v39, %v1282_v40  ;;  %3283 = vtanh.f32 %v2279_v16 }
 0x4bd   :  { %v2309_v2 = vpack.c.bf16 %v3282_v0, %v3280_v18  ;;  %2378 = vmatmul.bf16.gmra.mxu2 %v2358_v35  ;;  %v4883_v35 = vld [vmem:[#allocation10_spill] sm:$0xff] }
 0x4be   :  { %v1317_v0 = vadd.f32 %v4634_v19, %v4883_v35 }
 0x4bf   :  { %2329 = vmatmul.bf16.gmra.mxu1 %v2309_v2 }
 0x4c1   :  { %v2270_v48 = vpop.f32.mrf.mxu3 }
 0x4c2   :  { %v2280_v49 = vadd.f32 %v2270_v48, %v1304_v37  ;;  %v3284_v51 = vpop.eup %3283  ;;  %v4884_v37 = vld [vmem:[#allocation11_spill] sm:$0xff]  ;;  %v4885_v48 = vld [vmem:[#allocation13_spill] sm:$0xff] }
 0x4c3   :  { %v2221_v62 = vpop.f32.mrf.mxu2  ;;  %v1337_v9 = vadd.f32 %v4634_v19, %v4885_v48 }
 0x4c4   :  { %v2231_v45 = vadd.f32 %v2221_v62, %v1284_v7  ;;  %3285 = vtanh.f32 %v2280_v49  ;;  %v3064_v49 = vld [vmem:[%s4835_s5 + $0x38] sm:$0xff] }
 0x4c5   :  { %3287 = vtanh.f32 %v2230_v50  ;;  %v1319_v50 = vadd.f32 %v4634_v19, %v4884_v37  ;;  %2593 = vmatpush.bf16.msra.mxu2 %v3064_v49  ;;  %2634 = vmatpush.bf16.msra.mxu3 %v3064_v49 }
 0x4c6   :  { %3289 = vtanh.f32 %v2231_v45 }
 0x4ca   :  { %v3286_v21 = vpop.eup %3285 }
 0x4cb   :  { %v3288_v29 = vpop.eup %3287  ;;  %v2359_v36 = vpack.c.bf16 %v3286_v21, %v3284_v51  ;;  %v3063_v51 = vld [vmem:[%s4835_s5 + $0x30] sm:$0xff]  ;;  %v4886_v21 = vld [vmem:[#allocation15_spill] sm:$0xff] }
 0x4cc   :  { %v3290_v52 = vpop.eup %3289  ;;  %2594 = vmatpush.bf16.msra.mxu2 %v3063_v51  ;;  %2635 = vmatpush.bf16.msra.mxu3 %v3063_v51 }
 0x4cd   :  { %v2310_v5 = vpack.c.bf16 %v3290_v52, %v3288_v29  ;;  %2383 = vmatmul.bf16.gmra.mxu2 %v2359_v36  ;;  %v1339_v29 = vadd.f32 %v4634_v19, %v4886_v21 }
 0x4cf   :  { %2334 = vmatmul.bf16.gmra.mxu1 %v2310_v5  ;;  %v3062_v5 = vld [vmem:[%s4835_s5 + $0x28] sm:$0xff] }
 0x4d0   :  { %2595 = vmatpush.bf16.msra.mxu2 %v3062_v5  ;;  %2636 = vmatpush.bf16.msra.mxu3 %v3062_v5  ;;  %v4897_v5 = vld [vmem:[#allocation34_spill] sm:$0xff] }
 0x51c   :  { %v2320_v4 = vpop.f32.mrf.mxu1 }
 0x51d   :  { %v2340_v54 = vadd.f32 %v2320_v4, %v1307_v53 }
 0x51f   :  { %3291 = vtanh.f32 %v2340_v54  ;;  %v3061_v54 = vld [vmem:[%s4835_s5 + $0x20] sm:$0xff] }
 0x520   :  { %v2369_v56 = vpop.f32.mrf.mxu2  ;;  %2596 = vmatpush.bf16.msra.mxu2 %v3061_v54  ;;  %2637 = vmatpush.bf16.msra.mxu3 %v3061_v54 }
 0x521   :  { %v2389_v1 = vadd.f32 %v2369_v56, %v1327_v33 }
 0x524   :  { %v2322_v63 = vpop.f32.mrf.mxu1  ;;  %2597 = vmatpush.bf16.msra.mxu2 %v3060_v43  ;;  %2638 = vmatpush.bf16.msra.mxu3 %v3060_v43 }
 0x525   :  { %v2341_v57 = vadd.f32 %v2322_v63, %v1309_v27  ;;  %v3292_v44 = vpop.eup %3291  ;;  %v4887_v27 = vld [vmem:[#allocation12_spill] sm:$0xff] }
 0x526   :  { %v1322_v10 = vadd.f32 %v4634_v19, %v4887_v27 }
 0x527   :  { %3293 = vtanh.f32 %v2341_v57 }
 0x528   :  { %v2371_v38 = vpop.f32.mrf.mxu2  ;;  %3295 = vtanh.f32 %v2389_v1 }
 0x529   :  { %v2390_v13 = vadd.f32 %v2371_v38, %v1329_v17  ;;  %v4888_v17 = vld [vmem:[#allocation14_spill] sm:$0xff] }
 0x52a   :  { %v1324_v38 = vadd.f32 %v4634_v19, %v4888_v17 }
 0x52b   :  { %3297 = vtanh.f32 %v2390_v13  ;;  %v4889_v13 = vld [vmem:[#allocation17_spill] sm:$0xff] }
 0x52c   :  { %v2325_v61 = vpop.f32.mrf.mxu1 }
 0x52d   :  { %v3294_v12 = vpop.eup %3293  ;;  %v2342_v24 = vadd.f32 %v2325_v61, %v1312_v11  ;;  %v1344_v11 = vadd.f32 %v4634_v19, %v4890_v46  ;;  %v4901_v46 = vld [vmem:[#allocation36_spill] sm:$0xff] }
 0x52e   :  { %v2423_v15 = vpack.c.bf16 %v3294_v12, %v3292_v44  ;;  %v3296_v8 = vpop.eup %3295  ;;  %v1342_v44 = vadd.f32 %v4634_v19, %v4889_v13  ;;  %v4899_v13 = vld [vmem:[#allocation35_spill] sm:$0xff] }
 0x52f   :  { %3299 = vtanh.f32 %v2342_v24 }
 0x530   :  { %2435 = vmatmul.bf16.vlgmr.msrb.gmra.mxu3 %v2423_v15  ;;  %v2374_v28 = vpop.f32.mrf.mxu2 }
 0x531   :  { %v3298_v6 = vpop.eup %3297  ;;  %v2391_v14 = vadd.f32 %v2374_v28, %v1332_v42 }
 0x532   :  { %v2472_v58 = vpack.c.bf16 %v3298_v6, %v3296_v8  ;;  %v3059_v8 = vld [vmem:[%s4835_s5 + $0x10] sm:$0xff] }
 0x533   :  { %2598 = vmatpush.bf16.msra.mxu2 %v3059_v8  ;;  %2639 = vmatpush.bf16.msra.mxu3 %v3059_v8 }
 0x534   :  { %v2327_v55 = vpop.f32.mrf.mxu1  ;;  %2484 = vmatmul.bf16.vlgmr.msra.gmra.mxu1 %v2472_v58 }
 0x535   :  { %v2343_v26 = vadd.f32 %v2327_v55, %v1314_v23  ;;  %v3300_v31 = vpop.eup %3299  ;;  %v3058_v55 = vld [vmem:[%s4835_s5 + $0x8] sm:$0xff] }
 0x537   :  { %3301 = vtanh.f32 %v2343_v26  ;;  %2599 = vmatpush.bf16.msra.mxu2 %v3058_v55  ;;  %2640 = vmatpush.bf16.msra.mxu3 %v3058_v55  ;;  %v3057_v26 = vld [vmem:[%s4835_s5] sm:$0xff] }
 0x538   :  { %v2376_v34 = vpop.f32.mrf.mxu2  ;;  %3303 = vtanh.f32 %v2391_v14 }
 0x539   :  { %v2392_v30 = vadd.f32 %v2376_v34, %v1334_v60  ;;  %v4891_v60 = vld [vmem:[#allocation31_spill] sm:$0xff] }
 0x53a   :  { %v1367_v34 = vadd.f32 %v4634_v19, %v4891_v60 }
 0x53b   :  { %3305 = vtanh.f32 %v2392_v30  ;;  %2600 = vmatpush.bf16.msra.mxu2 %v3057_v26  ;;  %2641 = vmatpush.bf16.msra.mxu3 %v3057_v26  ;;  %v4892_v30 = vld [vmem:[#allocation22_spill] sm:$0xff] }
 0x53c   :  { %v2330_v3 = vpop.f32.mrf.mxu1 }
 0x53d   :  { %v3302_v32 = vpop.eup %3301  ;;  %v2344_v40 = vadd.f32 %v2330_v3, %v1317_v0  ;;  %v4894_v0 = vld [vmem:[#allocation24_spill] sm:$0xff] }
 0x53e   :  { %v2424_v18 = vpack.c.bf16 %v3302_v32, %v3300_v31  ;;  %v3304_v39 = vpop.eup %3303  ;;  %v1347_v31 = vadd.f32 %v4634_v19, %v4892_v30  ;;  %v4893_v32 = vld [vmem:[#allocation32_spill] sm:$0xff]  ;;  %v4903_v30 = vld [vmem:[#allocation37_spill] sm:$0xff] }
 0x53f   :  { %3307 = vtanh.f32 %v2344_v40 }
 0x540   :  { %2440 = vmatmul.bf16.gmra.mxu3 %v2424_v18  ;;  %v2379_v41 = vpop.f32.mrf.mxu2  ;;  %v1369_v18 = vadd.f32 %v4634_v19, %v4893_v32  ;;  %v4904_v32 = vld [vmem:[#allocation29_spill] sm:$0xff] }
 0x541   :  { %v3306_v2 = vpop.eup %3305  ;;  %v2393_v45 = vadd.f32 %v2379_v41, %v1337_v9  ;;  %v1349_v41 = vadd.f32 %v4634_v19, %v4894_v0 }
 0x542   :  { %v2473_v16 = vpack.c.bf16 %v3306_v2, %v3304_v39 }
 0x544   :  { %v2332_v7 = vpop.f32.mrf.mxu1  ;;  %2489 = vmatmul.bf16.gmra.mxu1 %v2473_v16 }
 0x545   :  { %v2345_v62 = vadd.f32 %v2332_v7, %v1319_v50  ;;  %v3308_v4 = vpop.eup %3307 }
 0x547   :  { %3309 = vtanh.f32 %v2345_v62 }
 0x548   :  { %v2381_v36 = vpop.f32.mrf.mxu2  ;;  %3311 = vtanh.f32 %v2393_v45  ;;  %v4895_v45 = vld [vmem:[#allocation33_spill] sm:$0xff] }
 0x549   :  { %v2394_v52 = vadd.f32 %v2381_v36, %v1339_v29  ;;  %v1372_v51 = vadd.f32 %v4634_v19, %v4895_v45  ;;  %v4896_v29 = vld [vmem:[#allocation25_spill] sm:$0xff] }
 0x54a   :  { %v1352_v36 = vadd.f32 %v4634_v19, %v4896_v29 }
 0x54b   :  { %3313 = vtanh.f32 %v2394_v52 }
 0x54c   :  { %v2335_v59 = vpop.f32.mrf.mxu1 }
 0x54d   :  { %v3310_v53 = vpop.eup %3309  ;;  %v2346_v57 = vadd.f32 %v2335_v59, %v1322_v10 }
 0x54e   :  { %v2425_v56 = vpack.c.bf16 %v3310_v53, %v3308_v4  ;;  %v3312_v47 = vpop.eup %3311  ;;  %v1374_v4 = vadd.f32 %v4634_v19, %v4897_v5 }
 0x54f   :  { %3315 = vtanh.f32 %v2346_v57 }
 0x550   :  { %2445 = vmatmul.bf16.gmra.mxu3 %v2425_v56  ;;  %v2384_v33 = vpop.f32.mrf.mxu2  ;;  %v4898_v56 = vld [vmem:[#allocation26_spill] sm:$0xff] }
 0x551   :  { %v3314_v63 = vpop.eup %3313  ;;  %v2395_v15 = vadd.f32 %v2384_v33, %v1342_v44  ;;  %v1354_v54 = vadd.f32 %v4634_v19, %v4898_v56  ;;  %v1377_v44 = vadd.f32 %v4634_v19, %v4899_v13 }
 0x552   :  { %v2474_v1 = vpack.c.bf16 %v3314_v63, %v3312_v47 }
 0x554   :  { %v2337_v61 = vpop.f32.mrf.mxu1  ;;  %2494 = vmatmul.bf16.gmra.mxu1 %v2474_v1 }
 0x555   :  { %v2347_v12 = vadd.f32 %v2337_v61, %v1324_v38  ;;  %v3316_v58 = vpop.eup %3315 }
 0x557   :  { %3317 = vtanh.f32 %v2347_v12  ;;  %v4900_v12 = vld [vmem:[#allocation27_spill] sm:$0xff] }
 0x558   :  { %v2386_v28 = vpop.f32.mrf.mxu2  ;;  %3319 = vtanh.f32 %v2395_v15  ;;  %v1357_v15 = vadd.f32 %v4634_v19, %v4900_v12 }
 0x559   :  { %v2396_v6 = vadd.f32 %v2386_v28, %v1344_v11  ;;  %v1379_v11 = vadd.f32 %v4634_v19, %v4901_v46 }
 0x55b   :  { %3321 = vtanh.f32 %v2396_v6 }
 0x55d   :  { %v3318_v24 = vpop.eup %3317 }
 0x55e   :  { %v2426_v20 = vpack.c.bf16 %v3318_v24, %v3316_v58  ;;  %v3320_v23 = vpop.eup %3319  ;;  %v4902_v58 = vld [vmem:[#allocation28_spill] sm:$0xff] }
 0x55f   :  { %v1359_v24 = vadd.f32 %v4634_v19, %v4902_v58 }
 0x560   :  { %2450 = vmatmul.bf16.gmra.mxu3 %v2426_v20 }
 0x561   :  { %v3322_v25 = vpop.eup %3321 }
 0x562   :  { %v2475_v42 = vpack.c.bf16 %v3322_v25, %v3320_v23 }
 0x564   :  { %2499 = vmatmul.bf16.gmra.mxu1 %v2475_v42 }
 0x5b1   :  { %v2485_v14 = vpop.f32.mrf.mxu1 }
 0x5b2   :  { %v2505_v3 = vadd.f32 %v2485_v14, %v1367_v34 }
 0x5b3   :  { %v2436_v22 = vpop.f32.mrf.mxu3 }
 0x5b4   :  { %v2456_v39 = vadd.f32 %v2436_v22, %v1347_v31  ;;  %3323 = vtanh.f32 %v2505_v3  ;;  %v1382_v31 = vadd.f32 %v4634_v19, %v4903_v30 }
 0x5b9   :  { %v2487_v35 = vpop.f32.mrf.mxu1 }
 0x5ba   :  { %v2506_v2 = vadd.f32 %v2487_v35, %v1369_v18  ;;  %v3324_v37 = vpop.eup %3323  ;;  %v1362_v18 = vadd.f32 %v4634_v19, %v4904_v32  ;;  %v4905_v35 = vld [vmem:[#allocation38_spill] sm:$0xff] }
 0x5bb   :  { %v2438_v40 = vpop.f32.mrf.mxu3  ;;  %v1384_v0 = vadd.f32 %v4634_v19, %v4905_v35 }
 0x5bc   :  { %v2457_v16 = vadd.f32 %v2438_v40, %v1349_v41  ;;  %3325 = vtanh.f32 %v2506_v2  ;;  %v3365_v40 = vld [vmem:[%s4833_s3] ss:$0 sm:$0xff]  ;;  %s3394_s3 = smov [#allocation3]  }
 0x5bd   :  { %3327 = vtanh.f32 %v2456_v39 }
 0x5be   :  { %3329 = vtanh.f32 %v2457_v16  ;;  %v4906_v16 = vld [vmem:[#allocation30_spill] sm:$0xff] }
 0x5c1   :  { %v2490_v50 = vpop.f32.mrf.mxu1 }
 0x5c2   :  { %v3326_v48 = vpop.eup %3325  ;;  %v2507_v52 = vadd.f32 %v2490_v50, %v1372_v51 }
 0x5c3   :  { %v3328_v9 = vpop.eup %3327  ;;  %v2630_v7 = vpack.c.bf16 %v3326_v48, %v3324_v37  ;;  %v2441_v49 = vpop.f32.mrf.mxu3  ;;  %v1364_v37 = vadd.f32 %v3365_v40, %v4906_v16 }
 0x5c4   :  { %v3330_v62 = vpop.eup %3329  ;;  %v2458_v59 = vadd.f32 %v2441_v49, %v1352_v36  ;;  %3331 = vtanh.f32 %v2507_v52 }
 0x5c5   :  { %v2538_v21 = vpack.c.bf16 %v3330_v62, %v3328_v9  ;;  %2642 = vmatmul.bf16.vlgmr.msra.gmra.mxu3 %v2630_v7 }
 0x5c7   :  { %2601 = vmatmul.bf16.vlgmr.msra.gmra.mxu2 %v2538_v21  ;;  %v3098_v21 = vld [vmem:[%s4836_s6] ss:$0 sm:$0xff]  ;;  %s2675_s6 = sshll.u32 %s3394_s3, 4  ;;  %s2676_s6 = int_to_ptr.vmem [resolvable:$true] %s2675_s6 }
 0x5c9   :  { %v2492_v53 = vpop.f32.mrf.mxu1 }
 0x5ca   :  { %v2508_v47 = vadd.f32 %v2492_v53, %v1374_v4  ;;  %v3332_v33 = vpop.eup %3331 }
 0x5cb   :  { %v2443_v27 = vpop.f32.mrf.mxu3 }
 0x5cc   :  { %v2459_v10 = vadd.f32 %v2443_v27, %v1354_v54  ;;  %3333 = vtanh.f32 %v2508_v47 }
 0x5cd   :  { %3335 = vtanh.f32 %v2458_v59 }
 0x5ce   :  { %3337 = vtanh.f32 %v2459_v10 }
 0x5d1   :  { %v2495_v63 = vpop.f32.mrf.mxu1 }
 0x5d2   :  { %v3334_v57 = vpop.eup %3333  ;;  %v2509_v8 = vadd.f32 %v2495_v63, %v1377_v44 }
 0x5d3   :  { %v3336_v1 = vpop.eup %3335  ;;  %v2446_v43 = vpop.f32.mrf.mxu3  ;;  %v2631_v17 = vpack.c.bf16 %v3334_v57, %v3332_v33 }
 0x5d4   :  { %v3338_v38 = vpop.eup %3337  ;;  %v2460_v28 = vadd.f32 %v2446_v43, %v1357_v15  ;;  %3339 = vtanh.f32 %v2509_v8 }
 0x5d5   :  { %v2539_v61 = vpack.c.bf16 %v3338_v38, %v3336_v1  ;;  %2647 = vmatmul.bf16.gmra.mxu3 %v2631_v17 }
 0x5d7   :  { %2606 = vmatmul.bf16.gmra.mxu2 %v2539_v61 }
 0x5d9   :  { %v2497_v6 = vpop.f32.mrf.mxu1 }
 0x5da   :  { %v2510_v20 = vadd.f32 %v2497_v6, %v1379_v11  ;;  %v3340_v42 = vpop.eup %3339 }
 0x5db   :  { %v2448_v23 = vpop.f32.mrf.mxu3 }
 0x5dc   :  { %v2461_v25 = vadd.f32 %v2448_v23, %v1359_v24  ;;  %3341 = vtanh.f32 %v2510_v20 }
 0x5dd   :  { %3343 = vtanh.f32 %v2460_v28 }
 0x5de   :  { %3345 = vtanh.f32 %v2461_v25 }
 0x5e1   :  { %v2500_v55 = vpop.f32.mrf.mxu1 }
 0x5e2   :  { %v3342_v26 = vpop.eup %3341  ;;  %v2511_v39 = vadd.f32 %v2500_v55, %v1382_v31 }
 0x5e3   :  { %v3344_v14 = vpop.eup %3343  ;;  %v2451_v22 = vpop.f32.mrf.mxu3  ;;  %v2632_v60 = vpack.c.bf16 %v3342_v26, %v3340_v42 }
 0x5e4   :  { %v3346_v34 = vpop.eup %3345  ;;  %v2462_v41 = vadd.f32 %v2451_v22, %v1362_v18  ;;  %3347 = vtanh.f32 %v2511_v39 }
 0x5e5   :  { %v2540_v3 = vpack.c.bf16 %v3346_v34, %v3344_v14  ;;  %2652 = vmatmul.bf16.gmra.mxu3 %v2632_v60 }
 0x5e7   :  { %2611 = vmatmul.bf16.gmra.mxu2 %v2540_v3 }
 0x5e9   :  { %v2502_v2 = vpop.f32.mrf.mxu1 }
 0x5ea   :  { %v2512_v50 = vadd.f32 %v2502_v2, %v1384_v0  ;;  %v3348_v7 = vpop.eup %3347 }
 0x5eb   :  { %v2453_v48 = vpop.f32.mrf.mxu3 }
 0x5ec   :  { %v2463_v9 = vadd.f32 %v2453_v48, %v1364_v37  ;;  %3349 = vtanh.f32 %v2512_v50 }
 0x5ed   :  { %3351 = vtanh.f32 %v2462_v41 }
 0x5ee   :  { %3353 = vtanh.f32 %v2463_v9 }
 0x5f2   :  { %v3350_v49 = vpop.eup %3349 }
 0x5f3   :  { %v3352_v62 = vpop.eup %3351  ;;  %v2633_v45 = vpack.c.bf16 %v3350_v49, %v3348_v7 }
 0x5f4   :  { %v3354_v19 = vpop.eup %3353 }
 0x5f5   :  { %v2541_v51 = vpack.c.bf16 %v3354_v19, %v3352_v62  ;;  %2657 = vmatmul.bf16.gmra.mxu3 %v2633_v45 }
 0x5f7   :  { %2616 = vmatmul.bf16.gmra.mxu2 %v2541_v51 }
 0x648   :  { %v2643_v29 = vpop.f32.mrf.mxu3 }
 0x649   :  { %v2644_v36 = vadd.f32 %v3098_v21, %v2643_v29 }
 0x64a   :  { %v2602_v52 = vpop.f32.mrf.mxu2 }
 0x64b   :  { %v2603_v5 = vadd.f32 %v3098_v21, %v2602_v52  ;;  %2663 = vst [vmem:[#allocation3 + $0x40] sm:$0xff] %v2644_v36 }
 0x64d   :  { %2622 = vst [vmem:[#allocation3] sm:$0xff] %v2603_v5 }
 0x650   :  { %v2645_v4 = vpop.f32.mrf.mxu3 }
 0x651   :  { %v2646_v59 = vadd.f32 %v3098_v21, %v2645_v4 }
 0x652   :  { %v2604_v53 = vpop.f32.mrf.mxu2 }
 0x653   :  { %v2605_v56 = vadd.f32 %v3098_v21, %v2604_v53  ;;  %2664 = vst [vmem:[#allocation3 + $0x48] sm:$0xff] %v2646_v59 }
 0x655   :  { %2623 = vst [vmem:[#allocation3 + $0x8] sm:$0xff] %v2605_v56 }
 0x658   :  { %v2648_v54 = vpop.f32.mrf.mxu3 }
 0x659   :  { %v2649_v47 = vadd.f32 %v3098_v21, %v2648_v54 }
 0x65a   :  { %v2607_v27 = vpop.f32.mrf.mxu2 }
 0x65b   :  { %v2608_v10 = vadd.f32 %v3098_v21, %v2607_v27  ;;  %2665 = vst [vmem:[#allocation3 + $0x50] sm:$0xff] %v2649_v47 }
 0x65d   :  { %2624 = vst [vmem:[#allocation3 + $0x10] sm:$0xff] %v2608_v10 }
 0x660   :  { %v2650_v33 = vpop.f32.mrf.mxu3 }
 0x661   :  { %v2651_v63 = vadd.f32 %v3098_v21, %v2650_v33 }
 0x662   :  { %v2609_v57 = vpop.f32.mrf.mxu2 }
 0x663   :  { %v2610_v1 = vadd.f32 %v3098_v21, %v2609_v57  ;;  %2666 = vst [vmem:[#allocation3 + $0x58] sm:$0xff] %v2651_v63 }
 0x665   :  { %2625 = vst [vmem:[#allocation3 + $0x18] sm:$0xff] %v2610_v1 }
 0x668   :  { %v2653_v43 = vpop.f32.mrf.mxu3 }
 0x669   :  { %v2654_v17 = vadd.f32 %v3098_v21, %v2653_v43 }
 0x66a   :  { %v2612_v38 = vpop.f32.mrf.mxu2 }
 0x66b   :  { %v2613_v13 = vadd.f32 %v3098_v21, %v2612_v38  ;;  %2667 = vst [vmem:[#allocation3 + $0x60] sm:$0xff] %v2654_v17 }
 0x66d   :  { %2626 = vst [vmem:[#allocation3 + $0x20] sm:$0xff] %v2613_v13 }
 0x670   :  { %v2655_v44 = vpop.f32.mrf.mxu3 }
 0x671   :  { %v2656_v61 = vadd.f32 %v3098_v21, %v2655_v44 }
 0x672   :  { %v2614_v12 = vpop.f32.mrf.mxu2 }
 0x673   :  { %v2615_v15 = vadd.f32 %v3098_v21, %v2614_v12  ;;  %2668 = vst [vmem:[#allocation3 + $0x68] sm:$0xff] %v2656_v61 }
 0x675   :  { %2627 = vst [vmem:[#allocation3 + $0x28] sm:$0xff] %v2615_v15 }
 0x678   :  { %v2658_v8 = vpop.f32.mrf.mxu3 }
 0x679   :  { %v2659_v46 = vadd.f32 %v3098_v21, %v2658_v8 }
 0x67a   :  { %v2617_v11 = vpop.f32.mrf.mxu2 }
 0x67b   :  { %v2618_v28 = vadd.f32 %v3098_v21, %v2617_v11  ;;  %2669 = vst [vmem:[#allocation3 + $0x70] sm:$0xff] %v2659_v46 }
 0x67d   :  { %2628 = vst [vmem:[#allocation3 + $0x30] sm:$0xff] %v2618_v28 }
 0x680   :  { %v2660_v6 = vpop.f32.mrf.mxu3 }
 0x681   :  { %v2661_v58 = vadd.f32 %v3098_v21, %v2660_v6 }
 0x682   :  { %v2619_v24 = vpop.f32.mrf.mxu2 }
 0x683   :  { %v2620_v20 = vadd.f32 %v3098_v21, %v2619_v24  ;;  %2670 = vst [vmem:[#allocation3 + $0x78] sm:$0xff] %v2661_v58 }
 0x685   :  { %2629 = vst [vmem:[#allocation3 + $0x38] sm:$0xff] %v2620_v20 }
 0x686   :  { %2683 = dma.vmem_to_hbm [thread:$0]  %s2676_s6, 2048, %s2678_s26, [#allocation4], %s3395_s1, %s3395_s1, %s3396_s27  }
 0x687   :  { %3390 = dma.done.wait [#allocation4], 2048  }
 0x688   :  { %3391 = vsyncadd [#allocation4], 4294965248 }
 0x689   :  { %2688 = vsyncpa [#allocation4], 1 }

</bundles_post_ra>
